<compile_context>
chip_gen: v6e
topology: v6e:2x2x1
jax: 0.10.0
libtpu: 0.0.40
codegen_flags: <defaults>
</compile_context>

<pallas_src>
import numpy as np
import jax
import jax.numpy as jnp
from jax import lax
from jax.experimental import pallas as pl
from jax.experimental.pallas import tpu as pltpu

# ---------------- configuration (synthetic "args") ----------------
HIDDEN_DIM = 32        # args.hidden_dim (d_model)
NHEADS = 4             # args.nheads (irrelevant: seq-len-1 attention)
DIM_FF = 64            # args.dim_feedforward
NUM_CLIPS = 16         # args.num_clips (vid_length)
BBOX_WEIGHTS = (2.0, 1.0)
LN_EPS = 1e-5

N = 2                  # batch
NR_BOXES = 8           # proposals per batch element
L_MEM = 20             # memory length (only the first NUM_CLIPS rows are used)

_HIGHEST = jax.lax.Precision.HIGHEST


# =============================================================================
# Packed-parameter layout (shared by the host-side packer and the kernel)
# =============================================================================
def _round8(x):
    return (x + 7) // 8 * 8


def _w_layout(D, F):
    """Sublane-stacked weight slab: name -> (first_row, rows, cols)."""
    entries = [("se_w1", 2, D), ("se_w2", D, D), ("attn_wvo", D, D),
               ("lin1_w", D, F), ("lin2_w", F, D),
               ("tw_scale", 4 * D, D), ("tw_shift", 4 * D, D),
               ("reg_w1", D, D), ("reg_w2", D, D), ("reg_w3s", D, 2)]
    table, off = {}, 0
    for name, r, c in entries:
        table[name] = (off, r, c)
        off += _round8(r)               # keep every block (8,*)-tile aligned
    width = max(c for _, _, c in entries)
    return table, off, width


def _v_layout(D, F):
    """Row-vector slab (biases / LN params / scorer): name -> (row, cols)."""
    entries = [("wsc", D), ("se_b1", D), ("se_b2", D), ("attn_bvo", D),
               ("norm2_g", D), ("norm2_b", D), ("lin1_b", F), ("lin2_b", D),
               ("norm3_g", D), ("norm3_b", D), ("tb_scale", D), ("tb_shift", D),
               ("reg_b1", D), ("reg_b2", D), ("reg_b3s", 2)]
    table = {name: (i, c) for i, (name, c) in enumerate(entries)}
    return table, _round8(len(entries)), max(c for _, c in entries)


# =============================================================================
# Host-side one-time parameter folding + packing (exact algebra, NumPy, no jit)
# =============================================================================
def fold_params(p, D=HIDDEN_DIM, F=DIM_FF):
    g = lambda k: np.asarray(p[k], np.float32)
    # seq-len-1 cross attention: out_proj(v_proj(x)) fold
    wvo = g("attn_wv") @ g("attn_wo")
    bvo = g("attn_bv") @ g("attn_wo") + g("attn_bo")
    # bbox-weight division folded into the last reg-MLP layer
    inv_w = np.array([[1.0 / BBOX_WEIGHTS[0], 1.0 / BBOX_WEIGHTS[1]]], np.float32)
    mats = {"se_w1": g("se_w1"), "se_w2": g("se_w2"), "attn_wvo": wvo,
            "lin1_w": g("lin1_w"), "lin2_w": g("lin2_w"),
            "tw_scale": g("time_w")[:, :D], "tw_shift": g("time_w")[:, D:],
            "reg_w1": g("reg_w1"), "reg_w2": g("reg_w2"),
            "reg_w3s": g("reg_w3") * inv_w}
    vecs = {"wsc": g("wsc"), "se_b1": g("se_b1"), "se_b2": g("se_b2"),
            "attn_bvo": bvo, "norm2_g": g("norm2_g"), "norm2_b": g("norm2_b"),
            "lin1_b": g("lin1_b"), "lin2_b": g("lin2_b"),
            "norm3_g": g("norm3_g"), "norm3_b": g("norm3_b"),
            "tb_scale": g("time_b")[:, :D], "tb_shift": g("time_b")[:, D:],
            "reg_b1": g("reg_b1"), "reg_b2": g("reg_b2"),
            "reg_b3s": g("reg_b3") * inv_w}

    wtab, wrows, wwidth = _w_layout(D, F)
    wslab = np.zeros((wrows, wwidth), np.float32)
    for name, (off, r, c) in wtab.items():
        wslab[off:off + r, :c] = mats[name]

    vtab, vrows, vwidth = _v_layout(D, F)
    vslab = np.zeros((vrows, vwidth), np.float32)
    for name, (k, c) in vtab.items():
        vslab[k, :c] = vecs[name].reshape(-1)

    return {"wslab": jnp.asarray(wslab), "vslab": jnp.asarray(vslab)}


# =============================================================================
# Full forward: ONE grid-less pallas_call, everything resident in VMEM
# =============================================================================
def span_refining_decoder_layer(mask, pos_embed, memory, spans, pro_features,
                                time_emb, packed):
    del mask, pos_embed            # unused by the reference forward pass
    if pro_features is not None:
        # TODO(synk): external pro_features query path is not fused (test uses None).
        raise NotImplementedError("fused kernel covers the pro_features=None path")

    N_, nb = spans.shape[:2]
    D = memory.shape[-1]
    F = DIM_FF
    L = NUM_CLIPS
    M = N_ * nb
    NbL = N_ * L

    # Wrapper side: layout plumbing only (no compute hoisted out of the kernel).
    vis_flat = jnp.transpose(memory[:L], (1, 0, 2)).reshape(NbL, D).astype(jnp.float32)
    spans_flat = spans.reshape(M, 2).astype(jnp.float32)              # kv-order rows
    temb_rep = jnp.repeat(time_emb.astype(jnp.float32), nb, axis=0)   # (M, 4D)

    wtab, _, _ = _w_layout(D, F)
    vtab, _, _ = _v_layout(D, F)

    def kernel(vis_ref, spans_ref, temb_ref, wslab_ref, vslab_ref,
               pred_ref, obj_ref):
        f32 = jnp.float32

        def W(name):                       # static sublane-aligned slab slice
            off, r, c = wtab[name]
            return wslab_ref[off:off + r, 0:c]

        def V(name):                       # one (1, c) row, lane offset 0
            k, c = vtab[name]
            return vslab_ref[k:k + 1, 0:c]

        def mm(a, w, b=None):
            out = jnp.dot(a, w, preferred_element_type=f32, precision=_HIGHEST)
            return out if b is None else out + b

        def layer_norm(x, g, b):
            # E[x^2] - mu^2: the two lane reduces are independent (no serial chain)
            mu = jnp.mean(x, axis=-1, keepdims=True)
            ms = jnp.mean(x * x, axis=-1, keepdims=True)
            var = jnp.maximum(ms - mu * mu, 0.0)
            return (x - mu) * lax.rsqrt(var + LN_EPS) * g + b

        spans_v = spans_ref[...]                                    # (M, 2)
        prop = jnp.clip((spans_v * L).astype(jnp.int32), 0, L - 1)
        s = prop[:, 0:1]
        e = prop[:, 1:2]

        # ---- span pooling: ONE block-diagonal (M, Nb*L) x (Nb*L, D) matmul ----
        vis = vis_ref[...]                                          # (Nb*L, D)
        scores = lax.dot_general(V("wsc"), vis, (((1,), (1,)), ((), ())),
                                 preferred_element_type=f32,
                                 precision=_HIGHEST)                # (1, Nb*L)
        # one global max: softmax is shift-invariant per masked row (bias cancels)
        w_row = jnp.exp(scores - jnp.max(scores, axis=1, keepdims=True))

        r_i = lax.broadcasted_iota(jnp.int32, (M, NbL), 0)
        c_i = lax.broadcasted_iota(jnp.int32, (M, NbL), 1)
        rb = jnp.zeros((M, NbL), jnp.int32)       # row batch id without vector int-div
        for k in range(1, N_):
            rb = rb + (r_i >= k * nb).astype(jnp.int32)
        cs = rb * L + s                            # absolute column bounds per row
        ce = rb * L + e
        mask = jnp.logical_or(jnp.logical_and(c_i >= cs, c_i < ce),
                              jnp.logical_and(s == e, c_i == cs))
        p = jnp.where(mask, jnp.broadcast_to(w_row, (M, NbL)), f32(0.0))
        denom = jnp.maximum(jnp.sum(p, axis=1, keepdims=True), f32(1e-30))
        feat = mm(p, vis) * pl.reciprocal(denom, approx=True)       # (M, D)

        # ---- span_embed: MLP(2 -> D -> D), ReLU between layers ----
        h = jnp.maximum(mm(spans_v, W("se_w1"), V("se_b1")), 0.0)
        sf = feat + mm(h, W("se_w2"), V("se_b2"))                   # (M, D) kv-order

        # ---- folded seq-len-1 cross attention + residual in query order ----
        attn = mm(sf, W("attn_wvo"), V("attn_bvo"))                 # kv-order rows
        # permutation built from iotas: q row r <- kv row (r % nb) * N + r // nb
        qr = lax.broadcasted_iota(jnp.int32, (M, M), 0)
        qc = lax.broadcasted_iota(jnp.int32, (M, M), 1)
        qb = jnp.zeros((M, M), jnp.int32)
        for k in range(1, N_):
            qb = qb + (qr >= k * nb).astype(jnp.int32)
        perm = (qc == (qr - qb * nb) * N_ + qb).astype(f32)
        xn = layer_norm(mm(perm, sf) + attn, V("norm2_g"), V("norm2_b"))

        # ---- FFN + norm3 ----
        ff = mm(jnp.maximum(mm(xn, W("lin1_w"), V("lin1_b")), 0.0),
                W("lin2_w"), V("lin2_b"))
        obj = layer_norm(xn + ff, V("norm3_g"), V("norm3_b"))       # (M, D)
        obj_ref[...] = obj.astype(obj_ref.dtype)

        # ---- time scale/shift (temb pre-repeated; weights pre-split: no lane slice) ----
        t = temb_ref[...]                                           # (M, 4D)
        silu_t = t * jax.nn.sigmoid(t)
        scale = mm(silu_t, W("tw_scale"), V("tb_scale"))            # (M, D)
        shift = mm(silu_t, W("tw_shift"), V("tb_shift"))            # (M, D)
        fc = obj * (scale + 1.0) + shift

        # ---- reg MLP (last layer pre-scaled by 1/bbox_weights) + apply_deltas ----
        r1 = jnp.maximum(mm(fc, W("reg_w1"), V("reg_b1")), 0.0)
        r2 = jnp.maximum(mm(r1, W("reg_w2"), V("reg_b2")), 0.0)
        deltas = mm(r2, W("reg_w3s"), V("reg_b3s"))                 # (M, 2): [dc, dw]

        widths = spans_v[:, 1:2] - spans_v[:, 0:1]
        center = spans_v[:, 0:1] + 0.5 * widths
        pc = center + deltas[:, 0:1]
        pw = jax.nn.sigmoid(jnp.minimum(deltas[:, 1:2], 5.0) + widths)
        # span_cxw_to_xx without a lane concatenate: pred[:, j] = pc + (j - 0.5) * pw
        col = lax.broadcasted_iota(jnp.int32, (M, 2), 1)
        half = jnp.where(col == 0, f32(-0.5), f32(0.5))
        pred_ref[...] = (pc + half * pw).astype(pred_ref.dtype)

    # Advisory cost hint for XLA's scheduler around the custom call.
    flops = 2 * (NbL * D                       # scorer
                 + M * NbL * D                 # block-diagonal pooling
                 + M * 2 * D + M * D * D       # span_embed
                 + M * D * D                   # folded attention
                 + M * M * D                   # query permutation
                 + M * D * F + M * F * D       # FFN
                 + 2 * M * 4 * D * D           # time scale + shift
                 + 2 * M * D * D + M * D * 2)  # reg MLP
    transcendentals = NbL + M * 4 * D + 2 * M
    bytes_accessed = 4 * (vis_flat.size + spans_flat.size + temb_rep.size
                          + packed["wslab"].size + packed["vslab"].size
                          + M * 2 + M * D)

    vspec = pl.BlockSpec(memory_space=pltpu.MemorySpace.VMEM)
    pred_flat, obj_flat = pl.pallas_call(
        kernel,
        out_shape=(jax.ShapeDtypeStruct((M, 2), jnp.float32),
                   jax.ShapeDtypeStruct((M, D), jnp.float32)),
        in_specs=[vspec] * 5,
        out_specs=(vspec, vspec),
        cost_estimate=pl.CostEstimate(flops=flops,
                                      transcendentals=transcendentals,
                                      bytes_accessed=bytes_accessed),
    )(vis_flat, spans_flat, temb_rep, packed["wslab"], packed["vslab"])

    return pred_flat.reshape(N_, nb, 2), obj_flat.reshape(1, M, D)


# =============================================================================
# Deterministic parameter init (weights stored transposed: (in, out))
# =============================================================================
def init_params(key, D, F):
    ks = list(jax.random.split(key, 30))
    it = iter(ks)

    def wmat(shape):
        return jax.random.normal(next(it), shape, jnp.float32) / np.sqrt(shape[0])

    def bias(shape):
        return 0.01 * jax.random.normal(next(it), shape, jnp.float32)

    p = {}
    # scorer: Linear(D, 1) stored as a (1, D) row
    p["wsc"] = jax.random.normal(next(it), (1, D), jnp.float32) / np.sqrt(D)
    p["bsc"] = bias((1, 1))
    # span_embed MLP(2, D, D, 2)
    p["se_w1"], p["se_b1"] = wmat((2, D)), bias((1, D))
    p["se_w2"], p["se_b2"] = wmat((D, D)), bias((1, D))
    # cross attention (value + output projections; query/key cancel for seq-len 1)
    p["attn_wv"], p["attn_bv"] = wmat((D, D)), bias((1, D))
    p["attn_wo"], p["attn_bo"] = wmat((D, D)), bias((1, D))
    # norms
    p["norm2_g"] = 1.0 + 0.05 * jax.random.normal(next(it), (1, D), jnp.float32)
    p["norm2_b"] = bias((1, D))
    p["norm3_g"] = 1.0 + 0.05 * jax.random.normal(next(it), (1, D), jnp.float32)
    p["norm3_b"] = bias((1, D))
    # FFN
    p["lin1_w"], p["lin1_b"] = wmat((D, F)), bias((1, F))
    p["lin2_w"], p["lin2_b"] = wmat((F, D)), bias((1, D))
    # block_time_mlp: Linear(4D, 2D)
    p["time_w"], p["time_b"] = wmat((4 * D, 2 * D)), bias((1, 2 * D))
    # reg_module MLP(D, D, 2, 3)
    p["reg_w1"], p["reg_b1"] = wmat((D, D)), bias((1, D))
    p["reg_w2"], p["reg_b2"] = wmat((D, D)), bias((1, D))
    p["reg_w3"], p["reg_b3"] = wmat((D, 2)), bias((1, 2))
    return p


# =============================================================================
# Pure NumPy reference (mirrors the PyTorch forward, incl. the loop/slice pooling)
# =============================================================================
def reference_forward(memory, spans, time_emb, params):
    P = {k: np.asarray(v, np.float32) for k, v in params.items()}
    mem = np.asarray(memory, np.float32)
    sp = np.asarray(spans, np.float32)
    te = np.asarray(time_emb, np.float32)
    N_, nb = sp.shape[:2]
    D = mem.shape[-1]
    L = NUM_CLIPS
    M = N_ * nb

    prop = np.clip((sp * L).astype(np.int32), 0, L - 1)
    vis = mem[:L].transpose(1, 0, 2)                      # (N, L, D)

    def softmax0(x):
        x = x - x.max(axis=0, keepdims=True)
        e = np.exp(x)
        return e / e.sum(axis=0, keepdims=True)

    feats = np.zeros((N_, nb, D), np.float32)
    for b in range(N_):
        for i in range(nb):
            s, e = int(prop[b, i, 0]), int(prop[b, i, 1])
            f = vis[b, s:s + 1] if s == e else vis[b, s:e]
            sc = f @ P["wsc"].T + P["bsc"]
            w = softmax0(sc)
            feats[b, i] = (w * f).sum(axis=0)

    h = np.maximum(sp.reshape(-1, 2) @ P["se_w1"] + P["se_b1"], 0.0)
    emb = (h @ P["se_w2"] + P["se_b2"]).reshape(N_, nb, D)
    sf = feats + emb

    q_in = sf.reshape(nb, N_, D).transpose(1, 0, 2).reshape(M, D)
    kv = sf.reshape(M, D)

    v = kv @ P["attn_wv"] + P["attn_bv"]
    attn = v @ P["attn_wo"] + P["attn_bo"]
    x = q_in + attn

    def ln(x, g, b):
        mu = x.mean(-1, keepdims=True)
        var = ((x - mu) ** 2).mean(-1, keepdims=True)
        return (x - mu) / np.sqrt(var + LN_EPS) * g + b

    xn = ln(x, P["norm2_g"], P["norm2_b"])
    ff = np.maximum(xn @ P["lin1_w"] + P["lin1_b"], 0.0) @ P["lin2_w"] + P["lin2_b"]
    obj = ln(xn + ff, P["norm3_g"], P["norm3_b"])

    silu = te * (1.0 / (1.0 + np.exp(-te)))
    ss = np.repeat(silu @ P["time_w"] + P["time_b"], nb, axis=0)
    scale, shift = ss[:, :D], ss[:, D:]
    fc = obj * (scale + 1.0) + shift

    r = np.maximum(fc @ P["reg_w1"] + P["reg_b1"], 0.0)
    r = np.maximum(r @ P["reg_w2"] + P["reg_b2"], 0.0)
    deltas = r @ P["reg_w3"] + P["reg_b3"]

    spf = sp.reshape(M, 2)
    widths = spf[:, 1:2] - spf[:, 0:1]
    center = spf[:, 0:1] + 0.5 * widths
    dc = deltas[:, 0:1] / BBOX_WEIGHTS[0]
    dw = np.minimum(deltas[:, 1:2] / BBOX_WEIGHTS[1], 5.0)
    pc = center + dc
    pw = 1.0 / (1.0 + np.exp(-(dw + widths)))
    pred = np.concatenate([pc - 0.5 * pw, pc + 0.5 * pw], axis=-1)
    return pred.reshape(N_, nb, 2), obj.reshape(1, M, D)


# =============================================================================
if __name__ == "__main__":
    key = jax.random.PRNGKey(0)
    k_mem, k_spans, k_time, k_par = jax.random.split(key, 4)

    memory = jax.random.normal(k_mem, (L_MEM, N, HIDDEN_DIM), jnp.float32)
    starts = jax.random.uniform(k_spans, (N, NR_BOXES, 1), minval=0.0, maxval=0.7)
    widths = jax.random.uniform(jax.random.fold_in(k_spans, 1),
                                (N, NR_BOXES, 1), minval=0.02, maxval=0.3)
    spans = jnp.concatenate([starts, jnp.clip(starts + widths, 0.0, 1.0)], axis=-1)
    time_emb = jax.random.normal(k_time, (N, 4 * HIDDEN_DIM), jnp.float32)

    params = init_params(k_par, HIDDEN_DIM, DIM_FF)
    packed = fold_params(params)           # host-side one-time fold + pack (2 slabs)

    fwd = jax.jit(span_refining_decoder_layer)
    pred_spans, obj_features = fwd(None, None, memory, spans, None, time_emb, packed)
    jax.block_until_ready((pred_spans, obj_features))

    assert pred_spans.shape == (N, NR_BOXES, 2)
    assert obj_features.shape == (1, N * NR_BOXES, HIDDEN_DIM)

    ref_pred, ref_obj = reference_forward(memory, spans, time_emb, params)
    # Matmuls run at HIGHEST precision (vs 2e-2 previously with default single-pass);
    # the remaining tolerance is dominated by the EUP approx reciprocal used for
    # the pooling normalizer.
    np.testing.assert_allclose(np.asarray(pred_spans), ref_pred, rtol=5e-3, atol=5e-3)
    np.testing.assert_allclose(np.asarray(obj_features), ref_obj, rtol=5e-3, atol=5e-3)

    print("KERNEL_OK")
</pallas_src>

<mosaic_0001>
module attributes {stable_mosaic.version = 11 : i64} {
  func.func @kernel(%arg0: memref<32x32xf32, #tpu.memory_space<vmem>>, %arg1: memref<16x2xf32, #tpu.memory_space<vmem>>, %arg2: memref<16x128xf32, #tpu.memory_space<vmem>>, %arg3: memref<520x64xf32, #tpu.memory_space<vmem>>, %arg4: memref<16x64xf32, #tpu.memory_space<vmem>>, %arg5: memref<16x2xf32, #tpu.memory_space<vmem>>, %arg6: memref<16x32xf32, #tpu.memory_space<vmem>>) attributes {dimension_semantics = [], scalar_prefetch = 0 : i64, scratch_operands = 0 : i64, tpu.core_type = #tpu.core_type<tc>} {
    %c0 = arith.constant 0 : index
    %c0_0 = arith.constant 0 : index
    %0 = vector.load %arg1[%c0, %c0_0] : memref<16x2xf32, #tpu.memory_space<vmem>>, vector<16x2xf32>
    %cst = arith.constant 1.600000e+01 : f32
    %1 = vector.broadcast %cst : f32 to vector<16x2xf32>
    %2 = arith.mulf %0, %1 : vector<16x2xf32>
    %3 = arith.fptosi %2 : vector<16x2xf32> to vector<16x2xi32>
    %c0_i32 = arith.constant 0 : i32
    %c15_i32 = arith.constant 15 : i32
    %4 = vector.broadcast %c0_i32 : i32 to vector<16x2xi32>
    %5 = arith.maxsi %4, %3 : vector<16x2xi32>
    %6 = vector.broadcast %c15_i32 : i32 to vector<16x2xi32>
    %7 = arith.minsi %6, %5 : vector<16x2xi32>
    %8 = vector.extract_strided_slice %7 {offsets = [0, 0], sizes = [16, 1], strides = [1, 1]} : vector<16x2xi32> to vector<16x1xi32>
    %9 = vector.extract_strided_slice %7 {offsets = [0, 1], sizes = [16, 1], strides = [1, 1]} : vector<16x2xi32> to vector<16x1xi32>
    %c0_1 = arith.constant 0 : index
    %c0_2 = arith.constant 0 : index
    %10 = vector.load %arg0[%c0_1, %c0_2] : memref<32x32xf32, #tpu.memory_space<vmem>>, vector<32x32xf32>
    %c0_3 = arith.constant 0 : index
    %c0_4 = arith.constant 0 : index
    %11 = vector.load %arg4[%c0_3, %c0_4] : memref<16x64xf32, #tpu.memory_space<vmem>>, vector<1x32xf32>
    %cst_5 = arith.constant dense<0.000000e+00> : vector<1x32xf32>
    %12 = tpu.matmul %11, %10, %cst_5 {dimension_numbers = #tpu.dot_dimension_numbers<[1], [1], [0], [0], [0, 0, 1, 0], [], []>, precision = #tpu.contract_precision<fp32>} : vector<1x32xf32>, vector<32x32xf32>, vector<1x32xf32> -> vector<1x32xf32>
    %cst_6 = arith.constant dense<0xFF800000> : vector<1xf32>
    %13 = vector.multi_reduction <maximumf>, %12, %cst_6 [1] : vector<1x32xf32> to vector<1xf32>
    %14 = vector.shape_cast %13 : vector<1xf32> to vector<1x1xf32>
    %15 = vector.broadcast %14 : vector<1x1xf32> to vector<1x32xf32>
    %16 = arith.subf %12, %15 : vector<1x32xf32>
    %17 = math.exp %16 : vector<1x32xf32>
    %18 = tpu.iota {dimensions = array<i32: 0>} : vector<16x32xi32>
    %19 = tpu.iota {dimensions = array<i32: 1>} : vector<16x32xi32>
    %c0_i32_7 = arith.constant 0 : i32
    %20 = vector.broadcast %c0_i32_7 : i32 to vector<16x32xi32>
    %c8_i32 = arith.constant 8 : i32
    %21 = vector.broadcast %c8_i32 : i32 to vector<16x32xi32>
    %22 = arith.cmpi sge, %18, %21 : vector<16x32xi32>
    %23 = arith.extui %22 : vector<16x32xi1> to vector<16x32xi32>
    %24 = arith.addi %20, %23 : vector<16x32xi32>
    %c16_i32 = arith.constant 16 : i32
    %25 = vector.broadcast %c16_i32 : i32 to vector<16x32xi32>
    %26 = arith.muli %24, %25 : vector<16x32xi32>
    %27 = vector.broadcast %8 : vector<16x1xi32> to vector<16x32xi32>
    %28 = arith.addi %26, %27 : vector<16x32xi32>
    %c16_i32_8 = arith.constant 16 : i32
    %29 = vector.broadcast %c16_i32_8 : i32 to vector<16x32xi32>
    %30 = arith.muli %24, %29 : vector<16x32xi32>
    %31 = vector.broadcast %9 : vector<16x1xi32> to vector<16x32xi32>
    %32 = arith.addi %30, %31 : vector<16x32xi32>
    %33 = arith.cmpi sge, %19, %28 : vector<16x32xi32>
    %34 = arith.cmpi slt, %19, %32 : vector<16x32xi32>
    %35 = arith.andi %33, %34 : vector<16x32xi1>
    %36 = arith.cmpi eq, %8, %9 : vector<16x1xi32>
    %37 = arith.cmpi eq, %19, %28 : vector<16x32xi32>
    %38 = vector.broadcast %36 : vector<16x1xi1> to vector<16x32xi1>
    %39 = arith.andi %38, %37 : vector<16x32xi1>
    %40 = arith.ori %35, %39 : vector<16x32xi1>
    %41 = vector.shape_cast %17 : vector<1x32xf32> to vector<1x32xf32>
    %42 = vector.broadcast %41 : vector<1x32xf32> to vector<16x32xf32>
    %cst_9 = arith.constant 0.000000e+00 : f32
    %43 = vector.broadcast %cst_9 : f32 to vector<16x32xf32>
    %44 = arith.select %40, %42, %43 : vector<16x32xi1>, vector<16x32xf32>
    %cst_10 = arith.constant dense<0.000000e+00> : vector<16xf32>
    %45 = vector.multi_reduction <add>, %44, %cst_10 [1] : vector<16x32xf32> to vector<16xf32>
    %46 = vector.shape_cast %45 : vector<16xf32> to vector<16x1xf32>
    %cst_11 = arith.constant 1.000000e-30 : f32
    %47 = vector.broadcast %cst_11 : f32 to vector<16x1xf32>
    %48 = arith.maximumf %46, %47 : vector<16x1xf32>
    %cst_12 = arith.constant dense<0.000000e+00> : vector<16x32xf32>
    %49 = tpu.matmul %44, %10, %cst_12 {dimension_numbers = #tpu.dot_dimension_numbers<[1], [0], [0], [1], [0, 0, 1, 1], [], []>, precision = #tpu.contract_precision<fp32>} : vector<16x32xf32>, vector<32x32xf32>, vector<16x32xf32> -> vector<16x32xf32>
    %50 = tpu.reciprocal %48 {approx = true} : vector<16x1xf32> -> vector<16x1xf32>
    %51 = vector.broadcast %50 : vector<16x1xf32> to vector<16x32xf32>
    %52 = arith.mulf %49, %51 : vector<16x32xf32>
    %c0_13 = arith.constant 0 : index
    %c0_14 = arith.constant 0 : index
    %53 = vector.load %arg3[%c0_13, %c0_14] : memref<520x64xf32, #tpu.memory_space<vmem>>, vector<2x32xf32>
    %c1 = arith.constant 1 : index
    %c0_15 = arith.constant 0 : index
    %54 = vector.load %arg4[%c1, %c0_15] : memref<16x64xf32, #tpu.memory_space<vmem>>, vector<1x32xf32>
    %cst_16 = arith.constant dense<0.000000e+00> : vector<16x32xf32>
    %55 = tpu.matmul %0, %53, %cst_16 {dimension_numbers = #tpu.dot_dimension_numbers<[1], [0], [0], [1], [0, 0, 1, 1], [], []>, precision = #tpu.contract_precision<fp32>} : vector<16x2xf32>, vector<2x32xf32>, vector<16x32xf32> -> vector<16x32xf32>
    %56 = vector.broadcast %54 : vector<1x32xf32> to vector<16x32xf32>
    %57 = arith.addf %55, %56 : vector<16x32xf32>
    %cst_17 = arith.constant 0.000000e+00 : f32
    %58 = vector.broadcast %cst_17 : f32 to vector<16x32xf32>
    %59 = arith.maximumf %57, %58 : vector<16x32xf32>
    %c8 = arith.constant 8 : index
    %c0_18 = arith.constant 0 : index
    %60 = vector.load %arg3[%c8, %c0_18] : memref<520x64xf32, #tpu.memory_space<vmem>>, vector<32x32xf32>
    %c2 = arith.constant 2 : index
    %c0_19 = arith.constant 0 : index
    %61 = vector.load %arg4[%c2, %c0_19] : memref<16x64xf32, #tpu.memory_space<vmem>>, vector<1x32xf32>
    %cst_20 = arith.constant dense<0.000000e+00> : vector<16x32xf32>
    %62 = tpu.matmul %59, %60, %cst_20 {dimension_numbers = #tpu.dot_dimension_numbers<[1], [0], [0], [1], [0, 0, 1, 1], [], []>, precision = #tpu.contract_precision<fp32>} : vector<16x32xf32>, vector<32x32xf32>, vector<16x32xf32> -> vector<16x32xf32>
    %63 = vector.broadcast %61 : vector<1x32xf32> to vector<16x32xf32>
    %64 = arith.addf %62, %63 : vector<16x32xf32>
    %65 = arith.addf %52, %64 : vector<16x32xf32>
    %c40 = arith.constant 40 : index
    %c0_21 = arith.constant 0 : index
    %66 = vector.load %arg3[%c40, %c0_21] : memref<520x64xf32, #tpu.memory_space<vmem>>, vector<32x32xf32>
    %c3 = arith.constant 3 : index
    %c0_22 = arith.constant 0 : index
    %67 = vector.load %arg4[%c3, %c0_22] : memref<16x64xf32, #tpu.memory_space<vmem>>, vector<1x32xf32>
    %cst_23 = arith.constant dense<0.000000e+00> : vector<16x32xf32>
    %68 = tpu.matmul %65, %66, %cst_23 {dimension_numbers = #tpu.dot_dimension_numbers<[1], [0], [0], [1], [0, 0, 1, 1], [], []>, precision = #tpu.contract_precision<fp32>} : vector<16x32xf32>, vector<32x32xf32>, vector<16x32xf32> -> vector<16x32xf32>
    %69 = vector.broadcast %67 : vector<1x32xf32> to vector<16x32xf32>
    %70 = arith.addf %68, %69 : vector<16x32xf32>
    %71 = tpu.iota {dimensions = array<i32: 0>} : vector<16x16xi32>
    %72 = tpu.iota {dimensions = array<i32: 1>} : vector<16x16xi32>
    %c0_i32_24 = arith.constant 0 : i32
    %73 = vector.broadcast %c0_i32_24 : i32 to vector<16x16xi32>
    %c8_i32_25 = arith.constant 8 : i32
    %74 = vector.broadcast %c8_i32_25 : i32 to vector<16x16xi32>
    %75 = arith.cmpi sge, %71, %74 : vector<16x16xi32>
    %76 = arith.extui %75 : vector<16x16xi1> to vector<16x16xi32>
    %77 = arith.addi %73, %76 : vector<16x16xi32>
    %c8_i32_26 = arith.constant 8 : i32
    %78 = vector.broadcast %c8_i32_26 : i32 to vector<16x16xi32>
    %79 = arith.muli %77, %78 : vector<16x16xi32>
    %80 = arith.subi %71, %79 : vector<16x16xi32>
    %c2_i32 = arith.constant 2 : i32
    %81 = vector.broadcast %c2_i32 : i32 to vector<16x16xi32>
    %82 = arith.muli %80, %81 : vector<16x16xi32>
    %83 = arith.addi %82, %77 : vector<16x16xi32>
    %84 = arith.cmpi eq, %72, %83 : vector<16x16xi32>
    %85 = arith.extui %84 : vector<16x16xi1> to vector<16x16xi32>
    %86 = arith.sitofp %85 : vector<16x16xi32> to vector<16x16xf32>
    %cst_27 = arith.constant dense<0.000000e+00> : vector<16x32xf32>
    %87 = tpu.matmul %86, %65, %cst_27 {dimension_numbers = #tpu.dot_dimension_numbers<[1], [0], [0], [1], [0, 0, 1, 1], [], []>, precision = #tpu.contract_precision<fp32>} : vector<16x16xf32>, vector<16x32xf32>, vector<16x32xf32> -> vector<16x32xf32>
    %88 = arith.addf %87, %70 : vector<16x32xf32>
    %c4 = arith.constant 4 : index
    %c0_28 = arith.constant 0 : index
    %89 = vector.load %arg4[%c4, %c0_28] : memref<16x64xf32, #tpu.memory_space<vmem>>, vector<1x32xf32>
    %c5 = arith.constant 5 : index
    %c0_29 = arith.constant 0 : index
    %90 = vector.load %arg4[%c5, %c0_29] : memref<16x64xf32, #tpu.memory_space<vmem>>, vector<1x32xf32>
    %cst_30 = arith.constant dense<0.000000e+00> : vector<16xf32>
    %91 = vector.multi_reduction <add>, %88, %cst_30 [1] : vector<16x32xf32> to vector<16xf32>
    %92 = vector.shape_cast %91 : vector<16xf32> to vector<16x1xf32>
    %cst_31 = arith.constant 3.200000e+01 : f32
    %93 = vector.broadcast %cst_31 : f32 to vector<16x1xf32>
    %94 = arith.divf %92, %93 : vector<16x1xf32>
    %95 = arith.mulf %88, %88 : vector<16x32xf32>
    %cst_32 = arith.constant dense<0.000000e+00> : vector<16xf32>
    %96 = vector.multi_reduction <add>, %95, %cst_32 [1] : vector<16x32xf32> to vector<16xf32>
    %97 = vector.shape_cast %96 : vector<16xf32> to vector<16x1xf32>
    %cst_33 = arith.constant 3.200000e+01 : f32
    %98 = vector.broadcast %cst_33 : f32 to vector<16x1xf32>
    %99 = arith.divf %97, %98 : vector<16x1xf32>
    %100 = arith.mulf %94, %94 : vector<16x1xf32>
    %101 = arith.subf %99, %100 : vector<16x1xf32>
    %cst_34 = arith.constant 0.000000e+00 : f32
    %102 = vector.broadcast %cst_34 : f32 to vector<16x1xf32>
    %103 = arith.maximumf %101, %102 : vector<16x1xf32>
    %104 = vector.broadcast %94 : vector<16x1xf32> to vector<16x32xf32>
    %105 = arith.subf %88, %104 : vector<16x32xf32>
    %cst_35 = arith.constant 9.99999974E-6 : f32
    %106 = vector.broadcast %cst_35 : f32 to vector<16x1xf32>
    %107 = arith.addf %103, %106 : vector<16x1xf32>
    %108 = math.rsqrt %107 : vector<16x1xf32>
    %109 = vector.broadcast %108 : vector<16x1xf32> to vector<16x32xf32>
    %110 = arith.mulf %105, %109 : vector<16x32xf32>
    %111 = vector.broadcast %89 : vector<1x32xf32> to vector<16x32xf32>
    %112 = arith.mulf %110, %111 : vector<16x32xf32>
    %113 = vector.broadcast %90 : vector<1x32xf32> to vector<16x32xf32>
    %114 = arith.addf %112, %113 : vector<16x32xf32>
    %c72 = arith.constant 72 : index
    %c0_36 = arith.constant 0 : index
    %115 = vector.load %arg3[%c72, %c0_36] : memref<520x64xf32, #tpu.memory_space<vmem>>, vector<32x64xf32>
    %c6 = arith.constant 6 : index
    %c0_37 = arith.constant 0 : index
    %116 = vector.load %arg4[%c6, %c0_37] : memref<16x64xf32, #tpu.memory_space<vmem>>, vector<1x64xf32>
    %cst_38 = arith.constant dense<0.000000e+00> : vector<16x64xf32>
    %117 = tpu.matmul %114, %115, %cst_38 {dimension_numbers = #tpu.dot_dimension_numbers<[1], [0], [0], [1], [0, 0, 1, 1], [], []>, precision = #tpu.contract_precision<fp32>} : vector<16x32xf32>, vector<32x64xf32>, vector<16x64xf32> -> vector<16x64xf32>
    %118 = vector.broadcast %116 : vector<1x64xf32> to vector<16x64xf32>
    %119 = arith.addf %117, %118 : vector<16x64xf32>
    %cst_39 = arith.constant 0.000000e+00 : f32
    %120 = vector.broadcast %cst_39 : f32 to vector<16x64xf32>
    %121 = arith.maximumf %119, %120 : vector<16x64xf32>
    %c104 = arith.constant 104 : index
    %c0_40 = arith.constant 0 : index
    %122 = vector.load %arg3[%c104, %c0_40] : memref<520x64xf32, #tpu.memory_space<vmem>>, vector<64x32xf32>
    %c7 = arith.constant 7 : index
    %c0_41 = arith.constant 0 : index
    %123 = vector.load %arg4[%c7, %c0_41] : memref<16x64xf32, #tpu.memory_space<vmem>>, vector<1x32xf32>
    %cst_42 = arith.constant dense<0.000000e+00> : vector<16x32xf32>
    %124 = tpu.matmul %121, %122, %cst_42 {dimension_numbers = #tpu.dot_dimension_numbers<[1], [0], [0], [1], [0, 0, 1, 1], [], []>, precision = #tpu.contract_precision<fp32>} : vector<16x64xf32>, vector<64x32xf32>, vector<16x32xf32> -> vector<16x32xf32>
    %125 = vector.broadcast %123 : vector<1x32xf32> to vector<16x32xf32>
    %126 = arith.addf %124, %125 : vector<16x32xf32>
    %127 = arith.addf %114, %126 : vector<16x32xf32>
    %c8_43 = arith.constant 8 : index
    %c0_44 = arith.constant 0 : index
    %128 = vector.load %arg4[%c8_43, %c0_44] : memref<16x64xf32, #tpu.memory_space<vmem>>, vector<1x32xf32>
    %c9 = arith.constant 9 : index
    %c0_45 = arith.constant 0 : index
    %129 = vector.load %arg4[%c9, %c0_45] : memref<16x64xf32, #tpu.memory_space<vmem>>, vector<1x32xf32>
    %cst_46 = arith.constant dense<0.000000e+00> : vector<16xf32>
    %130 = vector.multi_reduction <add>, %127, %cst_46 [1] : vector<16x32xf32> to vector<16xf32>
    %131 = vector.shape_cast %130 : vector<16xf32> to vector<16x1xf32>
    %cst_47 = arith.constant 3.200000e+01 : f32
    %132 = vector.broadcast %cst_47 : f32 to vector<16x1xf32>
    %133 = arith.divf %131, %132 : vector<16x1xf32>
    %134 = arith.mulf %127, %127 : vector<16x32xf32>
    %cst_48 = arith.constant dense<0.000000e+00> : vector<16xf32>
    %135 = vector.multi_reduction <add>, %134, %cst_48 [1] : vector<16x32xf32> to vector<16xf32>
    %136 = vector.shape_cast %135 : vector<16xf32> to vector<16x1xf32>
    %cst_49 = arith.constant 3.200000e+01 : f32
    %137 = vector.broadcast %cst_49 : f32 to vector<16x1xf32>
    %138 = arith.divf %136, %137 : vector<16x1xf32>
    %139 = arith.mulf %133, %133 : vector<16x1xf32>
    %140 = arith.subf %138, %139 : vector<16x1xf32>
    %cst_50 = arith.constant 0.000000e+00 : f32
    %141 = vector.broadcast %cst_50 : f32 to vector<16x1xf32>
    %142 = arith.maximumf %140, %141 : vector<16x1xf32>
    %143 = vector.broadcast %133 : vector<16x1xf32> to vector<16x32xf32>
    %144 = arith.subf %127, %143 : vector<16x32xf32>
    %cst_51 = arith.constant 9.99999974E-6 : f32
    %145 = vector.broadcast %cst_51 : f32 to vector<16x1xf32>
    %146 = arith.addf %142, %145 : vector<16x1xf32>
    %147 = math.rsqrt %146 : vector<16x1xf32>
    %148 = vector.broadcast %147 : vector<16x1xf32> to vector<16x32xf32>
    %149 = arith.mulf %144, %148 : vector<16x32xf32>
    %150 = vector.broadcast %128 : vector<1x32xf32> to vector<16x32xf32>
    %151 = arith.mulf %149, %150 : vector<16x32xf32>
    %152 = vector.broadcast %129 : vector<1x32xf32> to vector<16x32xf32>
    %153 = arith.addf %151, %152 : vector<16x32xf32>
    %c0_52 = arith.constant 0 : index
    %c0_53 = arith.constant 0 : index
    %154 = vector.load %arg6[%c0_52, %c0_53] : memref<16x32xf32, #tpu.memory_space<vmem>>, vector<16x32xf32>
    tpu.vector_store %arg6[%c0_52, %c0_53], %153 {strides = array<i32>} : memref<16x32xf32, #tpu.memory_space<vmem>>, vector<16x32xf32>,
    %c0_54 = arith.constant 0 : index
    %c0_55 = arith.constant 0 : index
    %155 = vector.load %arg2[%c0_54, %c0_55] : memref<16x128xf32, #tpu.memory_space<vmem>>, vector<16x128xf32>
    %156 = arith.negf %155 : vector<16x128xf32>
    %157 = math.exp %156 : vector<16x128xf32>
    %cst_56 = arith.constant 1.000000e+00 : f32
    %158 = vector.broadcast %cst_56 : f32 to vector<16x128xf32>
    %159 = arith.addf %158, %157 : vector<16x128xf32>
    %160 = arith.divf %158, %159 : vector<16x128xf32>
    %161 = arith.mulf %155, %160 : vector<16x128xf32>
    %c168 = arith.constant 168 : index
    %c0_57 = arith.constant 0 : index
    %162 = vector.load %arg3[%c168, %c0_57] : memref<520x64xf32, #tpu.memory_space<vmem>>, vector<128x32xf32>
    %c10 = arith.constant 10 : index
    %c0_58 = arith.constant 0 : index
    %163 = vector.load %arg4[%c10, %c0_58] : memref<16x64xf32, #tpu.memory_space<vmem>>, vector<1x32xf32>
    %cst_59 = arith.constant dense<0.000000e+00> : vector<16x32xf32>
    %164 = tpu.matmul %161, %162, %cst_59 {dimension_numbers = #tpu.dot_dimension_numbers<[1], [0], [0], [1], [0, 0, 1, 1], [], []>, precision = #tpu.contract_precision<fp32>} : vector<16x128xf32>, vector<128x32xf32>, vector<16x32xf32> -> vector<16x32xf32>
    %165 = vector.broadcast %163 : vector<1x32xf32> to vector<16x32xf32>
    %166 = arith.addf %164, %165 : vector<16x32xf32>
    %c296 = arith.constant 296 : index
    %c0_60 = arith.constant 0 : index
    %167 = vector.load %arg3[%c296, %c0_60] : memref<520x64xf32, #tpu.memory_space<vmem>>, vector<128x32xf32>
    %c11 = arith.constant 11 : index
    %c0_61 = arith.constant 0 : index
    %168 = vector.load %arg4[%c11, %c0_61] : memref<16x64xf32, #tpu.memory_space<vmem>>, vector<1x32xf32>
    %cst_62 = arith.constant dense<0.000000e+00> : vector<16x32xf32>
    %169 = tpu.matmul %161, %167, %cst_62 {dimension_numbers = #tpu.dot_dimension_numbers<[1], [0], [0], [1], [0, 0, 1, 1], [], []>, precision = #tpu.contract_precision<fp32>} : vector<16x128xf32>, vector<128x32xf32>, vector<16x32xf32> -> vector<16x32xf32>
    %170 = vector.broadcast %168 : vector<1x32xf32> to vector<16x32xf32>
    %171 = arith.addf %169, %170 : vector<16x32xf32>
    %cst_63 = arith.constant 1.000000e+00 : f32
    %172 = vector.broadcast %cst_63 : f32 to vector<16x32xf32>
    %173 = arith.addf %166, %172 : vector<16x32xf32>
    %174 = arith.mulf %153, %173 : vector<16x32xf32>
    %175 = arith.addf %174, %171 : vector<16x32xf32>
    %c424 = arith.constant 424 : index
    %c0_64 = arith.constant 0 : index
    %176 = vector.load %arg3[%c424, %c0_64] : memref<520x64xf32, #tpu.memory_space<vmem>>, vector<32x32xf32>
    %c12 = arith.constant 12 : index
    %c0_65 = arith.constant 0 : index
    %177 = vector.load %arg4[%c12, %c0_65] : memref<16x64xf32, #tpu.memory_space<vmem>>, vector<1x32xf32>
    %cst_66 = arith.constant dense<0.000000e+00> : vector<16x32xf32>
    %178 = tpu.matmul %175, %176, %cst_66 {dimension_numbers = #tpu.dot_dimension_numbers<[1], [0], [0], [1], [0, 0, 1, 1], [], []>, precision = #tpu.contract_precision<fp32>} : vector<16x32xf32>, vector<32x32xf32>, vector<16x32xf32> -> vector<16x32xf32>
    %179 = vector.broadcast %177 : vector<1x32xf32> to vector<16x32xf32>
    %180 = arith.addf %178, %179 : vector<16x32xf32>
    %cst_67 = arith.constant 0.000000e+00 : f32
    %181 = vector.broadcast %cst_67 : f32 to vector<16x32xf32>
    %182 = arith.maximumf %180, %181 : vector<16x32xf32>
    %c456 = arith.constant 456 : index
    %c0_68 = arith.constant 0 : index
    %183 = vector.load %arg3[%c456, %c0_68] : memref<520x64xf32, #tpu.memory_space<vmem>>, vector<32x32xf32>
    %c13 = arith.constant 13 : index
    %c0_69 = arith.constant 0 : index
    %184 = vector.load %arg4[%c13, %c0_69] : memref<16x64xf32, #tpu.memory_space<vmem>>, vector<1x32xf32>
    %cst_70 = arith.constant dense<0.000000e+00> : vector<16x32xf32>
    %185 = tpu.matmul %182, %183, %cst_70 {dimension_numbers = #tpu.dot_dimension_numbers<[1], [0], [0], [1], [0, 0, 1, 1], [], []>, precision = #tpu.contract_precision<fp32>} : vector<16x32xf32>, vector<32x32xf32>, vector<16x32xf32> -> vector<16x32xf32>
    %186 = vector.broadcast %184 : vector<1x32xf32> to vector<16x32xf32>
    %187 = arith.addf %185, %186 : vector<16x32xf32>
    %cst_71 = arith.constant 0.000000e+00 : f32
    %188 = vector.broadcast %cst_71 : f32 to vector<16x32xf32>
    %189 = arith.maximumf %187, %188 : vector<16x32xf32>
    %c488 = arith.constant 488 : index
    %c0_72 = arith.constant 0 : index
    %190 = vector.load %arg3[%c488, %c0_72] : memref<520x64xf32, #tpu.memory_space<vmem>>, vector<32x2xf32>
    %c14 = arith.constant 14 : index
    %c0_73 = arith.constant 0 : index
    %191 = vector.load %arg4[%c14, %c0_73] : memref<16x64xf32, #tpu.memory_space<vmem>>, vector<1x2xf32>
    %cst_74 = arith.constant dense<0.000000e+00> : vector<16x2xf32>
    %192 = tpu.matmul %189, %190, %cst_74 {dimension_numbers = #tpu.dot_dimension_numbers<[1], [0], [0], [1], [0, 0, 1, 1], [], []>, precision = #tpu.contract_precision<fp32>} : vector<16x32xf32>, vector<32x2xf32>, vector<16x2xf32> -> vector<16x2xf32>
    %193 = vector.broadcast %191 : vector<1x2xf32> to vector<16x2xf32>
    %194 = arith.addf %192, %193 : vector<16x2xf32>
    %195 = vector.extract_strided_slice %0 {offsets = [0, 1], sizes = [16, 1], strides = [1, 1]} : vector<16x2xf32> to vector<16x1xf32>
    %196 = vector.extract_strided_slice %0 {offsets = [0, 0], sizes = [16, 1], strides = [1, 1]} : vector<16x2xf32> to vector<16x1xf32>
    %197 = arith.subf %195, %196 : vector<16x1xf32>
    %198 = vector.extract_strided_slice %0 {offsets = [0, 0], sizes = [16, 1], strides = [1, 1]} : vector<16x2xf32> to vector<16x1xf32>
    %cst_75 = arith.constant 5.000000e-01 : f32
    %199 = vector.broadcast %cst_75 : f32 to vector<16x1xf32>
    %200 = arith.mulf %199, %197 : vector<16x1xf32>
    %201 = arith.addf %198, %200 : vector<16x1xf32>
    %202 = vector.extract_strided_slice %194 {offsets = [0, 0], sizes = [16, 1], strides = [1, 1]} : vector<16x2xf32> to vector<16x1xf32>
    %203 = arith.addf %201, %202 : vector<16x1xf32>
    %204 = vector.extract_strided_slice %194 {offsets = [0, 1], sizes = [16, 1], strides = [1, 1]} : vector<16x2xf32> to vector<16x1xf32>
    %cst_76 = arith.constant 5.000000e+00 : f32
    %205 = vector.broadcast %cst_76 : f32 to vector<16x1xf32>
    %206 = arith.minimumf %204, %205 : vector<16x1xf32>
    %207 = arith.addf %206, %197 : vector<16x1xf32>
    %208 = arith.negf %207 : vector<16x1xf32>
    %209 = math.exp %208 : vector<16x1xf32>
    %cst_77 = arith.constant 1.000000e+00 : f32
    %210 = vector.broadcast %cst_77 : f32 to vector<16x1xf32>
    %211 = arith.addf %210, %209 : vector<16x1xf32>
    %212 = arith.divf %210, %211 : vector<16x1xf32>
    %213 = tpu.iota {dimensions = array<i32: 1>} : vector<16x2xi32>
    %c0_i32_78 = arith.constant 0 : i32
    %214 = vector.broadcast %c0_i32_78 : i32 to vector<16x2xi32>
    %215 = arith.cmpi eq, %213, %214 : vector<16x2xi32>
    %cst_79 = arith.constant -5.000000e-01 : f32
    %cst_80 = arith.constant 5.000000e-01 : f32
    %216 = vector.broadcast %cst_79 : f32 to vector<16x2xf32>
    %217 = vector.broadcast %cst_80 : f32 to vector<16x2xf32>
    %218 = arith.select %215, %216, %217 : vector<16x2xi1>, vector<16x2xf32>
    %219 = vector.broadcast %212 : vector<16x1xf32> to vector<16x2xf32>
    %220 = arith.mulf %218, %219 : vector<16x2xf32>
    %221 = vector.broadcast %203 : vector<16x1xf32> to vector<16x2xf32>
    %222 = arith.addf %221, %220 : vector<16x2xf32>
    %c0_81 = arith.constant 0 : index
    %c0_82 = arith.constant 0 : index
    %223 = vector.load %arg5[%c0_81, %c0_82] : memref<16x2xf32, #tpu.memory_space<vmem>>, vector<16x2xf32>
    tpu.vector_store %arg5[%c0_81, %c0_82], %222 {strides = array<i32>} : memref<16x2xf32, #tpu.memory_space<vmem>>, vector<16x2xf32>,
    return
  }
}

</mosaic_0001>

<bundles_post_ra>
// kernel: span_refining_decoder_layer.1
= control target key start
LH: loop header
LB: loop body
LE: loop exit
PB: predicated region body
PF: predicated region fallthrough
CT: control target
= control target key end

     0   :  { %vm42_vm0 = vcmask 261120   ;;  %v9507_v3 = vmov 0.0   ;;  %vm9508_vm1 = vmmov 0   ;;  %s11638_s0 = inlined_call_operand.vmem [shape: f32[32,32], index: 0, kind: input, shape index: {}]   ;;  %s11639_s1 = inlined_call_operand.vmem [shape: f32[16,2], index: 1, kind: input, shape index: {}]   ;;  %s11640_s2 = inlined_call_operand.vmem [shape: f32[16,128], index: 2, kind: input, shape index: {}]   ;;  %s11641_s3 = inlined_call_operand.vmem [shape: f32[520,64], index: 3, kind: input, shape index: {}]   ;;  %s11642_s4 = inlined_call_operand.vmem [shape: f32[16,64], index: 4, kind: input, shape index: {}]   ;;  %s11643_s5 = inlined_call_operand.vmem [shape: f32[16,2], index: 5, kind: output, shape index: {0}]   ;;  %s11644_s6 = inlined_call_operand.hbm [shape: f32[16,32], index: 6, kind: output, shape index: {1}]  }
   0x1   :  { %v9555_v0 = vld [vmem:[%s11638_s0 + $0x18] sm:$0xff]  ;;  %v9560_v1 = vld [vmem:[%s11638_s0 + $0x10] sm:$0xff]  ;;  %v9565_v2 = vld [vmem:[%s11638_s0 + $0x8] sm:$0xff]  ;;  %8296 = vmatprep.subr.mxu0 %v9507_v3  ;;  %8307 = vmatprep.subr.mxu1 %v9507_v3 }
   0x2   :  { %v56_v4 = vsel %vm42_vm0, %v9555_v0, 0  ;;  %v53_v5 = vsel %vm42_vm0, %v9560_v1, 0  ;;  %v9576_v6 = vld [vmem:[%s11638_s0] sm:$0xff]  ;;  %v50_v9 = vsel %vm42_vm0, %v9565_v2, 0  ;;  %8304 = vmatprep.mubr.msk.f32.mxu0 %vm9508_vm1, %v9507_v3  ;;  %8315 = vmatprep.mubr.msk.f32.mxu1 %vm9508_vm1, %v9507_v3  ;;  %v9604_v15 = vld [vmem:[%s11639_s1 + $0x8] sm:$0xff] }
   0x3   :  { %v9578_v7 = vand.u32 4294901760, %v56_v4  ;;  %v9580_v8 = vand.u32 4294901760, %v53_v5  ;;  %v41_v10 = vld [vmem:[%s11642_s4] sm:$0x1]  ;;  %v9596_v12 = vand.u32 4294901760, %v50_v9  ;;  %v47_v13 = vsel %vm42_vm0, %v9576_v6, 0 }
   0x4   :  { %v9594_v11 = vld [vmem:[%s11639_s1] sm:$0xff]  ;;  %v44_v14 = vsel %vm42_vm0, %v41_v10, 0  ;;  %v9610_v17 = vand.u32 4294901760, %v47_v13 }
   0x5   :  { %8297 = vmatpush3.xpose.msra.mxu0 %v9578_v7  ;;  %v9608_v16 = vsub.f32 %v56_v4, %v9578_v7  ;;  %v9613_v18 = vsub.f32 %v53_v5, %v9580_v8  ;;  %v9615_v19 = vand.u32 4294901760, %v44_v14 }
   0x6   :  { %12 = vsyncpa [#allocation3], 0  ;;  %8298 = vmatprep.subr.mxu0 %v9507_v3  ;;  %v9619_v20 = vsub.f32 %v50_v9, %v9596_v12  ;;  %v25_v21 = vmul.f32 16.0, %v9594_v11  ;;  %v26_v22 = vmul.f32 16.0, %v9604_v15  ;;  %v9509_v26 = vmov 1   ;;  %s9511_s10 = smov 127  }
   0x7   :  { %v164_v23 = vand.u32 4294901760, %v9608_v16  ;;  %v171_v24 = vand.u32 4294901760, %v9613_v18  ;;  %v9626_v25 = vsub.f32 %v44_v14, %v9615_v19  ;;  %9445 = vset.pattern.permute.xlu0 %v9509_v26  ;;  %v9630_v27 = vsub.f32 %v47_v13, %v9610_v17  ;;  %s9512_s15 = smov 1  }
   0x8   :  { %v9430_v28 = vtrunc.f32 %v25_v21  ;;  %v9432_v29 = vtrunc.f32 %v26_v22  ;;  %v178_v33 = vand.u32 4294901760, %v9619_v20  ;;  %v11645_v34 = vmov 0  }
   0x9   :  { %8299 = vmatpush3.xpose.msra.mxu0 %v9580_v8  ;;  %v165_v30 = vsub.f32 %v9608_v16, %v164_v23  ;;  %v172_v31 = vsub.f32 %v9613_v18, %v171_v24  ;;  %v129_v32 = vand.u32 4294901760, %v9626_v25  ;;  %9444 = vset.pattern.permute.xlu1 %v11645_v34  ;;  %v185_v39 = vand.u32 4294901760, %v9630_v27 }
   0xa   :  { %8300 = vmatprep.subr.mxu0 %v9507_v3  ;;  %v9431_v35 = vcvt.f32.s32 %v9430_v28  ;;  %v9433_v36 = vcvt.f32.s32 %v9432_v29  ;;  %v179_v41 = vsub.f32 %v9619_v20, %v178_v33  ;;  %v9716_v50 = vand.u32 4294901760, %v9555_v0 }
   0xb   :  { %v166_v37 = vand.u32 4294901760, %v165_v30  ;;  %v130_v38 = vsub.f32 %v9626_v25, %v129_v32  ;;  %v173_v40 = vand.u32 4294901760, %v172_v31  ;;  %v186_v48 = vsub.f32 %v9630_v27, %v185_v39 }
   0xc   :  { %vm29_vm2 = vcmp.gt.s32.totalorder %v9431_v35, 0  ;;  %vm31_vm3 = vcmp.gt.s32.totalorder %v9433_v36, 0  ;;  %v180_v47 = vand.u32 4294901760, %v179_v41  ;;  %v9724_v51 = vand.u32 4294901760, %v9560_v1 }
   0xd   :  { %8301 = vmatpush3.xpose.msra.mxu0 %v9596_v12  ;;  %8308 = vmatpush3.xpose.msra.mxu1 %v166_v37  ;;  %v30_v42 = vsel %vm29_vm2, %v9431_v35, 0  ;;  %v32_v43 = vsel %vm31_vm3, %v9433_v36, 0  ;;  %v131_v46 = vand.u32 4294901760, %v130_v38  ;;  %v187_v49 = vand.u32 4294901760, %v186_v48 }
   0xe   :  { %8302 = vmatprep.subr.mxu0 %v9507_v3  ;;  %8309 = vmatprep.subr.mxu1 %v9507_v3  ;;  %vm33_vm4 = vcmp.lt.s32.totalorder %v30_v42, 15  ;;  %vm35_vm5 = vcmp.lt.s32.totalorder %v32_v43, 15  ;;  %v9730_v52 = vand.u32 4294901760, %v9565_v2  ;;  %v9736_v53 = vand.u32 4294901760, %v9576_v6 }
   0xf   :  { %v9653_v44 = vsel %vm33_vm4, %v30_v42, 15  ;;  %v9655_v45 = vsel %vm35_vm5, %v32_v43, 15  ;;  %vm543_vm7 = vcmask 253952  }
  0x10   :  { %583 = vrot.lane.b32.xlu0 %v9653_v44, %s9511_s10  ;;  %565 = vperm.xlu1 %9444, %v9655_v45   ;;  %v9759_v21 = vsub.f32 %v9565_v2, %v9730_v52  ;;  %v9763_v22 = vsub.f32 %v9576_v6, %v9736_v53 }
  0x11   :  { %8303 = vmatpush3.xpose.msra.mxu0 %v9610_v17  ;;  %8310 = vmatpush3.xpose.msra.mxu1 %v173_v40 }
  0x12   :  { %8311 = vmatprep.subr.mxu1 %v9507_v3  ;;  %8318 = vmatprep.subr.mxu0 %v9507_v3 }
  0x14   :  { %8305 = vmatmul.mubr.f32.vlgmr.msra.gmra.mxu0 %v131_v46  ;;  %585 = vrot.lane.b32.xlu0 %v9655_v45, %s9511_s10 }
  0x15   :  { %8312 = vmatpush3.xpose.msra.mxu1 %v180_v47  ;;  %8319 = vmatpush3.xpose.msra.mxu0 %v9608_v16 }
  0x16   :  { %8313 = vmatprep.subr.mxu1 %v9507_v3  ;;  %8320 = vmatprep.subr.mxu0 %v9507_v3 }
  0x17   :  { %8326 = vmatprep.mubr.msk.f32.mxu0 %vm9508_vm1, %v9507_v3  ;;  %9447 = vset.pattern.permute.xlu1 %v9509_v26 }
  0x18   :  { %573 = vperm.xlu0 %9445, %v9655_v45   ;;  %570 = vperm.xlu1 %9447, %v9653_v44  }
  0x19   :  { %8314 = vmatpush3.xpose.msra.mxu1 %v187_v49  ;;  %8321 = vmatpush3.xpose.msra.mxu0 %v9613_v18  ;;  %v1157_v49 = vld [vmem:[%s11641_s3] sm:$0x3] }
  0x1a   :  { %8322 = vmatprep.subr.mxu0 %v9507_v3  ;;  %8329 = vmatprep.subr.mxu1 %v9507_v3 }
  0x1c   :  { %8316 = vmatmul.mubr.f32.vlgmr.msra.gmra.mxu1 %v9615_v19  ;;  %9446 = vset.pattern.permute.xlu0 %v11645_v34 }
  0x1d   :  { %8323 = vmatpush3.xpose.msra.mxu0 %v9619_v20  ;;  %8330 = vmatpush3.xpose.msra.mxu1 %v9578_v7  ;;  %v9755_v20 = vsub.f32 %v9560_v1, %v9724_v51  ;;  %v9775_v1 = vand.u32 4294901760, %v9763_v22 }
  0x1e   :  { %8324 = vmatprep.subr.mxu0 %v9507_v3  ;;  %8331 = vmatprep.subr.mxu1 %v9507_v3 }
  0x1f   :  { %8337 = vmatprep.mubr.msk.f32.mxu1 %vm9508_vm1, %v9507_v3  ;;  %562 = vperm.xlu0 %9446, %v9653_v44   ;;  %v763_v29 = vsub.f32 %v9763_v22, %v9775_v1 }
  0x20   :  { %9448 = vset.pattern.permute.xlu1 %v11645_v34 }
  0x21   :  { %8325 = vmatpush3.xpose.msra.mxu0 %v9630_v27  ;;  %8332 = vmatpush3.xpose.msra.mxu1 %v9580_v8  ;;  %v764_v31 = vand.u32 4294901760, %v763_v29 }
  0x22   :  { %8333 = vmatprep.subr.mxu1 %v9507_v3  ;;  %8340 = vmatprep.subr.mxu0 %v9507_v3 }
  0x24   :  { %8327 = vmatmul.mubr.f32.vlgmr.msra.gmra.mxu0 %v9626_v25 }
  0x25   :  { %8334 = vmatpush3.xpose.msra.mxu1 %v9596_v12  ;;  %8341 = vmatpush3.xpose.msra.mxu0 %v164_v23 }
  0x26   :  { %8335 = vmatprep.subr.mxu1 %v9507_v3  ;;  %8342 = vmatprep.subr.mxu0 %v9507_v3 }
  0x27   :  { %8348 = vmatprep.mubr.msk.f32.mxu0 %vm9508_vm1, %v9507_v3 }
  0x29   :  { %8336 = vmatpush3.xpose.msra.mxu1 %v9610_v17  ;;  %8343 = vmatpush3.xpose.msra.mxu0 %v171_v24  ;;  %v9769_v24 = vand.u32 4294901760, %v9755_v20 }
  0x2a   :  { %8344 = vmatprep.subr.mxu0 %v9507_v3  ;;  %8351 = vmatprep.subr.mxu1 %v9507_v3 }
  0x2b   :  { %v749_v6 = vsub.f32 %v9755_v20, %v9769_v24 }
  0x2c   :  { %8338 = vmatmul.mubr.f32.vlgmr.msra.gmra.mxu1 %v129_v32 }
  0x2d   :  { %8345 = vmatpush3.xpose.msra.mxu0 %v178_v33  ;;  %8352 = vmatpush3.xpose.msra.mxu1 %v9578_v7  ;;  %v750_v28 = vand.u32 4294901760, %v749_v6 }
  0x2e   :  { %8346 = vmatprep.subr.mxu0 %v9507_v3  ;;  %8353 = vmatprep.subr.mxu1 %v9507_v3 }
  0x2f   :  { %8359 = vmatprep.mubr.msk.f32.mxu1 %vm9508_vm1, %v9507_v3 }
  0x31   :  { %8347 = vmatpush3.xpose.msra.mxu0 %v185_v39  ;;  %8354 = vmatpush3.xpose.msra.mxu1 %v9580_v8 }
  0x32   :  { %8355 = vmatprep.subr.mxu1 %v9507_v3  ;;  %8362 = vmatprep.subr.mxu0 %v9716_v50 }
  0x34   :  { %8349 = vmatmul.mubr.f32.vlgmr.msra.gmra.mxu0 %v9615_v19 }
  0x35   :  { %8356 = vmatpush3.xpose.msra.mxu1 %v9596_v12  ;;  %8363 = vmatpush3.msra.mxu0 %v9716_v50 }
  0x36   :  { %8357 = vmatprep.subr.mxu1 %v9507_v3  ;;  %8364 = vmatprep.subr.mxu0 %v9724_v51 }
  0x37   :  { %8365 = vmatpush3.msra.mxu0 %v9724_v51 }
  0x38   :  { %8366 = vmatprep.subr.mxu0 %v9730_v52 }
  0x39   :  { %8358 = vmatpush3.xpose.msra.mxu1 %v9610_v17  ;;  %8367 = vmatpush3.msra.mxu0 %v9730_v52 }
  0x3a   :  { %8368 = vmatprep.subr.mxu0 %v9736_v53 }
  0x3b   :  { %8369 = vmatpush3.msra.mxu0 %v9736_v53 }
  0x3c   :  { %8360 = vmatmul.mubr.f32.vlgmr.msra.gmra.mxu1 %v9615_v19  ;;  %v9751_v19 = vsub.f32 %v9555_v0, %v9716_v50  ;;  %v9772_v0 = vand.u32 4294901760, %v9759_v21 }
  0x3e   :  { %v9766_v23 = vand.u32 4294901760, %v9751_v19  ;;  %8384 = vmatprep.subr.mxu0 %v9751_v19  ;;  %v756_v25 = vsub.f32 %v9759_v21, %v9772_v0 }
  0x40   :  { %v742_v2 = vsub.f32 %v9751_v19, %v9766_v23  ;;  %v757_v30 = vand.u32 4294901760, %v756_v25 }
  0x42   :  { %v743_v27 = vand.u32 4294901760, %v742_v2 }
  0x44   :  { %8373 = vmatprep.subr.mxu1 %v743_v27 }
  0x45   :  { %8374 = vmatpush3.msra.mxu1 %v743_v27  ;;  %v1666_v27 = vld [vmem:[%s11641_s3 + $0x10] sm:$0xff] }
  0x46   :  { %8375 = vmatprep.subr.mxu1 %v750_v28 }
  0x47   :  { %8376 = vmatpush3.msra.mxu1 %v750_v28 }
  0x48   :  { %8377 = vmatprep.subr.mxu1 %v757_v30 }
  0x49   :  { %8378 = vmatpush3.msra.mxu1 %v757_v30  ;;  %v9891_v30 = vand.u32 4294901760, %v1666_v27 }
  0x4a   :  { %8379 = vmatprep.subr.mxu1 %v764_v31 }
  0x4b   :  { %8380 = vmatpush3.msra.mxu1 %v764_v31  ;;  %v1665_v31 = vld [vmem:[%s11641_s3 + $0x8] sm:$0xff] }
  0x4c   :  { %8395 = vmatprep.subr.mxu1 %v9716_v50 }
  0x82   :  { %v584_v54 = vpop.permute.xlu0 %583 }
  0x83   :  { %vm587_vm6 = vcmp.eq.s32.totalorder %v9653_v44, %v584_v54 }
  0x84   :  { %v591_v55 = vsel %vm587_vm6, 1, %v11645_v34 }
  0x85   :  { %594 = vperm.xlu0 %9446, %v591_v55  }
  0x86   :  { %v586_v17 = vpop.permute.xlu0 %585 }
  0x87   :  { %vm588_vm8 = vcmp.eq.s32.totalorder %v9655_v45, %v586_v17 }
  0x88   :  { %v592_v18 = vsel %vm588_vm8, 1, %v11645_v34  ;;  %vm1170_vm8 = vcmask 1041408  }
  0x89   :  { %9450 = vset.pattern.permute.xlu0 %v9509_v26 }
  0x8b   :  { %v566_v32 = vpop.permute.xlu1 %565 }
  0x8c   :  { %v568_v43 = vadd.s32 16, %v566_v32 }
  0x93   :  { %v571_v33 = vpop.permute.xlu1 %570  ;;  %v574_v35 = vpop.permute.xlu0 %573 }
  0x94   :  { %v576_v42 = vadd.s32 16, %v574_v35  ;;  %v9904_v35 = vsub.f32 %v1666_v27, %v9891_v30 }
  0x9a   :  { %v563_v39 = vpop.permute.xlu0 %562 }
  0xd4   :  { %v133_v56 = vpop.f32.mrf.mxu0 }
  0xd6   :  { %v8306_v57 = vpop.f32.mrf.mxu0 }
  0xdc   :  { %v224_v58 = vpop.f32.mrf.mxu1 }
  0xdd   :  { %v225_v5 = vadd.f32 %v224_v58, %v133_v56 }
  0xde   :  { %v8317_v59 = vpop.f32.mrf.mxu1 }
  0xe4   :  { %v304_v60 = vpop.f32.mrf.mxu0 }
  0xe5   :  { %v305_v8 = vadd.f32 %v304_v60, %v225_v5 }
  0xe6   :  { %v8328_v61 = vpop.f32.mrf.mxu0 }
  0xec   :  { %v381_v62 = vpop.f32.mrf.mxu1 }
  0xed   :  { %v382_v9 = vadd.f32 %v381_v62, %v305_v8  ;;  %v1172_v62 = vsel %vm1170_vm8, %v1157_v49, 0 }
  0xee   :  { %v8339_v63 = vpop.f32.mrf.mxu1  ;;  %v9810_v5 = vand.u32 4294901760, %v1172_v62 }
  0xf4   :  { %v464_v4 = vpop.f32.mrf.mxu0 }
  0xf5   :  { %v465_v10 = vadd.f32 %v464_v4, %v382_v9 }
  0xf6   :  { %v8350_v7 = vpop.f32.mrf.mxu0 }
  0xfc   :  { %v539_v12 = vpop.f32.mrf.mxu1 }
  0xfd   :  { %v540_v13 = vadd.f32 %v539_v12, %v465_v10  ;;  %v9817_v12 = vsub.f32 %v1172_v62, %v9810_v5 }
  0xfe   :  { %v8361_v14 = vpop.f32.mrf.mxu1 }
  0xff   :  { %v544_v16 = vsel %vm543_vm7, %v540_v13, -inf  ;;  %v1293_v2 = vand.u32 4294901760, %v9817_v12 }
 0x100   :  { %545 = vmax.xlane.f32.xlu1 %v544_v16  ;;  %v595_v41 = vpop.permute.xlu0 %594 }
 0x101   :  { %vm599_vm12 = vcmp.eq.s32.totalorder %v595_v41, 1 }
 0x111   :  { %597 = vperm.xlu1 %9448, %v592_v18  }
 0x115   :  { %9449 = vset.pattern.permute.xlu1 %v9509_v26  ;;  %v550_v26 = vlaneseq }
 0x117   :  { %v9788_v40 = vand.u32 127, %v550_v26  ;;  %v9790_v45 = vshrl.u32 %v550_v26, 7 }
 0x119   :  { %11650 = vst [vmem:[#allocation5_spill] sm:$0xff] %v9788_v40  ;;  %vm577_vm9 = vcmp.ge.s32.totalorder %v9788_v40, %v563_v39  ;;  %vm579_vm10 = vcmp.lt.s32.totalorder %v9788_v40, %v571_v33  ;;  %vm589_vm11 = vcmp.eq.s32.totalorder %v9788_v40, %v563_v39  ;;  %vm580_vm14 = vcmp.lt.s32.totalorder %v9788_v40, %v576_v42 }
 0x11a   :  { %vm578_vm15 = vcmp.ge.s32.totalorder %v9788_v40, %v568_v43  ;;  %vm581_vm1 = vmand %vm577_vm9, %vm579_vm10  ;;  %v607_v46 = vsub.s32 0, %v9790_v45  ;;  %vm590_vm3 = vcmp.eq.s32.totalorder %v9788_v40, %v568_v43  ;;  %vm1163_vm9 = vcmask 15360  }
 0x11b   :  { %vm601_vm2 = vmand %vm599_vm12, %vm589_vm11  ;;  %v1168_v18 = vsel %vm1163_vm9, %v9604_v15, 0  ;;  %v1294_v15 = vsub.f32 %v9817_v12, %v1293_v2  ;;  %v9913_v39 = vand.u32 4294901760, %v9904_v35  ;;  %vm2767_vm12 = vcmask 130048  }
 0x11c   :  { %vm582_vm5 = vmand %vm578_vm15, %vm580_vm14 }
 0x11d   :  { %vm603_vm6 = vmor %vm581_vm1, %vm601_vm2  ;;  %v1811_v42 = vsub.f32 %v9904_v35, %v9913_v39 }
 0x189   :  { %v546_v36 = vpop.xlane.xlu1 %545 }
 0x18a   :  { %v547_v37 = vsub.f32 %v540_v13, %v546_v36  ;;  %v1165_v13 = vsel %vm1163_vm9, %v9594_v11, 0  ;;  %v1250_v11 = vand.u32 4294901760, %v1168_v18  ;;  %v9906_v36 = vand.u32 4294901760, %v1665_v31 }
 0x18b   :  { %v9824_v17 = vand.u32 4294901760, %v1165_v13 }
 0x18c   :  { %v548_v38 = vmul.f32 1.442695, %v547_v37  ;;  %v9916_v26 = vsub.f32 %v1665_v31, %v9906_v36 }
 0x18d   :  { %v598_v44 = vpop.permute.xlu1 %597  ;;  %v1241_v6 = vsub.f32 %v1165_v13, %v9824_v17 }
 0x18e   :  { %9453 = vpow2.f32 %v548_v38  ;;  %vm600_vm13 = vcmp.eq.s32.totalorder %v598_v44, 1  ;;  %v9923_v43 = vand.u32 4294901760, %v9916_v26  ;;  %v1812_v44 = vand.u32 4294901760, %v1811_v42 }
 0x18f   :  { %vm602_vm4 = vmand %vm600_vm13, %vm590_vm3  ;;  %vm3881_vm13 = vcmask 523264  }
 0x190   :  { %vm604_vm7 = vmor %vm582_vm5, %vm602_vm4 }
 0x19b   :  { %v9454_v47 = vpop.eup %9453 }
 0x19c   :  { %v608_v48 = vrot.slane %v9454_v47, %v607_v46  ;;  %v1818_v46 = vsub.f32 %v9916_v26, %v9923_v43 }
 0x19e   :  { %v610_v54 = vsel %vm604_vm7, %v608_v48, 0.0  ;;  %v609_v55 = vsel %vm603_vm6, %v608_v48, 0.0  ;;  %v1819_v47 = vand.u32 4294901760, %v1818_v46 }
 0x19f   :  { %v614_v56 = vsel %vm42_vm0, %v610_v54, 0.0  ;;  %v623_v57 = vsel %vm42_vm0, %v610_v54, 0  ;;  %v611_v58 = vsel %vm42_vm0, %v609_v55, 0.0  ;;  %v620_v59 = vsel %vm42_vm0, %v609_v55, 0 }
 0x1a0   :  { %v9806_v60 = vand.u32 4294901760, %v623_v57  ;;  %615 = vadd.xlane.f32.xlu1 %v614_v56  ;;  %v694_v61 = vand.u32 4294901760, %v620_v59  ;;  %612 = vadd.xlane.f32.xlu0 %v611_v58 }
 0x1a2   :  { %v705_v63 = vsub.f32 %v623_v57, %v9806_v60  ;;  %v695_v4 = vsub.f32 %v620_v59, %v694_v61  ;;  %8381 = vmatprep.mubr.f32.mxu1 %v694_v61 }
 0x1a3   :  { %8382 = vmatmul.mubr.f32.vlgmr.msra.gmra.mxu1 %v9806_v60 }
 0x1a4   :  { %8396 = vmatpush3.msra.mxu1 %v9716_v50  ;;  %v696_v7 = vand.u32 4294901760, %v695_v4  ;;  %v706_v8 = vand.u32 4294901760, %v705_v63 }
 0x1a5   :  { %8397 = vmatprep.subr.mxu1 %v9724_v51 }
 0x1a6   :  { %8398 = vmatpush3.msra.mxu1 %v9724_v51  ;;  %8403 = vmatprep.mubr.f32.mxu1 %v696_v7  ;;  %v697_v9 = vsub.f32 %v695_v4, %v696_v7  ;;  %v707_v10 = vsub.f32 %v705_v63, %v706_v8 }
 0x1a7   :  { %8399 = vmatprep.subr.mxu1 %v9730_v52 }
 0x1a8   :  { %8400 = vmatpush3.msra.mxu1 %v9730_v52  ;;  %v698_v14 = vand.u32 4294901760, %v697_v9  ;;  %v708_v16 = vand.u32 4294901760, %v707_v10 }
 0x1a9   :  { %8401 = vmatprep.subr.mxu1 %v9736_v53 }
 0x1aa   :  { %8402 = vmatpush3.msra.mxu1 %v9736_v53  ;;  %8370 = vmatprep.mubr.f32.mxu0 %v698_v14 }
 0x1ab   :  { %8404 = vmatmul.mubr.f32.vlgmr.msra.gmra.mxu1 %v706_v8  ;;  %8417 = vmatprep.subr.mxu1 %v9716_v50 }
 0x1ac   :  { %8371 = vmatmul.mubr.f32.vlgmr.msra.gmra.mxu0 %v708_v16  ;;  %8418 = vmatpush3.msra.mxu1 %v9716_v50  ;;  %v1251_v50 = vsub.f32 %v1168_v18, %v1250_v11  ;;  %v7669_v16 = vld [vmem:[%s11642_s4 + $0x1] ss:$0 sm:$0xff] }
 0x1ad   :  { %8385 = vmatpush3.msra.mxu0 %v9751_v19  ;;  %8425 = vmatprep.mubr.f32.mxu1 %v694_v61  ;;  %v1242_v19 = vand.u32 4294901760, %v1241_v6 }
 0x1ae   :  { %8386 = vmatprep.subr.mxu0 %v9755_v20  ;;  %8392 = vmatprep.mubr.f32.mxu0 %v695_v4 }
 0x1af   :  { %8419 = vmatprep.subr.mxu1 %v9724_v51  ;;  %8387 = vmatpush3.msra.mxu0 %v9755_v20  ;;  %v1295_v20 = vand.u32 4294901760, %v1294_v15 }
 0x1b0   :  { %8420 = vmatpush3.msra.mxu1 %v9724_v51  ;;  %8388 = vmatprep.subr.mxu0 %v9759_v21  ;;  %v1252_v51 = vand.u32 4294901760, %v1251_v50 }
 0x1b1   :  { %8421 = vmatprep.subr.mxu1 %v9730_v52  ;;  %8389 = vmatpush3.msra.mxu0 %v9759_v21 }
 0x1b2   :  { %8422 = vmatpush3.msra.mxu1 %v9730_v52  ;;  %8390 = vmatprep.subr.mxu0 %v9763_v22  ;;  %v1243_v52 = vsub.f32 %v1241_v6, %v1242_v19 }
 0x1b3   :  { %8423 = vmatprep.subr.mxu1 %v9736_v53  ;;  %8391 = vmatpush3.msra.mxu0 %v9763_v22 }
 0x1b4   :  { %8424 = vmatpush3.msra.mxu1 %v9736_v53  ;;  %8393 = vmatmul.mubr.f32.vlgmr.msra.gmra.mxu0 %v705_v63  ;;  %v1253_v53 = vsub.f32 %v1251_v50, %v1252_v51  ;;  %v1244_v21 = vand.u32 4294901760, %v1243_v52 }
 0x1b5   :  { %8406 = vmatprep.subr.mxu0 %v9766_v23  ;;  %8426 = vmatmul.mubr.f32.vlgmr.msra.gmra.mxu1 %v9806_v60 }
 0x1b6   :  { %8407 = vmatpush3.msra.mxu0 %v9766_v23  ;;  %8414 = vmatprep.mubr.f32.mxu0 %v694_v61  ;;  %v1254_v22 = vand.u32 4294901760, %v1253_v53  ;;  %v1668_v23 = vld [vmem:[%s11641_s3 + $0x20] sm:$0xff] }
 0x1b7   :  { %8408 = vmatprep.subr.mxu0 %v9769_v24  ;;  %8433 = vmatprep.subr.mxu1 %v1295_v20 }
 0x1b8   :  { %8409 = vmatpush3.msra.mxu0 %v9769_v24  ;;  %8434 = vmatpush3.msra.mxu1 %v1295_v20  ;;  %v9870_v24 = vand.u32 4294901760, %v1668_v23 }
 0x1b9   :  { %8410 = vmatprep.subr.mxu0 %v9772_v0  ;;  %8435 = vmatprep.mubr.f32.mxu1 %v9824_v17 }
 0x1ba   :  { %8411 = vmatpush3.msra.mxu0 %v9772_v0  ;;  %8436 = vmatmul.mubr.f32.vlgmr.msra.gmra.mxu1 %v1250_v11  ;;  %v1667_v0 = vld [vmem:[%s11641_s3 + $0x18] sm:$0xff] }
 0x1bb   :  { %8412 = vmatprep.subr.mxu0 %v9775_v1  ;;  %8443 = vmatprep.subr.mxu1 %v9810_v5  ;;  %v9878_v25 = vand.u32 4294901760, %v1667_v0 }
 0x1bc   :  { %8413 = vmatpush3.msra.mxu0 %v9775_v1  ;;  %8444 = vmatpush3.msra.mxu1 %v9810_v5  ;;  %v9876_v1 = vsub.f32 %v1668_v23, %v9870_v24 }
 0x1bd   :  { %8415 = vmatmul.mubr.f32.vlgmr.msra.gmra.mxu0 %v9806_v60  ;;  %8428 = vmatprep.subr.mxu0 %v9810_v5  ;;  %v9889_v29 = vsub.f32 %v1667_v0, %v9878_v25 }
 0x1be   :  { %8429 = vmatpush3.msra.mxu0 %v9810_v5  ;;  %8430 = vmatprep.mubr.f32.mxu0 %v1244_v21  ;;  %v9886_v28 = vand.u32 4294901760, %v9876_v1 }
 0x1bf   :  { %8438 = vmatprep.subr.mxu0 %v9817_v12  ;;  %8445 = vmatprep.mubr.f32.mxu1 %v1242_v19  ;;  %v9901_v33 = vand.u32 4294901760, %v9889_v29 }
 0x1c0   :  { %8446 = vmatmul.mubr.f32.vlgmr.msra.gmra.mxu1 %v1252_v51  ;;  %8453 = vmatprep.subr.mxu1 %v9810_v5  ;;  %v1797_v32 = vsub.f32 %v9876_v1, %v9886_v28 }
 0x1c1   :  { %8431 = vmatmul.mubr.f32.vlgmr.msra.gmra.mxu0 %v1254_v22  ;;  %8454 = vmatpush3.msra.mxu1 %v9810_v5  ;;  %v1804_v38 = vsub.f32 %v9889_v29, %v9901_v33 }
 0x1c2   :  { %8439 = vmatpush3.msra.mxu0 %v9817_v12  ;;  %8440 = vmatprep.mubr.f32.mxu0 %v1241_v6  ;;  %v1798_v37 = vand.u32 4294901760, %v1797_v32 }
 0x1c3   :  { %8448 = vmatprep.subr.mxu0 %v1293_v2  ;;  %8455 = vmatprep.mubr.f32.mxu1 %v9824_v17  ;;  %v1805_v41 = vand.u32 4294901760, %v1804_v38 }
 0x1c4   :  { %8456 = vmatmul.mubr.f32.vlgmr.msra.gmra.mxu1 %v1250_v11  ;;  %8469 = vmatprep.subr.mxu1 %v1798_v37 }
 0x1c5   :  { %8441 = vmatmul.mubr.f32.vlgmr.msra.gmra.mxu0 %v1251_v50  ;;  %8470 = vmatpush3.msra.mxu1 %v1798_v37 }
 0x1c6   :  { %8449 = vmatpush3.msra.mxu0 %v1293_v2  ;;  %8450 = vmatprep.mubr.f32.mxu0 %v9824_v17 }
 0x1c7   :  { %8458 = vmatprep.subr.mxu0 %v9870_v24  ;;  %8471 = vmatprep.subr.mxu1 %v1805_v41 }
 0x1c8   :  { %8472 = vmatpush3.msra.mxu1 %v1805_v41 }
 0x1c9   :  { %8451 = vmatmul.mubr.f32.vlgmr.msra.gmra.mxu0 %v1250_v11  ;;  %8473 = vmatprep.subr.mxu1 %v1812_v44 }
 0x1ca   :  { %8459 = vmatpush3.msra.mxu0 %v9870_v24  ;;  %8474 = vmatpush3.msra.mxu1 %v1812_v44 }
 0x1cb   :  { %8460 = vmatprep.subr.mxu0 %v9878_v25  ;;  %8475 = vmatprep.subr.mxu1 %v1819_v47 }
 0x1cc   :  { %8461 = vmatpush3.msra.mxu0 %v9878_v25  ;;  %8476 = vmatpush3.msra.mxu1 %v1819_v47 }
 0x1cd   :  { %8462 = vmatprep.subr.mxu0 %v9891_v30  ;;  %8491 = vmatprep.subr.mxu1 %v9870_v24 }
 0x1ce   :  { %8463 = vmatpush3.msra.mxu0 %v9891_v30 }
 0x1cf   :  { %8464 = vmatprep.subr.mxu0 %v9906_v36 }
 0x1d0   :  { %8465 = vmatpush3.msra.mxu0 %v9906_v36 }
 0x1d1   :  { %8480 = vmatprep.subr.mxu0 %v9876_v1 }
 0x263   :  { %v8383_v48 = vpop.f32.mrf.mxu1 }
 0x265   :  { %v801_v54 = vpop.f32.mrf.mxu1 }
 0x26b   :  { %v8405_v57 = vpop.f32.mrf.mxu1 }
 0x26c   :  { %v8372_v49 = vpop.f32.mrf.mxu0 }
 0x26d   :  { %v808_v55 = vadd.f32 %v8383_v48, %v8372_v49  ;;  %v971_v59 = vpop.f32.mrf.mxu1 }
 0x26e   :  { %v700_v56 = vpop.f32.mrf.mxu0 }
 0x26f   :  { %v802_v58 = vadd.f32 %v801_v54, %v700_v56 }
 0x274   :  { %v8394_v60 = vpop.f32.mrf.mxu0 }
 0x275   :  { %v895_v61 = vadd.f32 %v8394_v60, %v808_v55  ;;  %v8427_v62 = vpop.f32.mrf.mxu1 }
 0x276   :  { %v887_v63 = vpop.f32.mrf.mxu0 }
 0x277   :  { %v888_v4 = vadd.f32 %v887_v63, %v802_v58  ;;  %v980_v5 = vadd.f32 %v8405_v57, %v895_v61  ;;  %v1143_v7 = vpop.f32.mrf.mxu1 }
 0x279   :  { %v972_v8 = vadd.f32 %v971_v59, %v888_v4 }
 0x27a   :  { %v8437_v9 = vpop.f32.mrf.mxu1 }
 0x27c   :  { %v1332_v12 = vpop.f32.mrf.mxu1 }
 0x27d   :  { %v8416_v10 = vpop.f32.mrf.mxu0 }
 0x27e   :  { %v1069_v13 = vadd.f32 %v8416_v10, %v980_v5 }
 0x27f   :  { %v1062_v14 = vpop.f32.mrf.mxu0 }
 0x280   :  { %v9932_v17 = vadd.f32 %v8427_v62, %v1069_v13  ;;  %v1063_v18 = vadd.f32 %v1062_v14, %v972_v8  ;;  %v8447_v11 = vpop.f32.mrf.mxu1 }
 0x281   :  { %v8432_v2 = vpop.f32.mrf.mxu0 }
 0x282   :  { %v9934_v6 = vadd.f32 %v1143_v7, %v1063_v18  ;;  %v1257_v15 = vadd.f32 %v8432_v2, %v7669_v16  ;;  %v1493_v52 = vpop.f32.mrf.mxu1 }
 0x283   :  { %v1246_v50 = vpop.f32.mrf.mxu0 }
 0x284   :  { %v1339_v19 = vadd.f32 %v8437_v9, %v1257_v15  ;;  %v1247_v20 = vadd.f32 %v7669_v16, %v1246_v50  ;;  %v8457_v31 = vpop.f32.mrf.mxu1  ;;  %v616_v15 = vpop.xlane.xlu1 %615 }
 0x285   :  { %v8442_v51 = vpop.f32.mrf.mxu0  ;;  %v613_v50 = vpop.xlane.xlu0 %612 }
 0x286   :  { %v1333_v53 = vadd.f32 %v1332_v12, %v1247_v20  ;;  %v1420_v21 = vadd.f32 %v8442_v51, %v1339_v19  ;;  %v1653_v44 = vpop.f32.mrf.mxu1  ;;  %v618_v20 = vmax.f32 %v616_v15, 1e-30  ;;  %v7670_v51 = vld [vmem:[%s11642_s4 + $0x2] ss:$0 sm:$0xff] }
 0x287   :  { %v1412_v22 = vpop.f32.mrf.mxu0 }
 0x288   :  { %v1502_v23 = vadd.f32 %v8447_v11, %v1420_v21  ;;  %v1413_v0 = vadd.f32 %v1412_v22, %v1333_v53  ;;  %9455 = vrcp.f32 %v618_v20 }
 0x289   :  { %v8452_v27 = vpop.f32.mrf.mxu0 }
 0x28a   :  { %v1494_v32 = vadd.f32 %v1493_v52, %v1413_v0  ;;  %v1582_v37 = vadd.f32 %v8452_v27, %v1502_v23  ;;  %v617_v52 = vmax.f32 %v613_v50, 1e-30 }
 0x28b   :  { %v1575_v38 = vpop.f32.mrf.mxu0 }
 0x28c   :  { %v1660_v41 = vadd.f32 %v8457_v31, %v1582_v37  ;;  %v1576_v42 = vadd.f32 %v1575_v38, %v1494_v32  ;;  %9457 = vrcp.f32 %v617_v52 }
 0x28e   :  { %v1664_v46 = vmax.f32 %v1660_v41, 0.0  ;;  %v1654_v47 = vadd.f32 %v1653_v44, %v1576_v42 }
 0x290   :  { %v1678_v48 = vsel %vm42_vm0, %v1664_v46, 0  ;;  %v1663_v49 = vmax.f32 %v1654_v47, 0.0 }
 0x291   :  { %v1759_v54 = vand.u32 4294901760, %v1678_v48 }
 0x292   :  { %v1675_v55 = vsel %vm42_vm0, %v1663_v49, 0 }
 0x293   :  { %v1760_v56 = vsub.f32 %v1678_v48, %v1759_v54  ;;  %v1749_v57 = vand.u32 4294901760, %v1675_v55 }
 0x295   :  { %v1750_v58 = vsub.f32 %v1675_v55, %v1749_v57  ;;  %8477 = vmatprep.mubr.f32.mxu1 %v1749_v57  ;;  %v1761_v59 = vand.u32 4294901760, %v1760_v56  ;;  %v9456_v55 = vpop.eup %9455 }
 0x296   :  { %8478 = vmatmul.mubr.f32.vlgmr.msra.gmra.mxu1 %v1759_v54 }
 0x297   :  { %8492 = vmatpush3.msra.mxu1 %v9870_v24  ;;  %v1751_v60 = vand.u32 4294901760, %v1750_v58  ;;  %v1762_v62 = vsub.f32 %v1760_v56, %v1761_v59 }
 0x298   :  { %8493 = vmatprep.subr.mxu1 %v9878_v25 }
 0x299   :  { %8494 = vmatpush3.msra.mxu1 %v9878_v25  ;;  %8499 = vmatprep.mubr.f32.mxu1 %v1751_v60  ;;  %v1752_v61 = vsub.f32 %v1750_v58, %v1751_v60  ;;  %v1763_v4 = vand.u32 4294901760, %v1762_v62  ;;  %v9458_v60 = vpop.eup %9457 }
 0x29a   :  { %8495 = vmatprep.subr.mxu1 %v9891_v30  ;;  %v1155_v62 = vmul.f32 %v9458_v60, %v9934_v6 }
 0x29b   :  { %8496 = vmatpush3.msra.mxu1 %v9891_v30  ;;  %v1753_v63 = vand.u32 4294901760, %v1752_v61 }
 0x29c   :  { %8497 = vmatprep.subr.mxu1 %v9906_v36 }
 0x29d   :  { %8498 = vmatpush3.msra.mxu1 %v9906_v36  ;;  %8466 = vmatprep.mubr.f32.mxu0 %v1753_v63 }
 0x29e   :  { %8500 = vmatmul.mubr.f32.vlgmr.msra.gmra.mxu1 %v1761_v59  ;;  %8513 = vmatprep.subr.mxu1 %v9870_v24 }
 0x29f   :  { %8467 = vmatmul.mubr.f32.vlgmr.msra.gmra.mxu0 %v1763_v4  ;;  %8514 = vmatpush3.msra.mxu1 %v9870_v24  ;;  %v2213_v24 = vld [vmem:[%s11641_s3 + $0x40] sm:$0xff] }
 0x2a0   :  { %8481 = vmatpush3.msra.mxu0 %v9876_v1  ;;  %8521 = vmatprep.mubr.f32.mxu1 %v1749_v57  ;;  %v9971_v1 = vand.u32 4294901760, %v2213_v24 }
 0x2a1   :  { %8482 = vmatprep.subr.mxu0 %v9889_v29  ;;  %8488 = vmatprep.mubr.f32.mxu0 %v1750_v58 }
 0x2a2   :  { %8515 = vmatprep.subr.mxu1 %v9878_v25  ;;  %8483 = vmatpush3.msra.mxu0 %v9889_v29 }
 0x2a3   :  { %8516 = vmatpush3.msra.mxu1 %v9878_v25  ;;  %8484 = vmatprep.subr.mxu0 %v9904_v35  ;;  %v2212_v25 = vld [vmem:[%s11641_s3 + $0x38] sm:$0xff] }
 0x2a4   :  { %8517 = vmatprep.subr.mxu1 %v9891_v30  ;;  %8485 = vmatpush3.msra.mxu0 %v9904_v35  ;;  %v9979_v29 = vand.u32 4294901760, %v2212_v25 }
 0x2a5   :  { %8518 = vmatpush3.msra.mxu1 %v9891_v30  ;;  %8486 = vmatprep.subr.mxu0 %v9916_v26  ;;  %v2211_v30 = vld [vmem:[%s11641_s3 + $0x30] sm:$0xff] }
 0x2a6   :  { %8519 = vmatprep.subr.mxu1 %v9906_v36  ;;  %8487 = vmatpush3.msra.mxu0 %v9916_v26  ;;  %v9990_v35 = vsub.f32 %v2212_v25, %v9979_v29 }
 0x2a7   :  { %8520 = vmatpush3.msra.mxu1 %v9906_v36  ;;  %8489 = vmatmul.mubr.f32.vlgmr.msra.gmra.mxu0 %v1760_v56  ;;  %v9992_v36 = vand.u32 4294901760, %v2211_v30 }
 0x2a8   :  { %8502 = vmatprep.subr.mxu0 %v9886_v28  ;;  %8522 = vmatmul.mubr.f32.vlgmr.msra.gmra.mxu1 %v1759_v54 }
 0x2a9   :  { %8503 = vmatpush3.msra.mxu0 %v9886_v28  ;;  %8510 = vmatprep.mubr.f32.mxu0 %v1749_v57  ;;  %v9977_v28 = vsub.f32 %v2213_v24, %v9971_v1  ;;  %v10005_v5 = vsub.f32 %v2211_v30, %v9992_v36  ;;  %v1156_v57 = vmul.f32 %v9456_v55, %v9932_v17  ;;  %v552_v24 = vadd.s32 8, %v9790_v45 }
 0x2aa   :  { %8504 = vmatprep.subr.mxu0 %v9901_v33 }
 0x2ab   :  { %8505 = vmatpush3.msra.mxu0 %v9901_v33  ;;  %v9987_v33 = vand.u32 4294901760, %v9977_v28  ;;  %v10014_v10 = vand.u32 4294901760, %v10005_v5 }
 0x2ac   :  { %8506 = vmatprep.subr.mxu0 %v9913_v39 }
 0x2ad   :  { %8507 = vmatpush3.msra.mxu0 %v9913_v39  ;;  %v2210_v39 = vld [vmem:[%s11641_s3 + $0x28] sm:$0xff]  ;;  %v2342_v26 = vsub.f32 %v9977_v28, %v9987_v33  ;;  %v2356_v14 = vsub.f32 %v10005_v5, %v10014_v10 }
 0x2ae   :  { %8508 = vmatprep.subr.mxu0 %v9923_v43  ;;  %v10007_v7 = vand.u32 4294901760, %v2210_v39 }
 0x2af   :  { %8509 = vmatpush3.msra.mxu0 %v9923_v43  ;;  %v10002_v43 = vand.u32 4294901760, %v9990_v35  ;;  %v2343_v8 = vand.u32 4294901760, %v2342_v26  ;;  %v2357_v18 = vand.u32 4294901760, %v2356_v14 }
 0x2b0   :  { %8511 = vmatmul.mubr.f32.vlgmr.msra.gmra.mxu0 %v1759_v54  ;;  %8524 = vmatprep.subr.mxu0 %v9971_v1  ;;  %v10017_v12 = vsub.f32 %v2210_v39, %v10007_v7 }
 0x2b1   :  { %8525 = vmatpush3.msra.mxu0 %v9971_v1  ;;  %v2349_v9 = vsub.f32 %v9990_v35, %v10002_v43  ;;  %8535 = vmatprep.subr.mxu1 %v2343_v8 }
 0x2b2   :  { %8526 = vmatprep.subr.mxu0 %v9979_v29  ;;  %v10024_v16 = vand.u32 4294901760, %v10017_v12  ;;  %8536 = vmatpush3.msra.mxu1 %v2343_v8 }
 0x2b3   :  { %8527 = vmatpush3.msra.mxu0 %v9979_v29  ;;  %v2350_v13 = vand.u32 4294901760, %v2349_v9  ;;  %v7672_v9 = vadd.s32 4294967288, %v552_v24 }
 0x2b4   :  { %8528 = vmatprep.subr.mxu0 %v9992_v36  ;;  %v2363_v2 = vsub.f32 %v10017_v12, %v10024_v16 }
 0x2b5   :  { %8529 = vmatpush3.msra.mxu0 %v9992_v36  ;;  %8537 = vmatprep.subr.mxu1 %v2350_v13 }
 0x2b6   :  { %8530 = vmatprep.subr.mxu0 %v10007_v7  ;;  %8538 = vmatpush3.msra.mxu1 %v2350_v13  ;;  %v2364_v11 = vand.u32 4294901760, %v2363_v2  ;;  %v2758_v2 = vmul.u32 2, %v7672_v9 }
 0x2b7   :  { %8531 = vmatpush3.msra.mxu0 %v10007_v7  ;;  %8539 = vmatprep.subr.mxu1 %v2357_v18 }
 0x2b8   :  { %8546 = vmatprep.subr.mxu0 %v9977_v28  ;;  %8540 = vmatpush3.msra.mxu1 %v2357_v18  ;;  %v2760_v52 = vadd.s32 1, %v2758_v2 }
 0x2b9   :  { %8541 = vmatprep.subr.mxu1 %v2364_v11 }
 0x2ba   :  { %8542 = vmatpush3.msra.mxu1 %v2364_v11  ;;  %vm2762_vm11 = vcmp.eq.s32.totalorder %v9788_v40, %v2760_v52 }
 0x2bb   :  { %8557 = vmatprep.subr.mxu1 %v9971_v1 }
 0x356   :  { %v8479_v53 = vpop.f32.mrf.mxu1 }
 0x358   :  { %v1856_v27 = vpop.f32.mrf.mxu1 }
 0x35e   :  { %v8501_v32 = vpop.f32.mrf.mxu1 }
 0x35f   :  { %v8468_v19 = vpop.f32.mrf.mxu0 }
 0x360   :  { %v1766_v22 = vadd.f32 %v8468_v19, %v7670_v51  ;;  %v2026_v44 = vpop.f32.mrf.mxu1  ;;  %v2757_v19 = vmul.u32 2, %v9790_v45 }
 0x361   :  { %v1755_v21 = vpop.f32.mrf.mxu0 }
 0x362   :  { %v1756_v23 = vadd.f32 %v7670_v51, %v1755_v21  ;;  %v1863_v31 = vadd.f32 %v8479_v53, %v1766_v22  ;;  %vm2761_vm10 = vcmp.eq.s32.totalorder %v9788_v40, %v2757_v19 }
 0x364   :  { %v1857_v41 = vadd.f32 %v1856_v27, %v1756_v23  ;;  %v10078_v23 = vsel %vm2761_vm10, 1.0, %v9507_v3 }
 0x367   :  { %v8490_v0 = vpop.f32.mrf.mxu0 }
 0x368   :  { %v1950_v38 = vadd.f32 %v8490_v0, %v1863_v31  ;;  %v8523_v47 = vpop.f32.mrf.mxu1  ;;  %v2769_v0 = vsel %vm2767_vm12, %v10078_v23, 0 }
 0x369   :  { %v1942_v37 = vpop.f32.mrf.mxu0 }
 0x36a   :  { %v1943_v42 = vadd.f32 %v1942_v37, %v1857_v41  ;;  %v2035_v46 = vadd.f32 %v8501_v32, %v1950_v38  ;;  %v2198_v61 = vpop.f32.mrf.mxu1  ;;  %v7671_v38 = vld [vmem:[%s11642_s4 + $0x3] ss:$0 sm:$0xff] }
 0x36c   :  { %v2027_v54 = vadd.f32 %v2026_v44, %v1943_v42 }
 0x370   :  { %v8512_v48 = vpop.f32.mrf.mxu0 }
 0x371   :  { %v2124_v49 = vadd.f32 %v8512_v48, %v2035_v46 }
 0x372   :  { %v2117_v56 = vpop.f32.mrf.mxu0 }
 0x373   :  { %v2205_v58 = vadd.f32 %v8523_v47, %v2124_v49  ;;  %v2118_v59 = vadd.f32 %v2117_v56, %v2027_v54 }
 0x375   :  { %v2209_v63 = vadd.f32 %v2205_v58, %v1156_v57  ;;  %v2199_v4 = vadd.f32 %v2198_v61, %v2118_v59 }
 0x377   :  { %v2208_v25 = vadd.f32 %v2199_v4, %v1155_v62  ;;  %v2223_v30 = vsel %vm42_vm0, %v2209_v63, 0  ;;  %v10046_v14 = vand.u32 4294901760, %v2209_v63 }
 0x378   :  { %v10037_v39 = vand.u32 4294901760, %v2223_v30 }
 0x379   :  { %v2220_v26 = vsel %vm42_vm0, %v2208_v25, 0  ;;  %v10050_v11 = vand.u32 4294901760, %v2208_v25  ;;  %v10056_v20 = vsub.f32 %v2209_v63, %v10046_v14 }
 0x37a   :  { %v10040_v8 = vand.u32 4294901760, %v2220_v26  ;;  %v2305_v17 = vsub.f32 %v2223_v30, %v10037_v39 }
 0x37b   :  { %v10061_v53 = vsub.f32 %v2208_v25, %v10050_v11  ;;  %v10068_v45 = vand.u32 4294901760, %v10056_v20 }
 0x37c   :  { %8543 = vmatprep.mubr.f32.mxu1 %v10040_v8  ;;  %v2295_v6 = vsub.f32 %v2220_v26, %v10040_v8  ;;  %v2306_v13 = vand.u32 4294901760, %v2305_v17 }
 0x37d   :  { %8544 = vmatmul.mubr.f32.vlgmr.msra.gmra.mxu1 %v10037_v39  ;;  %v10075_v22 = vand.u32 4294901760, %v10061_v53 }
 0x37e   :  { %8558 = vmatpush3.msra.mxu1 %v9971_v1  ;;  %v2296_v18 = vand.u32 4294901760, %v2295_v6  ;;  %v2307_v50 = vsub.f32 %v2305_v17, %v2306_v13 }
 0x37f   :  { %8559 = vmatprep.subr.mxu1 %v9979_v29 }
 0x380   :  { %8560 = vmatpush3.msra.mxu1 %v9979_v29  ;;  %8565 = vmatprep.mubr.f32.mxu1 %v2296_v18  ;;  %v2297_v15 = vsub.f32 %v2295_v6, %v2296_v18  ;;  %v2308_v21 = vand.u32 4294901760, %v2307_v50 }
 0x381   :  { %8561 = vmatprep.subr.mxu1 %v9992_v36 }
 0x382   :  { %8562 = vmatpush3.msra.mxu1 %v9992_v36  ;;  %v2298_v51 = vand.u32 4294901760, %v2297_v15 }
 0x383   :  { %8563 = vmatprep.subr.mxu1 %v10007_v7 }
 0x384   :  { %8564 = vmatpush3.msra.mxu1 %v10007_v7  ;;  %8532 = vmatprep.mubr.f32.mxu0 %v2298_v51 }
 0x385   :  { %8566 = vmatmul.mubr.f32.vlgmr.msra.gmra.mxu1 %v2306_v13  ;;  %8579 = vmatprep.subr.mxu1 %v9971_v1 }
 0x386   :  { %8533 = vmatmul.mubr.f32.vlgmr.msra.gmra.mxu0 %v2308_v21  ;;  %8580 = vmatpush3.msra.mxu1 %v9971_v1  ;;  %v10083_v1 = vsel %vm2762_vm11, 1.0, %v9507_v3  ;;  %v2900_v3 = vsub.f32 %v10061_v53, %v10075_v22 }
 0x387   :  { %8547 = vmatpush3.msra.mxu0 %v9977_v28  ;;  %8587 = vmatprep.mubr.f32.mxu1 %v10040_v8  ;;  %v2893_v28 = vsub.f32 %v10056_v20, %v10068_v45 }
 0x388   :  { %8548 = vmatprep.subr.mxu0 %v9990_v35  ;;  %8554 = vmatprep.mubr.f32.mxu0 %v2295_v6  ;;  %v2901_v27 = vand.u32 4294901760, %v2900_v3 }
 0x389   :  { %8581 = vmatprep.subr.mxu1 %v9979_v29  ;;  %8549 = vmatpush3.msra.mxu0 %v9990_v35  ;;  %v2894_v35 = vand.u32 4294901760, %v2893_v28 }
 0x38a   :  { %8582 = vmatpush3.msra.mxu1 %v9979_v29  ;;  %8550 = vmatprep.subr.mxu0 %v10005_v5  ;;  %v2772_v29 = vsel %vm2767_vm12, %v10083_v1, 0 }
 0x38b   :  { %8583 = vmatprep.subr.mxu1 %v9992_v36  ;;  %8551 = vmatpush3.msra.mxu0 %v10005_v5  ;;  %v2842_v5 = vsub.f32 %v2769_v0, %v2769_v0 }
 0x38c   :  { %8584 = vmatpush3.msra.mxu1 %v9992_v36  ;;  %8552 = vmatprep.subr.mxu0 %v10017_v12  ;;  %v2852_v36 = vsub.f32 %v2772_v29, %v2772_v29 }
 0x38d   :  { %8585 = vmatprep.subr.mxu1 %v10007_v7  ;;  %8553 = vmatpush3.msra.mxu0 %v10017_v12  ;;  %v2843_v12 = vand.u32 4294901760, %v2842_v5 }
 0x38e   :  { %8586 = vmatpush3.msra.mxu1 %v10007_v7  ;;  %8555 = vmatmul.mubr.f32.vlgmr.msra.gmra.mxu0 %v2305_v17  ;;  %v2853_v7 = vand.u32 4294901760, %v2852_v36 }
 0x38f   :  { %8568 = vmatprep.subr.mxu0 %v9987_v33  ;;  %8588 = vmatmul.mubr.f32.vlgmr.msra.gmra.mxu1 %v10037_v39 }
 0x390   :  { %8597 = vmatprep.subr.mxu1 %v2894_v35  ;;  %8569 = vmatpush3.msra.mxu0 %v9987_v33  ;;  %v2844_v33 = vsub.f32 %v2842_v5, %v2843_v12 }
 0x391   :  { %8576 = vmatprep.mubr.f32.mxu0 %v10040_v8  ;;  %8598 = vmatpush3.msra.mxu1 %v2894_v35 }
 0x392   :  { %8570 = vmatprep.subr.mxu0 %v10002_v43  ;;  %8599 = vmatprep.subr.mxu1 %v2901_v27 }
 0x393   :  { %8571 = vmatpush3.msra.mxu0 %v10002_v43  ;;  %8600 = vmatpush3.msra.mxu1 %v2901_v27  ;;  %v2854_v43 = vsub.f32 %v2852_v36, %v2853_v7  ;;  %v3326_v27 = vld [vmem:[%s11641_s3 + $0x60] sm:$0xff] }
 0x394   :  { %8572 = vmatprep.subr.mxu0 %v10014_v10  ;;  %8601 = vmatprep.mubr.msk.f32.mxu1 %vm2767_vm12, %v10078_v23 }
 0x395   :  { %8611 = vmatprep.subr.mxu1 %v10046_v14  ;;  %8573 = vmatpush3.msra.mxu0 %v10014_v10  ;;  %v2845_v10 = vand.u32 4294901760, %v2844_v33  ;;  %v2855_v31 = vand.u32 4294901760, %v2854_v43 }
 0x396   :  { %8602 = vmatmul.mubr.msk.f32.vlgmr.msra.gmra.mxu1 %vm2767_vm12, %v10083_v1  ;;  %8574 = vmatprep.subr.mxu0 %v10024_v16 }
 0x397   :  { %8612 = vmatpush3.msra.mxu1 %v10046_v14  ;;  %8575 = vmatpush3.msra.mxu0 %v10024_v16 }
 0x398   :  { %8613 = vmatprep.subr.mxu1 %v10050_v11  ;;  %8577 = vmatmul.mubr.f32.vlgmr.msra.gmra.mxu0 %v10037_v39 }
 0x399   :  { %8614 = vmatpush3.msra.mxu1 %v10050_v11  ;;  %8590 = vmatprep.subr.mxu0 %v10046_v14 }
 0x39a   :  { %8615 = vmatprep.mubr.f32.mxu1 %v2843_v12  ;;  %8625 = vmatprep.subr.mxu1 %v10046_v14  ;;  %v10165_v12 = vand.u32 4294901760, %v3326_v27 }
 0x39b   :  { %8591 = vmatpush3.msra.mxu0 %v10046_v14  ;;  %8616 = vmatmul.mubr.f32.vlgmr.msra.gmra.mxu1 %v2853_v7  ;;  %v3325_v7 = vld [vmem:[%s11641_s3 + $0x58] sm:$0xff] }
 0x39c   :  { %8626 = vmatpush3.msra.mxu1 %v10046_v14  ;;  %8592 = vmatprep.subr.mxu0 %v10050_v11  ;;  %v10171_v33 = vsub.f32 %v3326_v27, %v10165_v12  ;;  %v10173_v43 = vand.u32 4294901760, %v3325_v7 }
 0x39d   :  { %8627 = vmatprep.subr.mxu1 %v10050_v11  ;;  %8593 = vmatpush3.msra.mxu0 %v10050_v11 }
 0x39e   :  { %8594 = vmatprep.mubr.f32.mxu0 %v2845_v10  ;;  %8628 = vmatpush3.msra.mxu1 %v10050_v11  ;;  %v3324_v10 = vld [vmem:[%s11641_s3 + $0x50] sm:$0xff] }
 0x39f   :  { %8595 = vmatmul.mubr.f32.vlgmr.msra.gmra.mxu0 %v2855_v31  ;;  %8604 = vmatprep.subr.mxu0 %v10056_v20  ;;  %v10181_v31 = vand.u32 4294901760, %v10171_v33 }
 0x3a0   :  { %8605 = vmatpush3.msra.mxu0 %v10056_v20  ;;  %8608 = vmatprep.mubr.f32.mxu0 %v2842_v5 }
 0x3a1   :  { %8606 = vmatprep.subr.mxu0 %v10061_v53  ;;  %8629 = vmatprep.mubr.msk.f32.mxu1 %vm2767_vm12, %v10078_v23 }
 0x3a2   :  { %8607 = vmatpush3.msra.mxu0 %v10061_v53  ;;  %8630 = vmatmul.mubr.msk.f32.vlgmr.msra.gmra.mxu1 %vm2767_vm12, %v10083_v1 }
 0x3a3   :  { %8609 = vmatmul.mubr.f32.vlgmr.msra.gmra.mxu0 %v2852_v36  ;;  %8618 = vmatprep.subr.mxu0 %v10068_v45 }
 0x3a4   :  { %8619 = vmatpush3.msra.mxu0 %v10068_v45  ;;  %8622 = vmatprep.mubr.msk.f32.mxu0 %vm2767_vm12, %v10078_v23 }
 0x3a5   :  { %8620 = vmatprep.subr.mxu0 %v10075_v22 }
 0x3a6   :  { %8621 = vmatpush3.msra.mxu0 %v10075_v22 }
 0x3a7   :  { %8623 = vmatmul.mubr.msk.f32.vlgmr.msra.gmra.mxu0 %vm2767_vm12, %v10083_v1  ;;  %8632 = vmatprep.subr.mxu0 %v10165_v12 }
 0x3a8   :  { %8633 = vmatpush3.msra.mxu0 %v10165_v12 }
 0x3a9   :  { %8634 = vmatprep.subr.mxu0 %v10173_v43 }
 0x3aa   :  { %8635 = vmatpush3.msra.mxu0 %v10173_v43 }
 0x43d   :  { %v8545_v16 = vpop.f32.mrf.mxu1 }
 0x43f   :  { %v2401_v37 = vpop.f32.mrf.mxu1 }
 0x445   :  { %v8567_v41 = vpop.f32.mrf.mxu1 }
 0x446   :  { %v8534_v32 = vpop.f32.mrf.mxu0 }
 0x447   :  { %v2311_v44 = vadd.f32 %v8534_v32, %v7671_v38  ;;  %v2571_v47 = vpop.f32.mrf.mxu1  ;;  %v10186_v32 = vand.u32 4294901760, %v3324_v10 }
 0x448   :  { %v2300_v42 = vpop.f32.mrf.mxu0 }
 0x449   :  { %v2301_v48 = vadd.f32 %v7671_v38, %v2300_v42  ;;  %v2408_v49 = vadd.f32 %v8545_v16, %v2311_v44  ;;  %v10184_v16 = vsub.f32 %v3325_v7, %v10173_v43  ;;  %v3455_v38 = vsub.f32 %v10171_v33, %v10181_v31  ;;  %8636 = vmatprep.subr.mxu0 %v10186_v32 }
 0x44a   :  { %v10199_v42 = vsub.f32 %v3324_v10, %v10186_v32  ;;  %8637 = vmatpush3.msra.mxu0 %v10186_v32 }
 0x44b   :  { %v2402_v57 = vadd.f32 %v2401_v37, %v2301_v48  ;;  %v3323_v37 = vld [vmem:[%s11641_s3 + $0x48] sm:$0xff] }
 0x44c   :  { %v10201_v44 = vand.u32 4294901760, %v3323_v37  ;;  %v10208_v48 = vand.u32 4294901760, %v10199_v42 }
 0x44e   :  { %v8556_v46 = vpop.f32.mrf.mxu0  ;;  %8638 = vmatprep.subr.mxu0 %v10201_v44 }
 0x44f   :  { %v8589_v54 = vpop.f32.mrf.mxu1  ;;  %v2495_v56 = vadd.f32 %v8556_v46, %v2408_v49  ;;  %v3456_v46 = vand.u32 4294901760, %v3455_v38  ;;  %v10211_v49 = vsub.f32 %v3323_v37, %v10201_v44  ;;  %8639 = vmatpush3.msra.mxu0 %v10201_v44 }
 0x450   :  { %v2487_v55 = vpop.f32.mrf.mxu0  ;;  %8654 = vmatprep.subr.mxu0 %v10171_v33 }
 0x451   :  { %v2488_v58 = vadd.f32 %v2487_v55, %v2402_v57  ;;  %v2743_v59 = vpop.f32.mrf.mxu1  ;;  %v2580_v60 = vadd.f32 %v8567_v41, %v2495_v56  ;;  %v10196_v41 = vand.u32 4294901760, %v10184_v16  ;;  %8643 = vmatprep.subr.mxu1 %v3456_v46  ;;  %v3469_v55 = vsub.f32 %v10199_v42, %v10208_v48 }
 0x452   :  { %v10218_v56 = vand.u32 4294901760, %v10211_v49  ;;  %8644 = vmatpush3.msra.mxu1 %v3456_v46 }
 0x453   :  { %v2572_v4 = vadd.f32 %v2571_v47, %v2488_v58  ;;  %v3462_v47 = vsub.f32 %v10184_v16, %v10196_v41  ;;  %v3470_v57 = vand.u32 4294901760, %v3469_v55 }
 0x454   :  { %v3476_v58 = vsub.f32 %v10211_v49, %v10218_v56 }
 0x456   :  { %v8603_v61 = vpop.f32.mrf.mxu1 }
 0x458   :  { %v8578_v62 = vpop.f32.mrf.mxu0  ;;  %v2938_v30 = vpop.f32.mrf.mxu1 }
 0x459   :  { %v2669_v63 = vadd.f32 %v8578_v62, %v2580_v60 }
 0x45a   :  { %v2662_v24 = vpop.f32.mrf.mxu0 }
 0x45b   :  { %v2663_v25 = vadd.f32 %v2662_v24, %v2572_v4  ;;  %v2750_v39 = vadd.f32 %v8589_v54, %v2669_v63  ;;  %v8617_v17 = vpop.f32.mrf.mxu1  ;;  %v3463_v54 = vand.u32 4294901760, %v3462_v47 }
 0x45d   :  { %v2744_v26 = vadd.f32 %v2743_v59, %v2663_v25  ;;  %v3102_v2 = vpop.f32.mrf.mxu1  ;;  %8645 = vmatprep.subr.mxu1 %v3463_v54  ;;  %v3477_v59 = vand.u32 4294901760, %v3476_v58  ;;  %v3870_v58 = vld [vmem:[%s11641_s3 + $0x78] sm:$0xff] }
 0x45e   :  { %8646 = vmatpush3.msra.mxu1 %v3463_v54 }
 0x45f   :  { %v8596_v8 = vpop.f32.mrf.mxu0  ;;  %8647 = vmatprep.subr.mxu1 %v3470_v57 }
 0x460   :  { %v2858_v9 = vadd.f32 %v8596_v8, %v2750_v39  ;;  %8648 = vmatpush3.msra.mxu1 %v3470_v57 }
 0x461   :  { %v2847_v6 = vpop.f32.mrf.mxu0  ;;  %8649 = vmatprep.subr.mxu1 %v3477_v59 }
 0x462   :  { %v2945_v13 = vadd.f32 %v8603_v61, %v2858_v9  ;;  %v2848_v14 = vadd.f32 %v2847_v6, %v2744_v26  ;;  %v8631_v52 = vpop.f32.mrf.mxu1  ;;  %8650 = vmatpush3.msra.mxu1 %v3477_v59 }
 0x463   :  { %v8610_v18 = vpop.f32.mrf.mxu0  ;;  %8665 = vmatprep.subr.mxu1 %v10165_v12 }
 0x464   :  { %v2939_v11 = vadd.f32 %v2938_v30, %v2848_v14  ;;  %v3028_v15 = vadd.f32 %v8610_v18, %v2945_v13  ;;  %v3266_v1 = vpop.f32.mrf.mxu1 }
 0x465   :  { %v3020_v50 = vpop.f32.mrf.mxu0 }
 0x466   :  { %v3111_v19 = vadd.f32 %v8617_v17, %v3028_v15  ;;  %v3021_v20 = vadd.f32 %v3020_v50, %v2939_v11  ;;  %v7681_v11 = vld [vmem:[%s11642_s4 + $0x4] ss:$0 sm:$0xff] }
 0x467   :  { %v8624_v51 = vpop.f32.mrf.mxu0 }
 0x468   :  { %v3103_v53 = vadd.f32 %v3102_v2, %v3021_v20  ;;  %v3194_v21 = vadd.f32 %v8624_v51, %v3111_v19  ;;  %v7682_v20 = vld [vmem:[%s11642_s4 + $0x5] ss:$0 sm:$0xff] }
 0x469   :  { %v3187_v45 = vpop.f32.mrf.mxu0 }
 0x46a   :  { %v10148_v22 = vadd.f32 %v8631_v52, %v3194_v21  ;;  %v3188_v23 = vadd.f32 %v3187_v45, %v3103_v53 }
 0x46c   :  { %v10150_v28 = vadd.f32 %v3266_v1, %v3188_v23  ;;  %v3281_v0 = vsel %vm42_vm0, %v10148_v22, 0.0  ;;  %v3288_v5 = vmul.f32 %v10148_v22, %v10148_v22 }
 0x46d   :  { %3282 = vadd.xlane.f32.xlu0 %v3281_v0 }
 0x46e   :  { %v3287_v3 = vmul.f32 %v10150_v28, %v10150_v28  ;;  %v3278_v35 = vsel %vm42_vm0, %v10150_v28, 0.0  ;;  %v3292_v36 = vsel %vm42_vm0, %v3288_v5, 0.0 }
 0x470   :  { %v3289_v29 = vsel %vm42_vm0, %v3287_v3, 0.0 }
 0x471   :  { %3290 = vadd.xlane.f32.xlu1 %v3289_v29  ;;  %3279 = vadd.xlane.f32.xlu0 %v3278_v35 }
 0x475   :  { %3293 = vadd.xlane.f32.xlu0 %v3292_v36 }
 0x4f6   :  { %v3283_v60 = vpop.xlane.xlu0 %3282 }
 0x4f7   :  { %v3286_v63 = vmul.f32 0.03125, %v3283_v60 }
 0x4f9   :  { %v3298_v39 = vmul.f32 %v3286_v63, %v3286_v63  ;;  %v3304_v15 = vsub.f32 %v10148_v22, %v3286_v63 }
 0x4fa   :  { %v3291_v61 = vpop.xlane.xlu1 %3290  ;;  %v3280_v62 = vpop.xlane.xlu0 %3279 }
 0x4fb   :  { %v3285_v4 = vmul.f32 0.03125, %v3280_v62  ;;  %v3295_v24 = vmul.f32 0.03125, %v3291_v61  ;;  %v10336_v62 = vand.u32 4294901760, %v3870_v58 }
 0x4fd   :  { %v3297_v25 = vmul.f32 %v3285_v4, %v3285_v4  ;;  %v3303_v18 = vsub.f32 %v10150_v28, %v3285_v4  ;;  %v3869_v4 = vld [vmem:[%s11641_s3 + $0x70] sm:$0xff] }
 0x4fe   :  { %v3294_v30 = vpop.xlane.xlu0 %3293 }
 0x4ff   :  { %v3299_v26 = vsub.f32 %v3295_v24, %v3297_v25  ;;  %v3296_v8 = vmul.f32 0.03125, %v3294_v30  ;;  %v10348_v30 = vsub.f32 %v3870_v58, %v10336_v62 }
 0x501   :  { %v3301_v17 = vmax.f32 %v3299_v26, 0.0  ;;  %v3300_v9 = vsub.f32 %v3296_v8, %v3298_v39  ;;  %v10350_v39 = vand.u32 4294901760, %v3869_v4  ;;  %v3868_v8 = vld [vmem:[%s11641_s3 + $0x68] sm:$0xff] }
 0x503   :  { %v3305_v6 = vadd.f32 1e-05, %v3301_v17  ;;  %v3302_v13 = vmax.f32 %v3300_v9, 0.0  ;;  %v10361_v9 = vand.u32 4294901760, %v10348_v30 }
 0x505   :  { %9459 = vrsqrt.f32 %v3305_v6  ;;  %v3306_v14 = vadd.f32 1e-05, %v3302_v13  ;;  %v10364_v6 = vsub.f32 %v3869_v4, %v10350_v39  ;;  %v10366_v13 = vand.u32 4294901760, %v3868_v8 }
 0x507   :  { %9461 = vrsqrt.f32 %v3306_v14 }
 0x512   :  { %v9460_v2 = vpop.eup %9459 }
 0x513   :  { %v3309_v50 = vmul.f32 %v9460_v2, %v3303_v18  ;;  %v4036_v18 = vsub.f32 %v10348_v30, %v10361_v9  ;;  %v10375_v2 = vand.u32 4294901760, %v10364_v6 }
 0x514   :  { %v9462_v19 = vpop.eup %9461 }
 0x515   :  { %v3315_v51 = vmul.f32 %v7681_v11, %v3309_v50  ;;  %v3310_v52 = vmul.f32 %v9462_v19, %v3304_v15  ;;  %v4037_v50 = vand.u32 4294901760, %v4036_v18  ;;  %v4043_v19 = vsub.f32 %v10364_v6, %v10375_v2 }
 0x517   :  { %v10232_v53 = vadd.f32 %v7682_v20, %v3315_v51  ;;  %v3316_v21 = vmul.f32 %v7681_v11, %v3310_v52  ;;  %v10378_v11 = vsub.f32 %v3868_v8, %v10366_v13  ;;  %v4044_v51 = vand.u32 4294901760, %v4043_v19 }
 0x519   :  { %11651 = vst [vmem:[#allocation6_spill] sm:$0xff] %v10232_v53  ;;  %v3333_v45 = vsel %vm42_vm0, %v10232_v53, 0  ;;  %v10236_v23 = vadd.f32 %v7682_v20, %v3316_v21  ;;  %v10385_v20 = vand.u32 4294901760, %v10378_v11 }
 0x51a   :  { %v3407_v1 = vand.u32 4294901760, %v3333_v45 }
 0x51b   :  { %11652 = vst [vmem:[#allocation7_spill] sm:$0xff] %v10236_v23  ;;  %v3336_v22 = vsel %vm42_vm0, %v10236_v23, 0  ;;  %v4050_v52 = vsub.f32 %v10378_v11, %v10385_v20 }
 0x51c   :  { %8651 = vmatprep.mubr.f32.mxu1 %v3407_v1  ;;  %v3417_v28 = vand.u32 4294901760, %v3336_v22  ;;  %v3408_v0 = vsub.f32 %v3333_v45, %v3407_v1 }
 0x51d   :  { %v4051_v21 = vand.u32 4294901760, %v4050_v52  ;;  %v10409_v52 = vld [vmem:[%s11640_s2] sm:$0xff] }
 0x51e   :  { %v3418_v3 = vsub.f32 %v3336_v22, %v3417_v28  ;;  %8652 = vmatmul.mubr.f32.vlgmr.msra.gmra.mxu1 %v3417_v28  ;;  %v3409_v29 = vand.u32 4294901760, %v3408_v0 }
 0x51f   :  { %8666 = vmatpush3.msra.mxu1 %v10165_v12 }
 0x520   :  { %8667 = vmatprep.subr.mxu1 %v10173_v43  ;;  %8673 = vmatprep.mubr.f32.mxu1 %v3409_v29  ;;  %v3410_v35 = vsub.f32 %v3408_v0, %v3409_v29  ;;  %v3419_v5 = vand.u32 4294901760, %v3418_v3 }
 0x521   :  { %8668 = vmatpush3.msra.mxu1 %v10173_v43 }
 0x522   :  { %8669 = vmatprep.subr.mxu1 %v10186_v32  ;;  %v3411_v36 = vand.u32 4294901760, %v3410_v35  ;;  %v3420_v27 = vsub.f32 %v3418_v3, %v3419_v5 }
 0x523   :  { %8670 = vmatpush3.msra.mxu1 %v10186_v32 }
 0x524   :  { %8671 = vmatprep.subr.mxu1 %v10201_v44  ;;  %8640 = vmatprep.mubr.f32.mxu0 %v3411_v36  ;;  %v3421_v7 = vand.u32 4294901760, %v3420_v27 }
 0x525   :  { %8672 = vmatpush3.msra.mxu1 %v10201_v44 }
 0x526   :  { %8674 = vmatmul.mubr.f32.vlgmr.msra.gmra.mxu1 %v3419_v5  ;;  %8687 = vmatprep.subr.mxu1 %v10165_v12 }
 0x527   :  { %8641 = vmatmul.mubr.f32.vlgmr.msra.gmra.mxu0 %v3421_v7  ;;  %8688 = vmatpush3.msra.mxu1 %v10165_v12  ;;  %v3875_v12 = vld [vmem:[%s11641_s3 + $0xa0] sm:$0xff] }
 0x528   :  { %8655 = vmatpush3.msra.mxu0 %v10171_v33  ;;  %8695 = vmatprep.mubr.f32.mxu1 %v3407_v1  ;;  %v10273_v33 = vand.u32 4294901760, %v3875_v12 }
 0x529   :  { %8656 = vmatprep.subr.mxu0 %v10184_v16  ;;  %8662 = vmatprep.mubr.f32.mxu0 %v3408_v0 }
 0x52a   :  { %8689 = vmatprep.subr.mxu1 %v10173_v43  ;;  %8657 = vmatpush3.msra.mxu0 %v10184_v16  ;;  %v10279_v10 = vsub.f32 %v3875_v12, %v10273_v33  ;;  %v3873_v16 = vld [vmem:[%s11641_s3 + $0x90] sm:$0xff] }
 0x52b   :  { %8690 = vmatpush3.msra.mxu1 %v10173_v43  ;;  %8658 = vmatprep.subr.mxu0 %v10199_v42  ;;  %v3874_v43 = vld [vmem:[%s11641_s3 + $0x98] sm:$0xff]  ;;  %v10294_v38 = vand.u32 4294901760, %v3873_v16 }
 0x52c   :  { %8691 = vmatprep.subr.mxu1 %v10186_v32  ;;  %8659 = vmatpush3.msra.mxu0 %v10199_v42 }
 0x52d   :  { %8692 = vmatpush3.msra.mxu1 %v10186_v32  ;;  %8660 = vmatprep.subr.mxu0 %v10211_v49  ;;  %v10289_v32 = vand.u32 4294901760, %v10279_v10  ;;  %v10307_v46 = vsub.f32 %v3873_v16, %v10294_v38 }
 0x52e   :  { %8693 = vmatprep.subr.mxu1 %v10201_v44  ;;  %8661 = vmatpush3.msra.mxu0 %v10211_v49 }
 0x52f   :  { %8694 = vmatpush3.msra.mxu1 %v10201_v44  ;;  %8663 = vmatmul.mubr.f32.vlgmr.msra.gmra.mxu0 %v3418_v3  ;;  %v4001_v42 = vsub.f32 %v10279_v10, %v10289_v32  ;;  %v10319_v55 = vand.u32 4294901760, %v10307_v46 }
 0x530   :  { %8676 = vmatprep.subr.mxu0 %v10181_v31  ;;  %8696 = vmatmul.mubr.f32.vlgmr.msra.gmra.mxu1 %v3417_v28 }
 0x531   :  { %8677 = vmatpush3.msra.mxu0 %v10181_v31  ;;  %8684 = vmatprep.mubr.f32.mxu0 %v3407_v1  ;;  %v10281_v31 = vand.u32 4294901760, %v3874_v43  ;;  %v4002_v49 = vand.u32 4294901760, %v4001_v42  ;;  %v4015_v60 = vsub.f32 %v10307_v46, %v10319_v55  ;;  %v7683_v1 = vld [vmem:[%s11642_s4 + $0x6] ss:$0 sm:$0xff] }
 0x532   :  { %8678 = vmatprep.subr.mxu0 %v10196_v41 }
 0x533   :  { %8679 = vmatpush3.msra.mxu0 %v10196_v41  ;;  %v10292_v37 = vsub.f32 %v3874_v43, %v10281_v31  ;;  %v3872_v41 = vld [vmem:[%s11641_s3 + $0x88] sm:$0xff]  ;;  %8717 = vmatprep.subr.mxu1 %v4002_v49  ;;  %v4016_v24 = vand.u32 4294901760, %v4015_v60 }
 0x534   :  { %8680 = vmatprep.subr.mxu0 %v10208_v48  ;;  %v10309_v47 = vand.u32 4294901760, %v3872_v41  ;;  %8718 = vmatpush3.msra.mxu1 %v4002_v49 }
 0x535   :  { %8681 = vmatpush3.msra.mxu0 %v10208_v48  ;;  %v10304_v44 = vand.u32 4294901760, %v10292_v37  ;;  %v3871_v48 = vld [vmem:[%s11641_s3 + $0x80] sm:$0xff] }
 0x536   :  { %8682 = vmatprep.subr.mxu0 %v10218_v56  ;;  %v10325_v57 = vand.u32 4294901760, %v3871_v48 }
 0x537   :  { %8683 = vmatpush3.msra.mxu0 %v10218_v56  ;;  %v4008_v54 = vsub.f32 %v10292_v37, %v10304_v44  ;;  %v10322_v56 = vsub.f32 %v3872_v41, %v10309_v47 }
 0x538   :  { %8685 = vmatmul.mubr.f32.vlgmr.msra.gmra.mxu0 %v3417_v28  ;;  %8698 = vmatprep.subr.mxu0 %v10273_v33  ;;  %v10339_v63 = vsub.f32 %v3871_v48, %v10325_v57 }
 0x539   :  { %8699 = vmatpush3.msra.mxu0 %v10273_v33  ;;  %v4009_v59 = vand.u32 4294901760, %v4008_v54  ;;  %v10334_v61 = vand.u32 4294901760, %v10322_v56 }
 0x53a   :  { %8700 = vmatprep.subr.mxu0 %v10281_v31  ;;  %v10354_v26 = vand.u32 4294901760, %v10339_v63 }
 0x53b   :  { %8701 = vmatpush3.msra.mxu0 %v10281_v31  ;;  %8719 = vmatprep.subr.mxu1 %v4009_v59  ;;  %v4022_v25 = vsub.f32 %v10322_v56, %v10334_v61 }
 0x53c   :  { %8702 = vmatprep.subr.mxu0 %v10294_v38  ;;  %8720 = vmatpush3.msra.mxu1 %v4009_v59  ;;  %v4029_v14 = vsub.f32 %v10339_v63, %v10354_v26 }
 0x53d   :  { %8703 = vmatpush3.msra.mxu0 %v10294_v38  ;;  %8721 = vmatprep.subr.mxu1 %v4016_v24  ;;  %v4023_v17 = vand.u32 4294901760, %v4022_v25 }
 0x53e   :  { %8704 = vmatprep.subr.mxu0 %v10309_v47  ;;  %8722 = vmatpush3.msra.mxu1 %v4016_v24  ;;  %v4030_v15 = vand.u32 4294901760, %v4029_v14 }
 0x53f   :  { %8705 = vmatpush3.msra.mxu0 %v10309_v47  ;;  %8723 = vmatprep.subr.mxu1 %v4023_v17 }
 0x540   :  { %8706 = vmatprep.subr.mxu0 %v10325_v57  ;;  %8724 = vmatpush3.msra.mxu1 %v4023_v17 }
 0x541   :  { %8707 = vmatpush3.msra.mxu0 %v10325_v57  ;;  %8725 = vmatprep.subr.mxu1 %v4030_v15 }
 0x542   :  { %8708 = vmatprep.subr.mxu0 %v10336_v62  ;;  %8726 = vmatpush3.msra.mxu1 %v4030_v15 }
 0x543   :  { %8709 = vmatpush3.msra.mxu0 %v10336_v62  ;;  %8727 = vmatprep.subr.mxu1 %v4037_v50 }
 0x544   :  { %8710 = vmatprep.subr.mxu0 %v10350_v39  ;;  %8728 = vmatpush3.msra.mxu1 %v4037_v50 }
 0x545   :  { %8711 = vmatpush3.msra.mxu0 %v10350_v39  ;;  %8729 = vmatprep.subr.mxu1 %v4044_v51 }
 0x546   :  { %8712 = vmatprep.subr.mxu0 %v10366_v13  ;;  %8730 = vmatpush3.msra.mxu1 %v4044_v51 }
 0x547   :  { %8713 = vmatpush3.msra.mxu0 %v10366_v13  ;;  %8731 = vmatprep.subr.mxu1 %v4051_v21 }
 0x548   :  { %8736 = vmatprep.subr.mxu0 %v10279_v10  ;;  %8732 = vmatpush3.msra.mxu1 %v4051_v21 }
 0x549   :  { %8755 = vmatprep.subr.mxu1 %v10273_v33 }
 0x5de   :  { %v8653_v22 = vpop.f32.mrf.mxu1 }
 0x5e0   :  { %v3514_v35 = vpop.f32.mrf.mxu1 }
 0x5e6   :  { %v8675_v36 = vpop.f32.mrf.mxu1 }
 0x5e7   :  { %v8642_v45 = vpop.f32.mrf.mxu0 }
 0x5e8   :  { %v3424_v0 = vadd.f32 %v8642_v45, %v7683_v1  ;;  %v3684_v16 = vpop.f32.mrf.mxu1 }
 0x5e9   :  { %v3413_v28 = vpop.f32.mrf.mxu0 }
 0x5ea   :  { %v3414_v3 = vadd.f32 %v7683_v1, %v3413_v28  ;;  %v3521_v5 = vadd.f32 %v8653_v22, %v3424_v0  ;;  %v7687_v22 = vmul.f32 -1.442695, %v10409_v52 }
 0x5ec   :  { %v3515_v12 = vadd.f32 %v3514_v35, %v3414_v3  ;;  %9463 = vpow2.f32 %v7687_v22  ;;  %v10423_v3 = vld [vmem:[%s11640_s2 + $0x8] sm:$0xff]  ;;  %v4547_v35 = vld [vmem:[%s11641_s3 + $0x110] sm:$0xff] }
 0x5ef   :  { %v8664_v29 = vpop.f32.mrf.mxu0 }
 0x5f0   :  { %v3608_v7 = vadd.f32 %v8664_v29, %v3521_v5  ;;  %v8697_v42 = vpop.f32.mrf.mxu1  ;;  %v7688_v29 = vmul.f32 -1.442695, %v10423_v3 }
 0x5f1   :  { %v3600_v27 = vpop.f32.mrf.mxu0 }
 0x5f2   :  { %v3601_v43 = vadd.f32 %v3600_v27, %v3515_v12  ;;  %v3693_v41 = vadd.f32 %v8675_v36, %v3608_v7  ;;  %v3856_v4 = vpop.f32.mrf.mxu1  ;;  %9465 = vpow2.f32 %v7688_v29  ;;  %v10465_v27 = vand.u32 4294901760, %v4547_v35 }
 0x5f4   :  { %v3685_v54 = vadd.f32 %v3684_v16, %v3601_v43  ;;  %v10493_v43 = vsub.f32 %v4547_v35, %v10465_v27  ;;  %v4543_v16 = vld [vmem:[%s11641_s3 + $0xf0] sm:$0xff] }
 0x5f8   :  { %v8686_v48 = vpop.f32.mrf.mxu0 }
 0x5f9   :  { %v3782_v49 = vadd.f32 %v8686_v48, %v3693_v41  ;;  %v9464_v5 = vpop.eup %9463  ;;  %v4542_v48 = vld [vmem:[%s11641_s3 + $0xe8] sm:$0xff] }
 0x5fa   :  { %v3775_v58 = vpop.f32.mrf.mxu0  ;;  %v4526_v12 = vadd.f32 1.0, %v9464_v5 }
 0x5fb   :  { %v3863_v59 = vadd.f32 %v8697_v42, %v3782_v49  ;;  %v3776_v60 = vadd.f32 %v3775_v58, %v3685_v54  ;;  %v10522_v54 = vand.u32 4294901760, %v10493_v43 }
 0x5fc   :  { %9467 = vrcp.f32 %v4526_v12 }
 0x5fd   :  { %v3867_v24 = vmax.f32 %v3863_v59, 0.0  ;;  %v3857_v25 = vadd.f32 %v3856_v4, %v3776_v60  ;;  %v10538_v60 = vand.u32 4294901760, %v4542_v48  ;;  %v4541_v4 = vld [vmem:[%s11641_s3 + $0xe0] sm:$0xff] }
 0x5ff   :  { %v3886_v8 = vsel %vm3881_vm13, %v3867_v24, 0  ;;  %v3866_v17 = vmax.f32 %v3857_v25, 0.0  ;;  %v9466_v42 = vpop.eup %9465  ;;  %v4674_v25 = vsub.f32 %v10493_v43, %v10522_v54 }
 0x600   :  { %v10395_v14 = vand.u32 4294901760, %v3886_v8 }
 0x601   :  { %v3883_v18 = vsel %vm3881_vm13, %v3866_v17, 0  ;;  %v4540_v17 = vld [vmem:[%s11641_s3 + $0xd8] sm:$0xff] }
 0x602   :  { %v10398_v15 = vsub.f32 %v3886_v8, %v10395_v14  ;;  %v10400_v50 = vand.u32 4294901760, %v3883_v18 }
 0x604   :  { %v3962_v19 = vsub.f32 %v3883_v18, %v10400_v50  ;;  %8733 = vmatprep.mubr.f32.mxu1 %v10400_v50  ;;  %v3973_v51 = vand.u32 4294901760, %v10398_v15 }
 0x605   :  { %8734 = vmatmul.mubr.f32.vlgmr.msra.gmra.mxu1 %v10395_v14 }
 0x606   :  { %8756 = vmatpush3.msra.mxu1 %v10273_v33  ;;  %v3963_v21 = vand.u32 4294901760, %v3962_v19  ;;  %v3974_v45 = vsub.f32 %v10398_v15, %v3973_v51 }
 0x607   :  { %8757 = vmatprep.subr.mxu1 %v10281_v31 }
 0x608   :  { %8758 = vmatpush3.msra.mxu1 %v10281_v31  ;;  %8771 = vmatprep.mubr.f32.mxu1 %v3963_v21  ;;  %v3964_v1 = vsub.f32 %v3962_v19, %v3963_v21  ;;  %v3975_v0 = vand.u32 4294901760, %v3974_v45  ;;  %v4538_v45 = vld [vmem:[%s11641_s3 + $0xc8] sm:$0xff] }
 0x609   :  { %8759 = vmatprep.subr.mxu1 %v10294_v38  ;;  %v9468_v35 = vpop.eup %9467 }
 0x60a   :  { %8760 = vmatpush3.msra.mxu1 %v10294_v38  ;;  %v3965_v28 = vand.u32 4294901760, %v3964_v1 }
 0x60b   :  { %8761 = vmatprep.subr.mxu1 %v10309_v47 }
 0x60c   :  { %8762 = vmatpush3.msra.mxu1 %v10309_v47  ;;  %8714 = vmatprep.mubr.f32.mxu0 %v3965_v28 }
 0x60d   :  { %8763 = vmatprep.subr.mxu1 %v10325_v57  ;;  %8715 = vmatmul.mubr.f32.vlgmr.msra.gmra.mxu0 %v3975_v0 }
 0x60e   :  { %8737 = vmatpush3.msra.mxu0 %v10279_v10  ;;  %8764 = vmatpush3.msra.mxu1 %v10325_v57  ;;  %v4549_v10 = vld [vmem:[%s11641_s3 + $0x120] sm:$0xff] }
 0x60f   :  { %8738 = vmatprep.subr.mxu0 %v10292_v37  ;;  %8752 = vmatprep.mubr.f32.mxu0 %v3962_v19  ;;  %v10580_v19 = vand.u32 4294901760, %v4540_v17 }
 0x610   :  { %8765 = vmatprep.subr.mxu1 %v10336_v62  ;;  %8739 = vmatpush3.msra.mxu0 %v10292_v37  ;;  %v4548_v37 = vld [vmem:[%s11641_s3 + $0x118] sm:$0xff] }
 0x611   :  { %8766 = vmatpush3.msra.mxu1 %v10336_v62  ;;  %8740 = vmatprep.subr.mxu0 %v10307_v46 }
 0x612   :  { %8767 = vmatprep.subr.mxu1 %v10350_v39  ;;  %8741 = vmatpush3.msra.mxu0 %v10307_v46  ;;  %v10448_v46 = vand.u32 4294901760, %v4549_v10 }
 0x613   :  { %8768 = vmatpush3.msra.mxu1 %v10350_v39  ;;  %8742 = vmatprep.subr.mxu0 %v10322_v56 }
 0x614   :  { %8769 = vmatprep.subr.mxu1 %v10366_v13  ;;  %8743 = vmatpush3.msra.mxu0 %v10322_v56  ;;  %v10456_v56 = vand.u32 4294901760, %v4548_v37  ;;  %v10463_v36 = vsub.f32 %v4549_v10, %v10448_v46  ;;  %v10608_v10 = vsub.f32 %v4540_v17, %v10580_v19 }
 0x615   :  { %8770 = vmatpush3.msra.mxu1 %v10366_v13  ;;  %8744 = vmatprep.subr.mxu0 %v10339_v63 }
 0x616   :  { %8772 = vmatmul.mubr.f32.vlgmr.msra.gmra.mxu1 %v3973_v51  ;;  %8793 = vmatprep.subr.mxu1 %v10273_v33  ;;  %v4675_v51 = vand.u32 4294901760, %v4674_v25 }
 0x617   :  { %8745 = vmatpush3.msra.mxu0 %v10339_v63  ;;  %8794 = vmatpush3.msra.mxu1 %v10273_v33  ;;  %v4546_v33 = vld [vmem:[%s11641_s3 + $0x108] sm:$0xff]  ;;  %v10475_v63 = vsub.f32 %v4548_v37, %v10456_v56  ;;  %v10610_v37 = vand.u32 4294901760, %v4538_v45 }
 0x618   :  { %8809 = vmatprep.mubr.f32.mxu1 %v10400_v50  ;;  %8746 = vmatprep.subr.mxu0 %v10348_v30  ;;  %v10482_v7 = vand.u32 4294901760, %v4546_v33 }
 0x619   :  { %8795 = vmatprep.subr.mxu1 %v10281_v31  ;;  %8747 = vmatpush3.msra.mxu0 %v10348_v30  ;;  %v4545_v30 = vld [vmem:[%s11641_s3 + $0x100] sm:$0xff] }
 0x61a   :  { %8796 = vmatpush3.msra.mxu1 %v10281_v31  ;;  %8748 = vmatprep.subr.mxu0 %v10364_v6  ;;  %v4544_v31 = vld [vmem:[%s11641_s3 + $0xf8] sm:$0xff] }
 0x61b   :  { %8797 = vmatprep.subr.mxu1 %v10294_v38  ;;  %8749 = vmatpush3.msra.mxu0 %v10364_v6  ;;  %v10490_v6 = vand.u32 4294901760, %v10463_v36  ;;  %v10507_v41 = vand.u32 4294901760, %v4544_v31 }
 0x61c   :  { %8798 = vmatpush3.msra.mxu1 %v10294_v38  ;;  %8750 = vmatprep.subr.mxu0 %v10378_v11  ;;  %v10497_v38 = vand.u32 4294901760, %v4545_v30 }
 0x61d   :  { %8799 = vmatprep.subr.mxu1 %v10309_v47  ;;  %8751 = vmatpush3.msra.mxu0 %v10378_v11  ;;  %v10505_v11 = vand.u32 4294901760, %v10475_v63  ;;  %v4660_v49 = vsub.f32 %v10463_v36, %v10490_v6  ;;  %v10536_v59 = vsub.f32 %v4544_v31, %v10507_v41 }
 0x61e   :  { %8800 = vmatpush3.msra.mxu1 %v10309_v47  ;;  %8753 = vmatmul.mubr.f32.vlgmr.msra.gmra.mxu0 %v10398_v15  ;;  %v10512_v47 = vsub.f32 %v4546_v33, %v10482_v7  ;;  %v10529_v58 = vsub.f32 %v4545_v30, %v10497_v38  ;;  %v4536_v33 = vld [vmem:[%s11641_s3 + $0xb8] sm:$0xff] }
 0x61f   :  { %8774 = vmatprep.subr.mxu0 %v10289_v32  ;;  %8801 = vmatprep.subr.mxu1 %v10325_v57  ;;  %v4661_v24 = vand.u32 4294901760, %v4660_v49  ;;  %v10568_v15 = vand.u32 4294901760, %v10536_v59  ;;  %v10639_v49 = vsub.f32 %v4538_v45, %v10610_v37 }
 0x620   :  { %8775 = vmatpush3.msra.mxu0 %v10289_v32  ;;  %8790 = vmatprep.mubr.f32.mxu0 %v10400_v50  ;;  %v10524_v32 = vand.u32 4294901760, %v4543_v16  ;;  %v10571_v50 = vsub.f32 %v4542_v48, %v10538_v60  ;;  %v10636_v48 = vand.u32 4294901760, %v10608_v10 }
 0x621   :  { %8802 = vmatpush3.msra.mxu1 %v10325_v57  ;;  %8776 = vmatprep.subr.mxu0 %v10304_v44  ;;  %v4667_v57 = vsub.f32 %v10475_v63, %v10505_v11  ;;  %v4695_v28 = vsub.f32 %v10536_v59, %v10568_v15 }
 0x622   :  { %8803 = vmatprep.subr.mxu1 %v10336_v62  ;;  %8777 = vmatpush3.msra.mxu0 %v10304_v44  ;;  %v4527_v44 = vadd.f32 1.0, %v9466_v42  ;;  %v10553_v8 = vsub.f32 %v4543_v16, %v10524_v32  ;;  %v10601_v0 = vand.u32 4294901760, %v10571_v50 }
 0x623   :  { %8804 = vmatpush3.msra.mxu1 %v10336_v62  ;;  %8778 = vmatprep.subr.mxu0 %v10319_v55  ;;  %v10546_v62 = vand.u32 4294901760, %v10512_v47  ;;  %v4668_v18 = vand.u32 4294901760, %v4667_v57  ;;  %v4696_v16 = vand.u32 4294901760, %v4695_v28  ;;  %v4532_v57 = vmul.f32 %v9468_v35, %v10409_v52  ;;  %v4534_v52 = vld [vmem:[%s11641_s3 + $0xa8] sm:$0xff] }
 0x624   :  { %8805 = vmatprep.subr.mxu1 %v10350_v39  ;;  %8779 = vmatpush3.msra.mxu0 %v10319_v55  ;;  %v10561_v55 = vand.u32 4294901760, %v10529_v58  ;;  %9469 = vrcp.f32 %v4527_v44  ;;  %v10584_v21 = vand.u32 4294901760, %v10553_v8  ;;  %v4709_v42 = vsub.f32 %v10571_v50, %v10601_v0 }
 0x625   :  { %8806 = vmatpush3.msra.mxu1 %v10350_v39  ;;  %8780 = vmatprep.subr.mxu0 %v10334_v61  ;;  %v10563_v39 = vand.u32 4294901760, %v4541_v4  ;;  %v10672_v28 = vand.u32 4294901760, %v4534_v52 }
 0x626   :  { %8807 = vmatprep.subr.mxu1 %v10366_v13  ;;  %8781 = vmatpush3.msra.mxu0 %v10334_v61  ;;  %v4539_v61 = vld [vmem:[%s11641_s3 + $0xd0] sm:$0xff]  ;;  %v4702_v5 = vsub.f32 %v10553_v8, %v10584_v21 }
 0x627   :  { %8808 = vmatpush3.msra.mxu1 %v10366_v13  ;;  %8782 = vmatprep.subr.mxu0 %v10354_v26  ;;  %v4681_v13 = vsub.f32 %v10512_v47, %v10546_v62  ;;  %v10593_v1 = vsub.f32 %v4541_v4, %v10563_v39  ;;  %v10595_v22 = vand.u32 4294901760, %v4539_v61 }
 0x628   :  { %8810 = vmatmul.mubr.f32.vlgmr.msra.gmra.mxu1 %v10395_v14  ;;  %8783 = vmatpush3.msra.mxu0 %v10354_v26  ;;  %v4688_v26 = vsub.f32 %v10529_v58, %v10561_v55  ;;  %v4703_v4 = vand.u32 4294901760, %v4702_v5 }
 0x629   :  { %8784 = vmatprep.subr.mxu0 %v10361_v9  ;;  %8847 = vmatprep.subr.mxu1 %v4661_v24  ;;  %v4682_v29 = vand.u32 4294901760, %v4681_v13  ;;  %v10620_v30 = vand.u32 4294901760, %v10593_v1  ;;  %v10623_v31 = vsub.f32 %v4539_v61, %v10595_v22  ;;  %v4723_v13 = vsub.f32 %v10608_v10, %v10636_v48 }
 0x62a   :  { %8785 = vmatpush3.msra.mxu0 %v10361_v9  ;;  %8848 = vmatpush3.msra.mxu1 %v4661_v24  ;;  %v4537_v9 = vld [vmem:[%s11641_s3 + $0xc0] sm:$0xff] }
 0x62b   :  { %8786 = vmatprep.subr.mxu0 %v10375_v2  ;;  %8849 = vmatprep.subr.mxu1 %v4668_v18  ;;  %v10625_v12 = vand.u32 4294901760, %v4537_v9  ;;  %v4716_v44 = vsub.f32 %v10593_v1, %v10620_v30  ;;  %v10649_v24 = vand.u32 4294901760, %v10623_v31 }
 0x62c   :  { %8787 = vmatpush3.msra.mxu0 %v10375_v2  ;;  %8850 = vmatpush3.msra.mxu1 %v4668_v18  ;;  %v4689_v2 = vand.u32 4294901760, %v4688_v26  ;;  %v4710_v18 = vand.u32 4294901760, %v4709_v42  ;;  %v10669_v26 = vand.u32 4294901760, %v4532_v57 }
 0x62d   :  { %8788 = vmatprep.subr.mxu0 %v10385_v20  ;;  %8851 = vmatprep.subr.mxu1 %v4675_v51  ;;  %v10652_v25 = vsub.f32 %v4537_v9, %v10625_v12  ;;  %v4717_v9 = vand.u32 4294901760, %v4716_v44 }
 0x62e   :  { %8789 = vmatpush3.msra.mxu0 %v10385_v20  ;;  %8852 = vmatpush3.msra.mxu1 %v4675_v51  ;;  %v4535_v20 = vld [vmem:[%s11641_s3 + $0xb0] sm:$0xff]  ;;  %v10664_v51 = vand.u32 4294901760, %v10639_v49  ;;  %v10692_v44 = vsub.f32 %v4532_v57, %v10669_v26 }
 0x62f   :  { %8791 = vmatmul.mubr.f32.vlgmr.msra.gmra.mxu0 %v10395_v14  ;;  %8812 = vmatprep.subr.mxu0 %v10448_v46  ;;  %v10641_v14 = vand.u32 4294901760, %v4536_v33  ;;  %v10654_v17 = vand.u32 4294901760, %v4535_v20  ;;  %v10678_v35 = vand.u32 4294901760, %v10652_v25 }
 0x630   :  { %8813 = vmatpush3.msra.mxu0 %v10448_v46  ;;  %8853 = vmatprep.subr.mxu1 %v4682_v29 }
 0x631   :  { %8814 = vmatprep.subr.mxu0 %v10456_v56  ;;  %8854 = vmatpush3.msra.mxu1 %v4682_v29  ;;  %v9470_v61 = vpop.eup %9469  ;;  %v10667_v45 = vsub.f32 %v4536_v33, %v10641_v14  ;;  %v4730_v29 = vsub.f32 %v10623_v31, %v10649_v24  ;;  %v10681_v5 = vsub.f32 %v4535_v20, %v10654_v17 }
 0x632   :  { %8815 = vmatpush3.msra.mxu0 %v10456_v56  ;;  %8855 = vmatprep.subr.mxu1 %v4689_v2  ;;  %v4533_v33 = vmul.f32 %v9470_v61, %v10423_v3  ;;  %v10696_v20 = vsub.f32 %v4534_v52, %v10672_v28 }
 0x633   :  { %8816 = vmatprep.subr.mxu0 %v10465_v27  ;;  %8856 = vmatpush3.msra.mxu1 %v4689_v2  ;;  %v4724_v2 = vand.u32 4294901760, %v4723_v13  ;;  %v10689_v42 = vand.u32 4294901760, %v10667_v45  ;;  %v4731_v3 = vand.u32 4294901760, %v4730_v29  ;;  %v10702_v61 = vand.u32 4294901760, %v10681_v5 }
 0x634   :  { %8817 = vmatpush3.msra.mxu0 %v10465_v27  ;;  %8857 = vmatprep.subr.mxu1 %v4696_v16  ;;  %v10705_v57 = vand.u32 4294901760, %v4533_v33  ;;  %v10711_v13 = vand.u32 4294901760, %v10692_v44  ;;  %v10715_v29 = vand.u32 4294901760, %v10696_v20 }
 0x635   :  { %8818 = vmatprep.subr.mxu0 %v10482_v7  ;;  %8858 = vmatpush3.msra.mxu1 %v4696_v16  ;;  %v4737_v16 = vsub.f32 %v10639_v49, %v10664_v51  ;;  %v4758_v34 = vsub.f32 %v10681_v5, %v10702_v61 }
 0x636   :  { %8819 = vmatpush3.msra.mxu0 %v10482_v7  ;;  %8859 = vmatprep.subr.mxu1 %v4703_v4  ;;  %v4639_v40 = vsub.f32 %v10692_v44, %v10711_v13 }
 0x637   :  { %8820 = vmatprep.subr.mxu0 %v10497_v38  ;;  %8860 = vmatpush3.msra.mxu1 %v4703_v4  ;;  %v4744_v4 = vsub.f32 %v10652_v25, %v10678_v35  ;;  %v4738_v52 = vand.u32 4294901760, %v4737_v16  ;;  %v10722_v16 = vsub.f32 %v4533_v33, %v10705_v57 }
 0x638   :  { %8821 = vmatpush3.msra.mxu0 %v10497_v38  ;;  %8861 = vmatprep.subr.mxu1 %v4710_v18 }
 0x639   :  { %8822 = vmatprep.subr.mxu0 %v10507_v41  ;;  %8862 = vmatpush3.msra.mxu1 %v4710_v18  ;;  %v4751_v18 = vsub.f32 %v10667_v45, %v10689_v42  ;;  %v10733_v33 = vand.u32 4294901760, %v10722_v16 }
 0x63a   :  { %8823 = vmatpush3.msra.mxu0 %v10507_v41  ;;  %8863 = vmatprep.subr.mxu1 %v4717_v9 }
 0x63b   :  { %8824 = vmatprep.subr.mxu0 %v10524_v32  ;;  %8864 = vmatpush3.msra.mxu1 %v4717_v9  ;;  %v4745_v9 = vand.u32 4294901760, %v4744_v4  ;;  %v4765_v4 = vsub.f32 %v10696_v20, %v10715_v29 }
 0x63c   :  { %8825 = vmatpush3.msra.mxu0 %v10524_v32  ;;  %8865 = vmatprep.subr.mxu1 %v4724_v2 }
 0x63d   :  { %8826 = vmatprep.subr.mxu0 %v10538_v60  ;;  %8866 = vmatpush3.msra.mxu1 %v4724_v2  ;;  %v4752_v2 = vand.u32 4294901760, %v4751_v18  ;;  %v10736_v18 = vand.u32 4294901760, %v4639_v40 }
 0x63e   :  { %8827 = vmatpush3.msra.mxu0 %v10538_v60  ;;  %8867 = vmatprep.subr.mxu1 %v4731_v3 }
 0x63f   :  { %8828 = vmatprep.subr.mxu0 %v10563_v39  ;;  %8868 = vmatpush3.msra.mxu1 %v4731_v3  ;;  %v4759_v3 = vand.u32 4294901760, %v4758_v34  ;;  %v4649_v34 = vsub.f32 %v10722_v16, %v10733_v33 }
 0x640   :  { %8829 = vmatpush3.msra.mxu0 %v10563_v39  ;;  %8869 = vmatprep.subr.mxu1 %v4738_v52 }
 0x641   :  { %8830 = vmatprep.subr.mxu0 %v10580_v19  ;;  %8870 = vmatpush3.msra.mxu1 %v4738_v52  ;;  %v4766_v52 = vand.u32 4294901760, %v4765_v4  ;;  %v10748_v40 = vand.u32 4294901760, %v4649_v34 }
 0x642   :  { %8831 = vmatpush3.msra.mxu0 %v10580_v19  ;;  %8871 = vmatprep.subr.mxu1 %v4745_v9 }
 0x643   :  { %8832 = vmatprep.subr.mxu0 %v10595_v22  ;;  %8872 = vmatpush3.msra.mxu1 %v4745_v9  ;;  %v5242_v9 = vld [vmem:[%s11641_s3 + $0x140] sm:$0xff] }
 0x644   :  { %8833 = vmatpush3.msra.mxu0 %v10595_v22  ;;  %8873 = vmatprep.subr.mxu1 %v4752_v2 }
 0x645   :  { %8834 = vmatprep.subr.mxu0 %v10610_v37  ;;  %8874 = vmatpush3.msra.mxu1 %v4752_v2 }
 0x646   :  { %8835 = vmatpush3.msra.mxu0 %v10610_v37  ;;  %8875 = vmatprep.subr.mxu1 %v4759_v3 }
 0x647   :  { %8836 = vmatprep.subr.mxu0 %v10625_v12  ;;  %8876 = vmatpush3.msra.mxu1 %v4759_v3 }
 0x648   :  { %8837 = vmatpush3.msra.mxu0 %v10625_v12  ;;  %8844 = vmatprep.mubr.f32.mxu0 %v10736_v18 }
 0x649   :  { %8838 = vmatprep.subr.mxu0 %v10641_v14  ;;  %8877 = vmatprep.subr.mxu1 %v4766_v52 }
 0x64a   :  { %8839 = vmatpush3.msra.mxu0 %v10641_v14  ;;  %8878 = vmatpush3.msra.mxu1 %v4766_v52 }
 0x64b   :  { %8840 = vmatprep.subr.mxu0 %v10654_v17  ;;  %8879 = vmatprep.mubr.f32.mxu1 %v10669_v26 }
 0x64c   :  { %8841 = vmatpush3.msra.mxu0 %v10654_v17  ;;  %8917 = vmatprep.subr.mxu1 %v10448_v46 }
 0x64d   :  { %8842 = vmatprep.subr.mxu0 %v10672_v28  ;;  %8880 = vmatmul.mubr.f32.vlgmr.msra.gmra.mxu1 %v10705_v57 }
 0x64e   :  { %8843 = vmatpush3.msra.mxu0 %v10672_v28  ;;  %8918 = vmatpush3.msra.mxu1 %v10448_v46 }
 0x64f   :  { %8845 = vmatmul.mubr.f32.vlgmr.msra.gmra.mxu0 %v10748_v40  ;;  %8882 = vmatprep.subr.mxu0 %v10463_v36 }
 0x650   :  { %8883 = vmatpush3.msra.mxu0 %v10463_v36  ;;  %8919 = vmatprep.subr.mxu1 %v10456_v56 }
 0x651   :  { %8884 = vmatprep.subr.mxu0 %v10475_v63  ;;  %8920 = vmatpush3.msra.mxu1 %v10456_v56 }
 0x652   :  { %8885 = vmatpush3.msra.mxu0 %v10475_v63  ;;  %8921 = vmatprep.subr.mxu1 %v10465_v27 }
 0x653   :  { %8886 = vmatprep.subr.mxu0 %v10493_v43  ;;  %8922 = vmatpush3.msra.mxu1 %v10465_v27 }
 0x654   :  { %8887 = vmatpush3.msra.mxu0 %v10493_v43  ;;  %8923 = vmatprep.subr.mxu1 %v10482_v7 }
 0x655   :  { %8888 = vmatprep.subr.mxu0 %v10512_v47  ;;  %8924 = vmatpush3.msra.mxu1 %v10482_v7 }
 0x656   :  { %8889 = vmatpush3.msra.mxu0 %v10512_v47  ;;  %8925 = vmatprep.subr.mxu1 %v10497_v38  ;;  %v5249_v47 = vld [vmem:[%s11641_s3 + $0x178] sm:$0xff] }
 0x657   :  { %8890 = vmatprep.subr.mxu0 %v10529_v58  ;;  %8926 = vmatpush3.msra.mxu1 %v10497_v38 }
 0x658   :  { %8891 = vmatpush3.msra.mxu0 %v10529_v58  ;;  %8927 = vmatprep.subr.mxu1 %v10507_v41 }
 0x659   :  { %8892 = vmatprep.subr.mxu0 %v10536_v59  ;;  %8928 = vmatpush3.msra.mxu1 %v10507_v41 }
 0x65a   :  { %8893 = vmatpush3.msra.mxu0 %v10536_v59  ;;  %8929 = vmatprep.subr.mxu1 %v10524_v32  ;;  %v5248_v59 = vld [vmem:[%s11641_s3 + $0x170] sm:$0xff] }
 0x65b   :  { %8894 = vmatprep.subr.mxu0 %v10553_v8  ;;  %8930 = vmatpush3.msra.mxu1 %v10524_v32 }
 0x65c   :  { %8895 = vmatpush3.msra.mxu0 %v10553_v8  ;;  %8931 = vmatprep.subr.mxu1 %v10538_v60 }
 0x65d   :  { %8896 = vmatprep.subr.mxu0 %v10571_v50  ;;  %8932 = vmatpush3.msra.mxu1 %v10538_v60 }
 0x65e   :  { %8897 = vmatpush3.msra.mxu0 %v10571_v50  ;;  %8933 = vmatprep.subr.mxu1 %v10563_v39 }
 0x65f   :  { %8898 = vmatprep.subr.mxu0 %v10593_v1  ;;  %8934 = vmatpush3.msra.mxu1 %v10563_v39 }
 0x660   :  { %8899 = vmatpush3.msra.mxu0 %v10593_v1  ;;  %8935 = vmatprep.subr.mxu1 %v10580_v19  ;;  %v5246_v1 = vld [vmem:[%s11641_s3 + $0x160] sm:$0xff] }
 0x661   :  { %8900 = vmatprep.subr.mxu0 %v10608_v10  ;;  %8936 = vmatpush3.msra.mxu1 %v10580_v19 }
 0x662   :  { %8901 = vmatpush3.msra.mxu0 %v10608_v10  ;;  %8937 = vmatprep.subr.mxu1 %v10595_v22 }
 0x663   :  { %8902 = vmatprep.subr.mxu0 %v10623_v31  ;;  %8938 = vmatpush3.msra.mxu1 %v10595_v22 }
 0x664   :  { %8903 = vmatpush3.msra.mxu0 %v10623_v31  ;;  %8939 = vmatprep.subr.mxu1 %v10610_v37 }
 0x665   :  { %8904 = vmatprep.subr.mxu0 %v10639_v49  ;;  %8940 = vmatpush3.msra.mxu1 %v10610_v37 }
 0x666   :  { %8905 = vmatpush3.msra.mxu0 %v10639_v49  ;;  %8941 = vmatprep.subr.mxu1 %v10625_v12  ;;  %v10975_v49 = vand.u32 4294901760, %v5246_v1 }
 0x667   :  { %8906 = vmatprep.subr.mxu0 %v10652_v25  ;;  %8942 = vmatpush3.msra.mxu1 %v10625_v12 }
 0x668   :  { %8907 = vmatpush3.msra.mxu0 %v10652_v25  ;;  %8943 = vmatprep.subr.mxu1 %v10641_v14 }
 0x669   :  { %8908 = vmatprep.subr.mxu0 %v10667_v45  ;;  %8944 = vmatpush3.msra.mxu1 %v10641_v14 }
 0x66a   :  { %8909 = vmatpush3.msra.mxu0 %v10667_v45  ;;  %8945 = vmatprep.subr.mxu1 %v10654_v17 }
 0x66b   :  { %8910 = vmatprep.subr.mxu0 %v10681_v5  ;;  %8946 = vmatpush3.msra.mxu1 %v10654_v17 }
 0x66c   :  { %8911 = vmatpush3.msra.mxu0 %v10681_v5  ;;  %8914 = vmatprep.mubr.f32.mxu0 %v10692_v44 }
 0x66d   :  { %8912 = vmatprep.subr.mxu0 %v10696_v20  ;;  %8947 = vmatprep.subr.mxu1 %v10672_v28 }
 0x66e   :  { %8913 = vmatpush3.msra.mxu0 %v10696_v20  ;;  %8948 = vmatpush3.msra.mxu1 %v10672_v28  ;;  %v11006_v20 = vsub.f32 %v5246_v1, %v10975_v49 }
 0x66f   :  { %8915 = vmatmul.mubr.f32.vlgmr.msra.gmra.mxu0 %v10722_v16  ;;  %8952 = vmatprep.subr.mxu0 %v10490_v6 }
 0x670   :  { %8949 = vmatprep.mubr.f32.mxu1 %v10711_v13  ;;  %8953 = vmatpush3.msra.mxu0 %v10490_v6 }
 0x671   :  { %8987 = vmatprep.subr.mxu1 %v10448_v46  ;;  %8950 = vmatmul.mubr.f32.vlgmr.msra.gmra.mxu1 %v10733_v33 }
 0x672   :  { %8954 = vmatprep.subr.mxu0 %v10505_v11  ;;  %8988 = vmatpush3.msra.mxu1 %v10448_v46  ;;  %v5254_v46 = vld [vmem:[%s11641_s3 + $0x1a0] sm:$0xff] }
 0x673   :  { %8955 = vmatpush3.msra.mxu0 %v10505_v11  ;;  %8989 = vmatprep.subr.mxu1 %v10456_v56  ;;  %v10861_v36 = vand.u32 4294901760, %v5254_v46 }
 0x674   :  { %8956 = vmatprep.subr.mxu0 %v10522_v54  ;;  %8990 = vmatpush3.msra.mxu1 %v10456_v56  ;;  %v5253_v56 = vld [vmem:[%s11641_s3 + $0x198] sm:$0xff] }
 0x675   :  { %8957 = vmatpush3.msra.mxu0 %v10522_v54  ;;  %8991 = vmatprep.subr.mxu1 %v10465_v27  ;;  %v10870_v63 = vand.u32 4294901760, %v5253_v56  ;;  %v10880_v6 = vsub.f32 %v5254_v46, %v10861_v36  ;;  %v5241_v46 = vld [vmem:[%s11641_s3 + $0x138] sm:$0xff] }
 0x676   :  { %8958 = vmatprep.subr.mxu0 %v10546_v62  ;;  %8992 = vmatpush3.msra.mxu1 %v10465_v27  ;;  %v5252_v27 = vld [vmem:[%s11641_s3 + $0x190] sm:$0xff] }
 0x677   :  { %8959 = vmatpush3.msra.mxu0 %v10546_v62  ;;  %8993 = vmatprep.subr.mxu1 %v10482_v7  ;;  %v10882_v43 = vand.u32 4294901760, %v5252_v27  ;;  %v10892_v11 = vsub.f32 %v5253_v56, %v10870_v63  ;;  %v10904_v54 = vand.u32 4294901760, %v10880_v6 }
 0x678   :  { %8960 = vmatprep.subr.mxu0 %v10561_v55  ;;  %8994 = vmatpush3.msra.mxu1 %v10482_v7  ;;  %v5251_v7 = vld [vmem:[%s11641_s3 + $0x188] sm:$0xff] }
 0x679   :  { %8961 = vmatpush3.msra.mxu0 %v10561_v55  ;;  %8995 = vmatprep.subr.mxu1 %v10497_v38  ;;  %v10921_v62 = vand.u32 4294901760, %v10892_v11  ;;  %v10928_v55 = vand.u32 4294901760, %v5248_v59 }
 0x67a   :  { %8962 = vmatprep.subr.mxu0 %v10568_v15  ;;  %8996 = vmatpush3.msra.mxu1 %v10497_v38  ;;  %v5250_v38 = vld [vmem:[%s11641_s3 + $0x180] sm:$0xff] }
 0x67b   :  { %8963 = vmatpush3.msra.mxu0 %v10568_v15  ;;  %8997 = vmatprep.subr.mxu1 %v10507_v41  ;;  %v10909_v58 = vand.u32 4294901760, %v5250_v38  ;;  %v5365_v15 = vsub.f32 %v10880_v6, %v10904_v54 }
 0x67c   :  { %8964 = vmatprep.subr.mxu0 %v10584_v21  ;;  %8998 = vmatpush3.msra.mxu1 %v10507_v41  ;;  %v10894_v41 = vand.u32 4294901760, %v5251_v7 }
 0x67d   :  { %8965 = vmatpush3.msra.mxu0 %v10584_v21  ;;  %8999 = vmatprep.subr.mxu1 %v10524_v32  ;;  %v5366_v31 = vand.u32 4294901760, %v5365_v15 }
 0x67e   :  { %8966 = vmatprep.subr.mxu0 %v10601_v0  ;;  %9000 = vmatpush3.msra.mxu1 %v10524_v32  ;;  %v10907_v32 = vsub.f32 %v5252_v27, %v10882_v43  ;;  %v10924_v8 = vsub.f32 %v5251_v7, %v10894_v41  ;;  %v11033_v27 = vand.u32 4294901760, %v11006_v20 }
 0x67f   :  { %8967 = vmatpush3.msra.mxu0 %v10601_v0  ;;  %9001 = vmatprep.subr.mxu1 %v10538_v60 }
 0x680   :  { %8968 = vmatprep.subr.mxu0 %v10620_v30  ;;  %9002 = vmatpush3.msra.mxu1 %v10538_v60  ;;  %v10916_v60 = vand.u32 4294901760, %v5249_v47  ;;  %v10938_v50 = vand.u32 4294901760, %v10907_v32  ;;  %v10956_v0 = vand.u32 4294901760, %v10924_v8 }
 0x681   :  { %8969 = vmatpush3.msra.mxu0 %v10620_v30  ;;  %9003 = vmatprep.subr.mxu1 %v10563_v39  ;;  %v5245_v30 = vld [vmem:[%s11641_s3 + $0x158] sm:$0xff] }
 0x682   :  { %8970 = vmatprep.subr.mxu0 %v10636_v48  ;;  %9004 = vmatpush3.msra.mxu1 %v10563_v39  ;;  %v5247_v39 = vld [vmem:[%s11641_s3 + $0x168] sm:$0xff]  ;;  %v10946_v21 = vsub.f32 %v5249_v47, %v10916_v60  ;;  %v10992_v45 = vand.u32 4294901760, %v5245_v30 }
 0x683   :  { %8971 = vmatpush3.msra.mxu0 %v10636_v48  ;;  %9005 = vmatprep.subr.mxu1 %v10580_v19  ;;  %v10958_v10 = vand.u32 4294901760, %v5247_v39 }
 0x684   :  { %8972 = vmatprep.subr.mxu0 %v10649_v24  ;;  %9006 = vmatpush3.msra.mxu1 %v10580_v19  ;;  %v10941_v19 = vsub.f32 %v5250_v38, %v10909_v58  ;;  %v11021_v3 = vsub.f32 %v5245_v30, %v10992_v45  ;;  %v11038_v38 = vand.u32 4294901760, %v5242_v9 }
 0x685   :  { %8973 = vmatpush3.msra.mxu0 %v10649_v24  ;;  %9007 = vmatprep.subr.mxu1 %v10595_v22  ;;  %v5244_v24 = vld [vmem:[%s11641_s3 + $0x150] sm:$0xff] }
 0x686   :  { %8974 = vmatprep.subr.mxu0 %v10664_v51  ;;  %9008 = vmatpush3.msra.mxu1 %v10595_v22  ;;  %v5372_v22 = vsub.f32 %v10892_v11, %v10921_v62  ;;  %v10973_v48 = vand.u32 4294901760, %v10941_v19  ;;  %v11048_v15 = vand.u32 4294901760, %v11021_v3 }
 0x687   :  { %8975 = vmatpush3.msra.mxu0 %v10664_v51  ;;  %9009 = vmatprep.subr.mxu1 %v10610_v37  ;;  %v10990_v51 = vsub.f32 %v5247_v39, %v10958_v10 }
 0x688   :  { %8976 = vmatprep.subr.mxu0 %v10678_v35  ;;  %9010 = vmatpush3.msra.mxu1 %v10610_v37  ;;  %v10963_v37 = vsub.f32 %v5248_v59, %v10928_v55  ;;  %v5373_v25 = vand.u32 4294901760, %v5372_v22  ;;  %v5240_v59 = vld [vmem:[%s11641_s3 + $0x130] sm:$0xff]  ;;  %v11053_v22 = vand.u32 4294901760, %v5241_v46 }
 0x689   :  { %8977 = vmatpush3.msra.mxu0 %v10678_v35  ;;  %9011 = vmatprep.subr.mxu1 %v10625_v12  ;;  %v11018_v4 = vand.u32 4294901760, %v10990_v51 }
 0x68a   :  { %8978 = vmatprep.subr.mxu0 %v10689_v42  ;;  %9012 = vmatpush3.msra.mxu1 %v10625_v12  ;;  %v5379_v12 = vsub.f32 %v10907_v32, %v10938_v50  ;;  %v10997_v35 = vand.u32 4294901760, %v10963_v37 }
 0x68b   :  { %8979 = vmatpush3.msra.mxu0 %v10689_v42  ;;  %9013 = vmatprep.subr.mxu1 %v10641_v14  ;;  %v5393_v42 = vsub.f32 %v10941_v19, %v10973_v48  ;;  %v5414_v39 = vsub.f32 %v10990_v51, %v11018_v4 }
 0x68c   :  { %8980 = vmatprep.subr.mxu0 %v10702_v61  ;;  %9014 = vmatpush3.msra.mxu1 %v10641_v14  ;;  %v10980_v14 = vand.u32 4294901760, %v10946_v21  ;;  %v5380_v5 = vand.u32 4294901760, %v5379_v12  ;;  %v5407_v34 = vsub.f32 %v10963_v37, %v10997_v35 }
 0x68d   :  { %8981 = vmatpush3.msra.mxu0 %v10702_v61  ;;  %9015 = vmatprep.subr.mxu1 %v10654_v17  ;;  %v11008_v61 = vand.u32 4294901760, %v5244_v24  ;;  %v5394_v56 = vand.u32 4294901760, %v5393_v42 }
 0x68e   :  { %8982 = vmatprep.subr.mxu0 %v10715_v29  ;;  %9016 = vmatpush3.msra.mxu1 %v10654_v17  ;;  %v5386_v17 = vsub.f32 %v10924_v8, %v10956_v0  ;;  %v5408_v30 = vand.u32 4294901760, %v5407_v34 }
 0x68f   :  { %8983 = vmatpush3.msra.mxu0 %v10715_v29  ;;  %8984 = vmatprep.mubr.f32.mxu0 %v10669_v26  ;;  %v5400_v29 = vsub.f32 %v10946_v21, %v10980_v14  ;;  %v11036_v7 = vsub.f32 %v5244_v24, %v11008_v61  ;;  %v11063_v24 = vsub.f32 %v5242_v9, %v11038_v38 }
 0x690   :  { %9017 = vmatprep.subr.mxu1 %v10672_v28  ;;  %8985 = vmatmul.mubr.f32.vlgmr.msra.gmra.mxu0 %v10705_v57  ;;  %v5387_v2 = vand.u32 4294901760, %v5386_v17  ;;  %v5239_v17 = vld [vmem:[%s11641_s3 + $0x128] sm:$0xff] }
 0x691   :  { %9018 = vmatpush3.msra.mxu1 %v10672_v28  ;;  %9022 = vmatprep.subr.mxu0 %v10861_v36  ;;  %v5243_v28 = vld [vmem:[%s11641_s3 + $0x148] sm:$0xff]  ;;  %v5401_v47 = vand.u32 4294901760, %v5400_v29  ;;  %v11060_v12 = vand.u32 4294901760, %v11036_v7  ;;  %v11078_v29 = vsub.f32 %v5241_v46, %v11053_v22  ;;  %v11081_v9 = vand.u32 4294901760, %v5239_v17 }
 0x692   :  { %9019 = vmatprep.mubr.f32.mxu1 %v10669_v26  ;;  %9023 = vmatpush3.msra.mxu0 %v10861_v36  ;;  %v11023_v52 = vand.u32 4294901760, %v5243_v28 }
 0x693   :  { %9057 = vmatprep.subr.mxu1 %v5366_v31  ;;  %9020 = vmatmul.mubr.f32.vlgmr.msra.gmra.mxu1 %v10705_v57  ;;  %v5435_v34 = vsub.f32 %v11036_v7, %v11060_v12  ;;  %v11101_v53 = vsub.f32 %v5239_v17, %v11081_v9 }
 0x694   :  { %9024 = vmatprep.subr.mxu0 %v10870_v63  ;;  %9058 = vmatpush3.msra.mxu1 %v5366_v31  ;;  %v11051_v1 = vsub.f32 %v5243_v28, %v11023_v52  ;;  %v5421_v31 = vsub.f32 %v11006_v20, %v11033_v27  ;;  %v5415_v28 = vand.u32 4294901760, %v5414_v39 }
 0x695   :  { %9025 = vmatpush3.msra.mxu0 %v10870_v63  ;;  %9059 = vmatprep.subr.mxu1 %v5373_v25 }
 0x696   :  { %9026 = vmatprep.subr.mxu0 %v10882_v43  ;;  %9060 = vmatpush3.msra.mxu1 %v5373_v25  ;;  %v11065_v25 = vand.u32 4294901760, %v5240_v59  ;;  %v11075_v42 = vand.u32 4294901760, %v11051_v1 }
 0x697   :  { %9027 = vmatpush3.msra.mxu0 %v10882_v43  ;;  %9061 = vmatprep.subr.mxu1 %v5380_v5 }
 0x698   :  { %9028 = vmatprep.subr.mxu0 %v10894_v41  ;;  %9062 = vmatpush3.msra.mxu1 %v5380_v5  ;;  %v5428_v5 = vsub.f32 %v11021_v3, %v11048_v15  ;;  %v11090_v39 = vsub.f32 %v5240_v59, %v11065_v25  ;;  %v5436_v59 = vand.u32 4294901760, %v5435_v34  ;;  %v11115_v34 = vand.u32 4294901760, %v11101_v53 }
 0x699   :  { %9029 = vmatpush3.msra.mxu0 %v10894_v41  ;;  %9063 = vmatprep.subr.mxu1 %v5387_v2 }
 0x69a   :  { %9030 = vmatprep.subr.mxu0 %v10909_v58  ;;  %9064 = vmatpush3.msra.mxu1 %v5387_v2  ;;  %v5422_v2 = vand.u32 4294901760, %v5421_v31  ;;  %v5429_v46 = vand.u32 4294901760, %v5428_v5  ;;  %v11097_v31 = vand.u32 4294901760, %v11078_v29  ;;  %v11107_v5 = vand.u32 4294901760, %v11090_v39 }
 0x69b   :  { %9031 = vmatpush3.msra.mxu0 %v10909_v58  ;;  %9065 = vmatprep.subr.mxu1 %v5394_v56 }
 0x69c   :  { %9032 = vmatprep.subr.mxu0 %v10916_v60  ;;  %9066 = vmatpush3.msra.mxu1 %v5394_v56  ;;  %v11087_v56 = vand.u32 4294901760, %v11063_v24  ;;  %v5456_v17 = vsub.f32 %v11078_v29, %v11097_v31 }
 0x69d   :  { %9033 = vmatpush3.msra.mxu0 %v10916_v60  ;;  %9067 = vmatprep.subr.mxu1 %v5401_v47 }
 0x69e   :  { %9034 = vmatprep.subr.mxu0 %v10928_v55  ;;  %9068 = vmatpush3.msra.mxu1 %v5401_v47  ;;  %v5442_v47 = vsub.f32 %v11051_v1, %v11075_v42 }
 0x69f   :  { %9035 = vmatpush3.msra.mxu0 %v10928_v55  ;;  %9069 = vmatprep.subr.mxu1 %v5408_v30 }
 0x6a0   :  { %9036 = vmatprep.subr.mxu0 %v10958_v10  ;;  %9070 = vmatpush3.msra.mxu1 %v5408_v30  ;;  %v5449_v30 = vsub.f32 %v11063_v24, %v11087_v56 }
 0x6a1   :  { %9037 = vmatpush3.msra.mxu0 %v10958_v10  ;;  %9071 = vmatprep.subr.mxu1 %v5415_v28 }
 0x6a2   :  { %9038 = vmatprep.subr.mxu0 %v10975_v49  ;;  %9072 = vmatpush3.msra.mxu1 %v5415_v28  ;;  %v5443_v28 = vand.u32 4294901760, %v5442_v47  ;;  %v5450_v23 = vand.u32 4294901760, %v5449_v30  ;;  %v5457_v47 = vand.u32 4294901760, %v5456_v17 }
 0x6a3   :  { %9039 = vmatpush3.msra.mxu0 %v10975_v49  ;;  %9073 = vmatprep.subr.mxu1 %v5422_v2 }
 0x6a4   :  { %9040 = vmatprep.subr.mxu0 %v10992_v45  ;;  %9074 = vmatpush3.msra.mxu1 %v5422_v2  ;;  %v5463_v2 = vsub.f32 %v11090_v39, %v11107_v5 }
 0x6a5   :  { %9041 = vmatpush3.msra.mxu0 %v10992_v45  ;;  %9075 = vmatprep.subr.mxu1 %v5429_v46 }
 0x6a6   :  { %9042 = vmatprep.subr.mxu0 %v11008_v61  ;;  %9076 = vmatpush3.msra.mxu1 %v5429_v46  ;;  %v5470_v46 = vsub.f32 %v11101_v53, %v11115_v34  ;;  %v5464_v30 = vand.u32 4294901760, %v5463_v2 }
 0x6a7   :  { %9043 = vmatpush3.msra.mxu0 %v11008_v61  ;;  %9077 = vmatprep.subr.mxu1 %v5436_v59 }
 0x6a8   :  { %9044 = vmatprep.subr.mxu0 %v11023_v52  ;;  %9078 = vmatpush3.msra.mxu1 %v5436_v59  ;;  %v5471_v59 = vand.u32 4294901760, %v5470_v46 }
 0x6a9   :  { %9045 = vmatpush3.msra.mxu0 %v11023_v52  ;;  %9079 = vmatprep.subr.mxu1 %v5443_v28 }
 0x6aa   :  { %9046 = vmatprep.subr.mxu0 %v11038_v38  ;;  %9080 = vmatpush3.msra.mxu1 %v5443_v28 }
 0x6ab   :  { %9047 = vmatpush3.msra.mxu0 %v11038_v38  ;;  %9081 = vmatprep.subr.mxu1 %v5450_v23 }
 0x6ac   :  { %9048 = vmatprep.subr.mxu0 %v11053_v22  ;;  %9082 = vmatpush3.msra.mxu1 %v5450_v23  ;;  %v7684_v23 = vld [vmem:[%s11642_s4 + $0x7] ss:$0 sm:$0xff] }
 0x6ad   :  { %9049 = vmatpush3.msra.mxu0 %v11053_v22  ;;  %9083 = vmatprep.subr.mxu1 %v5457_v47 }
 0x6ae   :  { %9050 = vmatprep.subr.mxu0 %v11065_v25  ;;  %9084 = vmatpush3.msra.mxu1 %v5457_v47 }
 0x6af   :  { %9051 = vmatpush3.msra.mxu0 %v11065_v25  ;;  %9085 = vmatprep.subr.mxu1 %v5464_v30 }
 0x6b0   :  { %9052 = vmatprep.subr.mxu0 %v11081_v9  ;;  %9086 = vmatpush3.msra.mxu1 %v5464_v30 }
 0x6b1   :  { %9053 = vmatpush3.msra.mxu0 %v11081_v9  ;;  %9054 = vmatprep.mubr.f32.mxu0 %v10736_v18 }
 0x6b2   :  { %9087 = vmatprep.subr.mxu1 %v5471_v59  ;;  %9055 = vmatmul.mubr.f32.vlgmr.msra.gmra.mxu0 %v10748_v40 }
 0x6b3   :  { %9088 = vmatpush3.msra.mxu1 %v5471_v59  ;;  %9092 = vmatprep.subr.mxu0 %v10880_v6 }
 0x6b4   :  { %9089 = vmatprep.mubr.f32.mxu1 %v10669_v26  ;;  %9093 = vmatpush3.msra.mxu0 %v10880_v6 }
 0x6b5   :  { %9127 = vmatprep.subr.mxu1 %v10861_v36  ;;  %9090 = vmatmul.mubr.f32.vlgmr.msra.gmra.mxu1 %v10705_v57 }
 0x6b6   :  { %9094 = vmatprep.subr.mxu0 %v10892_v11  ;;  %9128 = vmatpush3.msra.mxu1 %v10861_v36 }
 0x6b7   :  { %9095 = vmatpush3.msra.mxu0 %v10892_v11  ;;  %9129 = vmatprep.subr.mxu1 %v10870_v63 }
 0x6b8   :  { %9096 = vmatprep.subr.mxu0 %v10907_v32  ;;  %9130 = vmatpush3.msra.mxu1 %v10870_v63 }
 0x6b9   :  { %9097 = vmatpush3.msra.mxu0 %v10907_v32  ;;  %9131 = vmatprep.subr.mxu1 %v10882_v43 }
 0x6ba   :  { %9098 = vmatprep.subr.mxu0 %v10924_v8  ;;  %9132 = vmatpush3.msra.mxu1 %v10882_v43 }
 0x6bb   :  { %9099 = vmatpush3.msra.mxu0 %v10924_v8  ;;  %9133 = vmatprep.subr.mxu1 %v10894_v41 }
 0x6bc   :  { %9100 = vmatprep.subr.mxu0 %v10941_v19  ;;  %9134 = vmatpush3.msra.mxu1 %v10894_v41 }
 0x6bd   :  { %9101 = vmatpush3.msra.mxu0 %v10941_v19  ;;  %9135 = vmatprep.subr.mxu1 %v10909_v58 }
 0x6be   :  { %9102 = vmatprep.subr.mxu0 %v10946_v21  ;;  %9136 = vmatpush3.msra.mxu1 %v10909_v58 }
 0x6bf   :  { %9103 = vmatpush3.msra.mxu0 %v10946_v21  ;;  %9137 = vmatprep.subr.mxu1 %v10916_v60 }
 0x6c0   :  { %9104 = vmatprep.subr.mxu0 %v10963_v37  ;;  %9138 = vmatpush3.msra.mxu1 %v10916_v60 }
 0x6c1   :  { %9105 = vmatpush3.msra.mxu0 %v10963_v37  ;;  %9139 = vmatprep.subr.mxu1 %v10928_v55 }
 0x6c2   :  { %9106 = vmatprep.subr.mxu0 %v10990_v51  ;;  %9140 = vmatpush3.msra.mxu1 %v10928_v55 }
 0x6c3   :  { %9107 = vmatpush3.msra.mxu0 %v10990_v51  ;;  %9141 = vmatprep.subr.mxu1 %v10958_v10 }
 0x6c4   :  { %9108 = vmatprep.subr.mxu0 %v11006_v20  ;;  %9142 = vmatpush3.msra.mxu1 %v10958_v10 }
 0x6c5   :  { %9109 = vmatpush3.msra.mxu0 %v11006_v20  ;;  %9143 = vmatprep.subr.mxu1 %v10975_v49 }
 0x6c6   :  { %9110 = vmatprep.subr.mxu0 %v11021_v3  ;;  %9144 = vmatpush3.msra.mxu1 %v10975_v49 }
 0x6c7   :  { %9111 = vmatpush3.msra.mxu0 %v11021_v3  ;;  %9145 = vmatprep.subr.mxu1 %v10992_v45 }
 0x6c8   :  { %9112 = vmatprep.subr.mxu0 %v11036_v7  ;;  %9146 = vmatpush3.msra.mxu1 %v10992_v45 }
 0x6c9   :  { %9113 = vmatpush3.msra.mxu0 %v11036_v7  ;;  %9147 = vmatprep.subr.mxu1 %v11008_v61 }
 0x6ca   :  { %9114 = vmatprep.subr.mxu0 %v11051_v1  ;;  %9148 = vmatpush3.msra.mxu1 %v11008_v61 }
 0x6cb   :  { %9115 = vmatpush3.msra.mxu0 %v11051_v1  ;;  %9149 = vmatprep.subr.mxu1 %v11023_v52  ;;  %v5950_v1 = vld [vmem:[%s11641_s3 + $0x1a8] sm:$0xff] }
 0x6cc   :  { %9116 = vmatprep.subr.mxu0 %v11063_v24  ;;  %9150 = vmatpush3.msra.mxu1 %v11023_v52 }
 0x6cd   :  { %9117 = vmatpush3.msra.mxu0 %v11063_v24  ;;  %9151 = vmatprep.subr.mxu1 %v11038_v38 }
 0x6ce   :  { %9118 = vmatprep.subr.mxu0 %v11078_v29  ;;  %9152 = vmatpush3.msra.mxu1 %v11038_v38 }
 0x6cf   :  { %9119 = vmatpush3.msra.mxu0 %v11078_v29  ;;  %9153 = vmatprep.subr.mxu1 %v11053_v22 }
 0x6d0   :  { %9120 = vmatprep.subr.mxu0 %v11090_v39  ;;  %9154 = vmatpush3.msra.mxu1 %v11053_v22 }
 0x6d1   :  { %9121 = vmatpush3.msra.mxu0 %v11090_v39  ;;  %9155 = vmatprep.subr.mxu1 %v11065_v25 }
 0x6d2   :  { %9122 = vmatprep.subr.mxu0 %v11101_v53  ;;  %9156 = vmatpush3.msra.mxu1 %v11065_v25 }
 0x6d3   :  { %9123 = vmatpush3.msra.mxu0 %v11101_v53  ;;  %9124 = vmatprep.mubr.f32.mxu0 %v10692_v44  ;;  %v8716_v53 = vpop.f32.mrf.mxu0  ;;  %v8735_v44 = vpop.f32.mrf.mxu1 }
 0x6d4   :  { %9157 = vmatprep.subr.mxu1 %v11081_v9  ;;  %9125 = vmatmul.mubr.f32.vlgmr.msra.gmra.mxu0 %v10722_v16  ;;  %v3978_v16 = vadd.f32 %v8716_v53, %v7684_v23 }
 0x6d5   :  { %9158 = vmatpush3.msra.mxu1 %v11081_v9  ;;  %9162 = vmatprep.subr.mxu0 %v10904_v54  ;;  %v4088_v40 = vpop.f32.mrf.mxu1 }
 0x6d6   :  { %9159 = vmatprep.mubr.f32.mxu1 %v10711_v13  ;;  %9163 = vmatpush3.msra.mxu0 %v10904_v54  ;;  %v3967_v13 = vpop.f32.mrf.mxu0 }
 0x6d7   :  { %9197 = vmatprep.subr.mxu1 %v10861_v36  ;;  %9160 = vmatmul.mubr.f32.vlgmr.msra.gmra.mxu1 %v10733_v33  ;;  %v3968_v18 = vadd.f32 %v7684_v23, %v3967_v13 }
 0x6d8   :  { %9164 = vmatprep.subr.mxu0 %v10921_v62  ;;  %9198 = vmatpush3.msra.mxu1 %v10861_v36  ;;  %v4095_v36 = vadd.f32 %v8735_v44, %v3978_v16 }
 0x6d9   :  { %9165 = vmatpush3.msra.mxu0 %v10921_v62  ;;  %9199 = vmatprep.subr.mxu1 %v10870_v63  ;;  %v4089_v11 = vadd.f32 %v4088_v40, %v3968_v18 }
 0x6da   :  { %9166 = vmatprep.subr.mxu0 %v10938_v50  ;;  %9200 = vmatpush3.msra.mxu1 %v10870_v63  ;;  %v8773_v63 = vpop.f32.mrf.mxu1 }
 0x6db   :  { %9167 = vmatpush3.msra.mxu0 %v10938_v50  ;;  %9201 = vmatprep.subr.mxu1 %v10882_v43 }
 0x6dc   :  { %9168 = vmatprep.subr.mxu0 %v10956_v0  ;;  %9202 = vmatpush3.msra.mxu1 %v10882_v43  ;;  %v4270_v54 = vpop.f32.mrf.mxu1 }
 0x6dd   :  { %9169 = vmatpush3.msra.mxu0 %v10956_v0  ;;  %9203 = vmatprep.subr.mxu1 %v10894_v41  ;;  %v11653_v0 = vld [vmem:[#allocation7_spill] sm:$0xff] }
 0x6de   :  { %9170 = vmatprep.subr.mxu0 %v10973_v48  ;;  %9204 = vmatpush3.msra.mxu1 %v10894_v41  ;;  %v8754_v33 = vpop.f32.mrf.mxu0 }
 0x6df   :  { %9171 = vmatpush3.msra.mxu0 %v10973_v48  ;;  %9205 = vmatprep.subr.mxu1 %v10909_v58  ;;  %v4190_v43 = vadd.f32 %v8754_v33, %v4095_v36  ;;  %v11654_v48 = vld [vmem:[#allocation6_spill] sm:$0xff] }
 0x6e0   :  { %9172 = vmatprep.subr.mxu0 %v10980_v14  ;;  %9206 = vmatpush3.msra.mxu1 %v10909_v58  ;;  %v4182_v6 = vpop.f32.mrf.mxu0 }
 0x6e1   :  { %9173 = vmatpush3.msra.mxu0 %v10980_v14  ;;  %9207 = vmatprep.subr.mxu1 %v10916_v60  ;;  %v4183_v41 = vadd.f32 %v4182_v6, %v4089_v11  ;;  %v4279_v32 = vadd.f32 %v8773_v63, %v4190_v43 }
 0x6e2   :  { %9174 = vmatprep.subr.mxu0 %v10997_v35  ;;  %9208 = vmatpush3.msra.mxu1 %v10916_v60 }
 0x6e3   :  { %9175 = vmatpush3.msra.mxu0 %v10997_v35  ;;  %9209 = vmatprep.subr.mxu1 %v10928_v55  ;;  %v4271_v8 = vadd.f32 %v4270_v54, %v4183_v41 }
 0x6e4   :  { %9176 = vmatprep.subr.mxu0 %v11018_v4  ;;  %9210 = vmatpush3.msra.mxu1 %v10928_v55 }
 0x6e5   :  { %9177 = vmatpush3.msra.mxu0 %v11018_v4  ;;  %9211 = vmatprep.subr.mxu1 %v10958_v10 }
 0x6e6   :  { %9178 = vmatprep.subr.mxu0 %v11033_v27  ;;  %9212 = vmatpush3.msra.mxu1 %v10958_v10 }
 0x6e7   :  { %9179 = vmatpush3.msra.mxu0 %v11033_v27  ;;  %9213 = vmatprep.subr.mxu1 %v10975_v49  ;;  %v5951_v27 = vld [vmem:[%s11641_s3 + $0x1b0] sm:$0xff] }
 0x6e8   :  { %9180 = vmatprep.subr.mxu0 %v11048_v15  ;;  %9214 = vmatpush3.msra.mxu1 %v10975_v49  ;;  %v8811_v58 = vpop.f32.mrf.mxu1 }
 0x6e9   :  { %9181 = vmatpush3.msra.mxu0 %v11048_v15  ;;  %9215 = vmatprep.subr.mxu1 %v10992_v45  ;;  %v11315_v15 = vand.u32 4294901760, %v5951_v27 }
 0x6ea   :  { %9182 = vmatprep.subr.mxu0 %v11060_v12  ;;  %9216 = vmatpush3.msra.mxu1 %v10992_v45  ;;  %v4458_v21 = vpop.f32.mrf.mxu1 }
 0x6eb   :  { %9183 = vmatpush3.msra.mxu0 %v11060_v12  ;;  %9217 = vmatprep.subr.mxu1 %v11008_v61  ;;  %v11328_v24 = vsub.f32 %v5951_v27, %v11315_v15 }
 0x6ec   :  { %9184 = vmatprep.subr.mxu0 %v11075_v42  ;;  %9218 = vmatpush3.msra.mxu1 %v11008_v61 }
 0x6ed   :  { %9185 = vmatpush3.msra.mxu0 %v11075_v42  ;;  %9219 = vmatprep.subr.mxu1 %v11023_v52 }
 0x6ee   :  { %9186 = vmatprep.subr.mxu0 %v11087_v56  ;;  %9220 = vmatpush3.msra.mxu1 %v11023_v52 }
 0x6ef   :  { %9187 = vmatpush3.msra.mxu0 %v11087_v56  ;;  %9221 = vmatprep.subr.mxu1 %v11038_v38  ;;  %v8792_v60 = vpop.f32.mrf.mxu0 }
 0x6f0   :  { %9188 = vmatprep.subr.mxu0 %v11097_v31  ;;  %9222 = vmatpush3.msra.mxu1 %v11038_v38  ;;  %v4380_v62 = vadd.f32 %v8792_v60, %v4279_v32 }
 0x6f1   :  { %9189 = vmatpush3.msra.mxu0 %v11097_v31  ;;  %9223 = vmatprep.subr.mxu1 %v11053_v22  ;;  %v4373_v55 = vpop.f32.mrf.mxu0 }
 0x6f2   :  { %9190 = vmatprep.subr.mxu0 %v11107_v5  ;;  %9224 = vmatpush3.msra.mxu1 %v11053_v22  ;;  %v4465_v50 = vadd.f32 %v8811_v58, %v4380_v62  ;;  %v4374_v19 = vadd.f32 %v4373_v55, %v4271_v8  ;;  %v7685_v62 = vld [vmem:[%s11642_s4 + $0x8] ss:$0 sm:$0xff] }
 0x6f3   :  { %9191 = vmatpush3.msra.mxu0 %v11107_v5  ;;  %9225 = vmatprep.subr.mxu1 %v11065_v25 }
 0x6f4   :  { %9192 = vmatprep.subr.mxu0 %v11115_v34  ;;  %9226 = vmatpush3.msra.mxu1 %v11065_v25  ;;  %v11269_v10 = vadd.f32 %v4465_v50, %v11653_v0  ;;  %v4459_v37 = vadd.f32 %v4458_v21, %v4374_v19  ;;  %v11330_v25 = vand.u32 4294901760, %v5950_v1  ;;  %v7686_v19 = vld [vmem:[%s11642_s4 + $0x9] ss:$0 sm:$0xff] }
 0x6f5   :  { %9193 = vmatpush3.msra.mxu0 %v11115_v34  ;;  %9194 = vmatprep.mubr.f32.mxu0 %v10669_v26 }
 0x6f6   :  { %9227 = vmatprep.subr.mxu1 %v11081_v9  ;;  %9195 = vmatmul.mubr.f32.vlgmr.msra.gmra.mxu0 %v10705_v57  ;;  %v11276_v49 = vadd.f32 %v4459_v37, %v11654_v48  ;;  %v4475_v14 = vsel %vm42_vm0, %v11269_v10, 0.0  ;;  %v4481_v51 = vmul.f32 %v11269_v10, %v11269_v10  ;;  %v11340_v56 = vsub.f32 %v5950_v1, %v11330_v25 }
 0x6f7   :  { %9228 = vmatpush3.msra.mxu1 %v11081_v9  ;;  %9229 = vmatprep.mubr.f32.mxu1 %v10669_v26  ;;  %v5953_v26 = vld [vmem:[%s11641_s3 + $0x1c0] sm:$0xff]  ;;  %v11337_v9 = vand.u32 4294901760, %v11328_v24 }
 0x6f8   :  { %9230 = vmatmul.mubr.f32.vlgmr.msra.gmra.mxu1 %v10705_v57  ;;  %4476 = vadd.xlane.f32.xlu0 %v4475_v14  ;;  %v4472_v45 = vsel %vm42_vm0, %v11276_v49, 0.0  ;;  %v4480_v35 = vmul.f32 %v11276_v49, %v11276_v49  ;;  %v4485_v20 = vsel %vm42_vm0, %v4481_v51, 0.0  ;;  %v11294_v4 = vand.u32 4294901760, %v5953_v26  ;;  %v5952_v57 = vld [vmem:[%s11641_s3 + $0x1b8] sm:$0xff] }
 0x6f9   :  { %4473 = vadd.xlane.f32.xlu1 %v4472_v45  ;;  %v11302_v52 = vand.u32 4294901760, %v5952_v57  ;;  %v6096_v31 = vsub.f32 %v11328_v24, %v11337_v9  ;;  %v11347_v5 = vand.u32 4294901760, %v11340_v56 }
 0x6fa   :  { %v4482_v61 = vsel %vm42_vm0, %v4480_v35, 0.0  ;;  %v11300_v3 = vsub.f32 %v5953_v26, %v11294_v4  ;;  %9232 = vmatprep.subr.mxu0 %v11294_v4 }
 0x6fb   :  { %9233 = vmatpush3.msra.mxu0 %v11294_v4  ;;  %v11313_v38 = vsub.f32 %v5952_v57, %v11302_v52  ;;  %v6097_v28 = vand.u32 4294901760, %v6096_v31  ;;  %v6103_v17 = vsub.f32 %v11340_v56, %v11347_v5 }
 0x6fc   :  { %4486 = vadd.xlane.f32.xlu0 %v4485_v20  ;;  %v11310_v7 = vand.u32 4294901760, %v11300_v3  ;;  %9234 = vmatprep.subr.mxu0 %v11302_v52 }
 0x6fd   :  { %4483 = vadd.xlane.f32.xlu1 %v4482_v61  ;;  %9235 = vmatpush3.msra.mxu0 %v11302_v52  ;;  %v11325_v12 = vand.u32 4294901760, %v11313_v38  ;;  %v6104_v34 = vand.u32 4294901760, %v6103_v17 }
 0x6fe   :  { %v6082_v22 = vsub.f32 %v11300_v3, %v11310_v7  ;;  %9236 = vmatprep.subr.mxu0 %v11315_v15 }
 0x6ff   :  { %9237 = vmatpush3.msra.mxu0 %v11315_v15  ;;  %v6089_v29 = vsub.f32 %v11313_v38, %v11325_v12 }
 0x700   :  { %v6083_v42 = vand.u32 4294901760, %v6082_v22  ;;  %9238 = vmatprep.subr.mxu0 %v11330_v25 }
 0x701   :  { %9239 = vmatpush3.msra.mxu0 %v11330_v25  ;;  %v6090_v39 = vand.u32 4294901760, %v6089_v29 }
 0x702   :  { %9243 = vmatprep.subr.mxu1 %v6083_v42  ;;  %9254 = vmatprep.subr.mxu0 %v11300_v3 }
 0x703   :  { %9244 = vmatpush3.msra.mxu1 %v6083_v42  ;;  %v7690_v42 = vld [vmem:[%s11642_s4 + $0xb] ss:$0 sm:$0xff] }
 0x704   :  { %9245 = vmatprep.subr.mxu1 %v6090_v39 }
 0x705   :  { %9246 = vmatpush3.msra.mxu1 %v6090_v39 }
 0x706   :  { %9247 = vmatprep.subr.mxu1 %v6097_v28 }
 0x707   :  { %9248 = vmatpush3.msra.mxu1 %v6097_v28 }
 0x708   :  { %9249 = vmatprep.subr.mxu1 %v6104_v34 }
 0x709   :  { %9250 = vmatpush3.msra.mxu1 %v6104_v34 }
 0x70a   :  { %9265 = vmatprep.subr.mxu1 %v11294_v4 }
 0x70d   :  { %v8881_v41 = vpop.f32.mrf.mxu1 }
 0x70f   :  { %v8846_v43 = vpop.f32.mrf.mxu0  ;;  %v4803_v55 = vpop.f32.mrf.mxu1 }
 0x711   :  { %v4642_v11 = vpop.f32.mrf.mxu0 }
 0x72f   :  { %v8916_v54 = vpop.f32.mrf.mxu0 }
 0x731   :  { %v4913_v0 = vpop.f32.mrf.mxu0  ;;  %v8951_v37 = vpop.f32.mrf.mxu1 }
 0x733   :  { %v5009_v35 = vpop.f32.mrf.mxu1 }
 0x753   :  { %v9021_v26 = vpop.f32.mrf.mxu1 }
 0x755   :  { %v5229_v22 = vpop.f32.mrf.mxu1 }
 0x775   :  { %v9091_v28 = vpop.f32.mrf.mxu1 }
 0x781   :  { %v4477_v2 = vpop.xlane.xlu0 %4476 }
 0x782   :  { %v4479_v47 = vmul.f32 0.03125, %v4477_v2  ;;  %v4474_v46 = vpop.xlane.xlu1 %4473 }
 0x783   :  { %v4478_v30 = vmul.f32 0.03125, %v4474_v46 }
 0x784   :  { %v4491_v53 = vmul.f32 %v4479_v47, %v4479_v47  ;;  %v4497_v32 = vsub.f32 %v11269_v10, %v4479_v47  ;;  %v7689_v10 = vld [vmem:[%s11642_s4 + $0xa] ss:$0 sm:$0xff] }
 0x785   :  { %v4487_v59 = vpop.xlane.xlu0 %4486  ;;  %v4490_v13 = vmul.f32 %v4478_v30, %v4478_v30  ;;  %v4496_v60 = vsub.f32 %v11276_v49, %v4478_v30  ;;  %v8986_v49 = vpop.f32.mrf.mxu0  ;;  %v4653_v20 = vadd.f32 %v8846_v43, %v7689_v10  ;;  %v4643_v57 = vadd.f32 %v7689_v10, %v4642_v11 }
 0x786   :  { %v4489_v23 = vmul.f32 0.03125, %v4487_v59  ;;  %v4484_v44 = vpop.xlane.xlu1 %4483  ;;  %v5508_v30 = vpop.f32.mrf.mxu1 }
 0x787   :  { %v4488_v16 = vmul.f32 0.03125, %v4484_v44  ;;  %v5136_v61 = vpop.f32.mrf.mxu0  ;;  %v4810_v1 = vadd.f32 %v8881_v41, %v4653_v20  ;;  %v4804_v29 = vadd.f32 %v4803_v55, %v4643_v57 }
 0x788   :  { %v4493_v33 = vsub.f32 %v4489_v23, %v4491_v53 }
 0x789   :  { %v4492_v18 = vsub.f32 %v4488_v16, %v4490_v13  ;;  %v9056_v27 = vpop.f32.mrf.mxu0  ;;  %v4921_v39 = vadd.f32 %v8916_v54, %v4810_v1  ;;  %v4914_v17 = vadd.f32 %v4913_v0, %v4804_v29 }
 0x78a   :  { %v4495_v40 = vmax.f32 %v4493_v33, 0.0  ;;  %v5358_v34 = vadd.f32 %v9056_v27, %v7690_v42 }
 0x78b   :  { %v4494_v36 = vmax.f32 %v4492_v18, 0.0  ;;  %v5347_v31 = vpop.f32.mrf.mxu0  ;;  %v5018_v47 = vadd.f32 %v8951_v37, %v4921_v39  ;;  %v5010_v59 = vadd.f32 %v5009_v35, %v4914_v17 }
 0x78c   :  { %v4499_v63 = vadd.f32 1e-05, %v4495_v40  ;;  %v5348_v46 = vadd.f32 %v7690_v42, %v5347_v31  ;;  %v5515_v23 = vadd.f32 %v9091_v28, %v5358_v34 }
 0x78d   :  { %v4498_v6 = vadd.f32 1e-05, %v4494_v36  ;;  %v5143_v53 = vadd.f32 %v8986_v49, %v5018_v47  ;;  %v5137_v16 = vadd.f32 %v5136_v61, %v5010_v59 }
 0x78e   :  { %9471 = vrsqrt.f32 %v4499_v63  ;;  %v5509_v33 = vadd.f32 %v5508_v30, %v5348_v46 }
 0x78f   :  { %9473 = vrsqrt.f32 %v4498_v6  ;;  %v5236_v40 = vadd.f32 %v9021_v26, %v5143_v53  ;;  %v5230_v6 = vadd.f32 %v5229_v22, %v5137_v16  ;;  %v7691_v53 = vld [vmem:[%s11642_s4 + $0xc] ss:$0 sm:$0xff] }
 0x791   :  { %v5945_v41 = vadd.f32 1.0, %v5236_v40 }
 0x794   :  { %v9126_v2 = vpop.f32.mrf.mxu0 }
 0x795   :  { %v5626_v18 = vadd.f32 %v9126_v2, %v5515_v23 }
 0x796   :  { %v5618_v44 = vpop.f32.mrf.mxu0 }
 0x797   :  { %v9161_v13 = vpop.f32.mrf.mxu1  ;;  %v5619_v36 = vadd.f32 %v5618_v44, %v5509_v33 }
 0x798   :  { %v5723_v43 = vadd.f32 %v9161_v13, %v5626_v18 }
 0x799   :  { %v5714_v63 = vpop.f32.mrf.mxu1 }
 0x79a   :  { %v5715_v54 = vadd.f32 %v5714_v63, %v5619_v36 }
 0x79b   :  { %v9472_v58 = vpop.eup %9471 }
 0x79c   :  { %v9474_v8 = vpop.eup %9473  ;;  %v4503_v50 = vmul.f32 %v9472_v58, %v4497_v32 }
 0x79d   :  { %v4502_v21 = vmul.f32 %v9474_v8, %v4496_v60 }
 0x79e   :  { %v4509_v48 = vmul.f32 %v7685_v62, %v4503_v50 }
 0x79f   :  { %v4508_v14 = vmul.f32 %v7685_v62, %v4502_v21  ;;  %v5944_v62 = vadd.f32 1.0, %v5230_v6 }
 0x7a0   :  { %v4515_v51 = vadd.f32 %v7686_v19, %v4509_v48 }
 0x7a1   :  { %v4514_v45 = vadd.f32 %v7686_v19, %v4508_v14 }
 0x7a2   :  { %4517 = vst.msk [vmem:[#allocation2 + $0x8] sm:$0xff] %vm42_vm0, %v4515_v51  ;;  %v5947_v55 = vmul.f32 %v5945_v41, %v4515_v51 }
 0x7a3   :  { %4516 = vst.msk [vmem:[#allocation2] sm:$0xff] %vm42_vm0, %v4514_v45  ;;  %v5946_v37 = vmul.f32 %v5944_v62, %v4514_v45 }
 0x7b6   :  { %v9196_v11 = vpop.f32.mrf.mxu0 }
 0x7b7   :  { %v5848_v32 = vadd.f32 %v9196_v11, %v5723_v43 }
 0x7b8   :  { %v9231_v58 = vpop.f32.mrf.mxu1  ;;  %v5841_v60 = vpop.f32.mrf.mxu0 }
 0x7b9   :  { %v5941_v8 = vadd.f32 %v9231_v58, %v5848_v32  ;;  %v5842_v50 = vadd.f32 %v5841_v60, %v5715_v54 }
 0x7ba   :  { %v5934_v19 = vpop.f32.mrf.mxu1 }
 0x7bb   :  { %v5949_v21 = vadd.f32 %v5947_v55, %v5941_v8  ;;  %v5935_v0 = vadd.f32 %v5934_v19, %v5842_v50 }
 0x7bd   :  { %v5963_v48 = vsel %vm42_vm0, %v5949_v21, 0  ;;  %v5948_v14 = vadd.f32 %v5946_v37, %v5935_v0 }
 0x7be   :  { %v6044_v10 = vand.u32 4294901760, %v5963_v48 }
 0x7bf   :  { %v5960_v49 = vsel %vm42_vm0, %v5948_v14, 0 }
 0x7c0   :  { %v6045_v35 = vsub.f32 %v5963_v48, %v6044_v10  ;;  %v6034_v20 = vand.u32 4294901760, %v5960_v49 }
 0x7c2   :  { %v6035_v61 = vsub.f32 %v5960_v49, %v6034_v20  ;;  %9251 = vmatprep.mubr.f32.mxu1 %v6034_v20  ;;  %v6046_v26 = vand.u32 4294901760, %v6045_v35 }
 0x7c3   :  { %9252 = vmatmul.mubr.f32.vlgmr.msra.gmra.mxu1 %v6044_v10 }
 0x7c4   :  { %9266 = vmatpush3.msra.mxu1 %v11294_v4  ;;  %v6036_v51 = vand.u32 4294901760, %v6035_v61  ;;  %v6047_v57 = vsub.f32 %v6045_v35, %v6046_v26 }
 0x7c5   :  { %9267 = vmatprep.subr.mxu1 %v11302_v52 }
 0x7c6   :  { %9268 = vmatpush3.msra.mxu1 %v11302_v52  ;;  %9273 = vmatprep.mubr.f32.mxu1 %v6036_v51  ;;  %v6037_v45 = vsub.f32 %v6035_v61, %v6036_v51  ;;  %v6048_v1 = vand.u32 4294901760, %v6047_v57 }
 0x7c7   :  { %9269 = vmatprep.subr.mxu1 %v11315_v15 }
 0x7c8   :  { %9270 = vmatpush3.msra.mxu1 %v11315_v15  ;;  %v6038_v27 = vand.u32 4294901760, %v6037_v45 }
 0x7c9   :  { %9271 = vmatprep.subr.mxu1 %v11330_v25 }
 0x7ca   :  { %9272 = vmatpush3.msra.mxu1 %v11330_v25  ;;  %9240 = vmatprep.mubr.f32.mxu0 %v6038_v27 }
 0x7cb   :  { %9274 = vmatmul.mubr.f32.vlgmr.msra.gmra.mxu1 %v6046_v26  ;;  %9287 = vmatprep.subr.mxu1 %v11294_v4 }
 0x7cc   :  { %9241 = vmatmul.mubr.f32.vlgmr.msra.gmra.mxu0 %v6048_v1  ;;  %9288 = vmatpush3.msra.mxu1 %v11294_v4  ;;  %v6498_v4 = vld [vmem:[%s11641_s3 + $0x1e0] sm:$0xff] }
 0x7cd   :  { %9255 = vmatpush3.msra.mxu0 %v11300_v3  ;;  %9295 = vmatprep.mubr.f32.mxu1 %v6034_v20  ;;  %v11404_v3 = vand.u32 4294901760, %v6498_v4  ;;  %v11501_v1 = vld [vmem:[%s11639_s1] sm:$0xff] }
 0x7ce   :  { %9256 = vmatprep.subr.mxu0 %v11313_v38  ;;  %9262 = vmatprep.mubr.f32.mxu0 %v6035_v61 }
 0x7cf   :  { %9289 = vmatprep.subr.mxu1 %v11302_v52  ;;  %9257 = vmatpush3.msra.mxu0 %v11313_v38 }
 0x7d0   :  { %9290 = vmatpush3.msra.mxu1 %v11302_v52  ;;  %9258 = vmatprep.subr.mxu0 %v11328_v24  ;;  %v6497_v52 = vld [vmem:[%s11641_s3 + $0x1d8] sm:$0xff] }
 0x7d1   :  { %9291 = vmatprep.subr.mxu1 %v11315_v15  ;;  %9259 = vmatpush3.msra.mxu0 %v11328_v24  ;;  %v11412_v38 = vand.u32 4294901760, %v6497_v52 }
 0x7d2   :  { %9292 = vmatpush3.msra.mxu1 %v11315_v15  ;;  %9260 = vmatprep.subr.mxu0 %v11340_v56  ;;  %v6496_v15 = vld [vmem:[%s11641_s3 + $0x1d0] sm:$0xff] }
 0x7d3   :  { %9293 = vmatprep.subr.mxu1 %v11330_v25  ;;  %9261 = vmatpush3.msra.mxu0 %v11340_v56  ;;  %v11423_v24 = vsub.f32 %v6497_v52, %v11412_v38 }
 0x7d4   :  { %9294 = vmatpush3.msra.mxu1 %v11330_v25  ;;  %9263 = vmatmul.mubr.f32.vlgmr.msra.gmra.mxu0 %v6045_v35  ;;  %v11425_v25 = vand.u32 4294901760, %v6496_v15 }
 0x7d5   :  { %9276 = vmatprep.subr.mxu0 %v11310_v7  ;;  %9296 = vmatmul.mubr.f32.vlgmr.msra.gmra.mxu1 %v6044_v10 }
 0x7d6   :  { %9277 = vmatpush3.msra.mxu0 %v11310_v7  ;;  %9284 = vmatprep.mubr.f32.mxu0 %v6034_v20  ;;  %v11410_v7 = vsub.f32 %v6498_v4, %v11404_v3  ;;  %v11438_v22 = vsub.f32 %v6496_v15, %v11425_v25  ;;  %v11507_v4 = vld [vmem:[%s11639_s1 + $0x8] sm:$0xff] }
 0x7d7   :  { %9278 = vmatprep.subr.mxu0 %v11325_v12  ;;  %7583 = vrot.lane.b32.xlu1 %v11501_v1, %s9512_s15 }
 0x7d8   :  { %9279 = vmatpush3.msra.mxu0 %v11325_v12  ;;  %v11420_v12 = vand.u32 4294901760, %v11410_v7  ;;  %v11447_v31 = vand.u32 4294901760, %v11438_v22  ;;  %7585 = vrot.lane.b32.xlu0 %v11507_v4, %s9512_s15 }
 0x7d9   :  { %9280 = vmatprep.subr.mxu0 %v11337_v9 }
 0x7da   :  { %9281 = vmatpush3.msra.mxu0 %v11337_v9  ;;  %v6495_v9 = vld [vmem:[%s11641_s3 + $0x1c8] sm:$0xff]  ;;  %v6627_v56 = vsub.f32 %v11410_v7, %v11420_v12  ;;  %v6641_v34 = vsub.f32 %v11438_v22, %v11447_v31 }
 0x7db   :  { %9282 = vmatprep.subr.mxu0 %v11347_v5  ;;  %v11440_v42 = vand.u32 4294901760, %v6495_v9 }
 0x7dc   :  { %9283 = vmatpush3.msra.mxu0 %v11347_v5  ;;  %v11435_v5 = vand.u32 4294901760, %v11423_v24  ;;  %v6628_v29 = vand.u32 4294901760, %v6627_v56  ;;  %v6642_v47 = vand.u32 4294901760, %v6641_v34  ;;  %v7040_v56 = vld [vmem:[%s11641_s3 + $0x1e8] sm:$0xff] }
 0x7dd   :  { %9285 = vmatmul.mubr.f32.vlgmr.msra.gmra.mxu0 %v6044_v10  ;;  %9298 = vmatprep.subr.mxu0 %v11404_v3  ;;  %v11450_v28 = vsub.f32 %v6495_v9, %v11440_v42 }
 0x7de   :  { %9299 = vmatpush3.msra.mxu0 %v11404_v3  ;;  %v6634_v39 = vsub.f32 %v11423_v24, %v11435_v5  ;;  %9309 = vmatprep.subr.mxu1 %v6628_v29 }
 0x7df   :  { %9300 = vmatprep.subr.mxu0 %v11412_v38  ;;  %v11457_v2 = vand.u32 4294901760, %v11450_v28  ;;  %9310 = vmatpush3.msra.mxu1 %v6628_v29  ;;  %v11549_v29 = vand.u32 4294901760, %v7040_v56 }
 0x7e0   :  { %9301 = vmatpush3.msra.mxu0 %v11412_v38  ;;  %v6635_v17 = vand.u32 4294901760, %v6634_v39 }
 0x7e1   :  { %9302 = vmatprep.subr.mxu0 %v11425_v25  ;;  %v6648_v46 = vsub.f32 %v11450_v28, %v11457_v2 }
 0x7e2   :  { %9303 = vmatpush3.msra.mxu0 %v11425_v25  ;;  %9311 = vmatprep.subr.mxu1 %v6635_v17 }
 0x7e3   :  { %9304 = vmatprep.subr.mxu0 %v11440_v42  ;;  %9312 = vmatpush3.msra.mxu1 %v6635_v17  ;;  %v6649_v30 = vand.u32 4294901760, %v6648_v46  ;;  %v11559_v17 = vsub.f32 %v7040_v56, %v11549_v29 }
 0x7e4   :  { %9305 = vmatpush3.msra.mxu0 %v11440_v42  ;;  %9313 = vmatprep.subr.mxu1 %v6642_v47 }
 0x7e5   :  { %9320 = vmatprep.subr.mxu0 %v11410_v7  ;;  %9314 = vmatpush3.msra.mxu1 %v6642_v47  ;;  %v11566_v47 = vand.u32 4294901760, %v11559_v17 }
 0x7e6   :  { %9315 = vmatprep.subr.mxu1 %v6649_v30 }
 0x7e7   :  { %9316 = vmatpush3.msra.mxu1 %v6649_v30  ;;  %v7193_v30 = vsub.f32 %v11559_v17, %v11566_v47 }
 0x7e8   :  { %9331 = vmatprep.subr.mxu1 %v11404_v3 }
 0x883   :  { %v9253_v23 = vpop.f32.mrf.mxu1 }
 0x885   :  { %v6141_v18 = vpop.f32.mrf.mxu1 }
 0x88b   :  { %v9275_v36 = vpop.f32.mrf.mxu1 }
 0x88c   :  { %v9242_v59 = vpop.f32.mrf.mxu0 }
 0x88d   :  { %v6051_v13 = vadd.f32 %v9242_v59, %v7691_v53  ;;  %v6311_v41 = vpop.f32.mrf.mxu1  ;;  %v7194_v59 = vand.u32 4294901760, %v7193_v30 }
 0x88e   :  { %v6040_v44 = vpop.f32.mrf.mxu0 }
 0x88f   :  { %v6041_v16 = vadd.f32 %v7691_v53, %v6040_v44  ;;  %v6148_v40 = vadd.f32 %v9253_v23, %v6051_v13  ;;  %v7584_v53 = vpop.permute.xlu1 %7583  ;;  %v7586_v23 = vpop.permute.xlu0 %7585 }
 0x890   :  { %v11573_v44 = vsub.f32 %v11501_v1, %v7584_v53  ;;  %v11576_v13 = vsub.f32 %v11507_v4, %v7586_v23 }
 0x891   :  { %v6142_v43 = vadd.f32 %v6141_v18, %v6041_v16 }
 0x892   :  { %v7591_v16 = vmul.f32 0.5, %v11573_v44  ;;  %v7592_v18 = vmul.f32 0.5, %v11576_v13 }
 0x894   :  { %v9264_v33 = vpop.f32.mrf.mxu0  ;;  %7595 = vrot.lane.b32.xlu1 %v7591_v16, %s9511_s10 }
 0x895   :  { %v6235_v6 = vadd.f32 %v9264_v33, %v6148_v40  ;;  %v9297_v32 = vpop.f32.mrf.mxu1  ;;  %v7692_v40 = vld [vmem:[%s11642_s4 + $0xd] ss:$0 sm:$0xff] }
 0x896   :  { %v6227_v63 = vpop.f32.mrf.mxu0 }
 0x897   :  { %v6228_v11 = vadd.f32 %v6227_v63, %v6142_v43  ;;  %v6320_v54 = vadd.f32 %v9275_v36, %v6235_v6  ;;  %v6483_v19 = vpop.f32.mrf.mxu1 }
 0x898   :  { %7597 = vrot.lane.b32.xlu1 %v7592_v18, %s9511_s10 }
 0x899   :  { %v6312_v62 = vadd.f32 %v6311_v41, %v6228_v11 }
 0x89d   :  { %v9286_v58 = vpop.f32.mrf.mxu0 }
 0x89e   :  { %v6409_v60 = vadd.f32 %v9286_v58, %v6320_v54 }
 0x89f   :  { %v6402_v8 = vpop.f32.mrf.mxu0 }
 0x8a0   :  { %v6490_v55 = vadd.f32 %v9297_v32, %v6409_v60  ;;  %v6403_v50 = vadd.f32 %v6402_v8, %v6312_v62 }
 0x8a2   :  { %v6494_v21 = vmax.f32 %v6490_v55, 0.0  ;;  %v6484_v0 = vadd.f32 %v6483_v19, %v6403_v50 }
 0x8a4   :  { %v6508_v37 = vsel %vm42_vm0, %v6494_v21, 0  ;;  %v6493_v48 = vmax.f32 %v6484_v0, 0.0 }
 0x8a5   :  { %v6589_v14 = vand.u32 4294901760, %v6508_v37 }
 0x8a6   :  { %v6505_v10 = vsel %vm42_vm0, %v6493_v48, 0 }
 0x8a7   :  { %v6590_v49 = vsub.f32 %v6508_v37, %v6589_v14  ;;  %v6579_v35 = vand.u32 4294901760, %v6505_v10 }
 0x8a9   :  { %v6580_v20 = vsub.f32 %v6505_v10, %v6579_v35  ;;  %9317 = vmatprep.mubr.f32.mxu1 %v6579_v35  ;;  %v6591_v61 = vand.u32 4294901760, %v6590_v49 }
 0x8aa   :  { %9318 = vmatmul.mubr.f32.vlgmr.msra.gmra.mxu1 %v6589_v14 }
 0x8ab   :  { %9332 = vmatpush3.msra.mxu1 %v11404_v3  ;;  %v6581_v26 = vand.u32 4294901760, %v6580_v20  ;;  %v6592_v45 = vsub.f32 %v6590_v49, %v6591_v61 }
 0x8ac   :  { %9333 = vmatprep.subr.mxu1 %v11412_v38 }
 0x8ad   :  { %9334 = vmatpush3.msra.mxu1 %v11412_v38  ;;  %9339 = vmatprep.mubr.f32.mxu1 %v6581_v26  ;;  %v6582_v51 = vsub.f32 %v6580_v20, %v6581_v26  ;;  %v6593_v27 = vand.u32 4294901760, %v6592_v45 }
 0x8ae   :  { %9335 = vmatprep.subr.mxu1 %v11425_v25 }
 0x8af   :  { %9336 = vmatpush3.msra.mxu1 %v11425_v25  ;;  %v6583_v57 = vand.u32 4294901760, %v6582_v51 }
 0x8b0   :  { %9337 = vmatprep.subr.mxu1 %v11440_v42 }
 0x8b1   :  { %9338 = vmatpush3.msra.mxu1 %v11440_v42  ;;  %9306 = vmatprep.mubr.f32.mxu0 %v6583_v57 }
 0x8b2   :  { %9340 = vmatmul.mubr.f32.vlgmr.msra.gmra.mxu1 %v6591_v61  ;;  %9353 = vmatprep.subr.mxu1 %v11404_v3 }
 0x8b3   :  { %9307 = vmatmul.mubr.f32.vlgmr.msra.gmra.mxu0 %v6593_v27  ;;  %9354 = vmatpush3.msra.mxu1 %v11404_v3  ;;  %v7043_v3 = vld [vmem:[%s11641_s3 + $0x200] sm:$0xff] }
 0x8b4   :  { %9321 = vmatpush3.msra.mxu0 %v11410_v7  ;;  %9361 = vmatprep.mubr.f32.mxu1 %v6579_v35  ;;  %v11513_v52 = vand.u32 4294901760, %v7043_v3  ;;  %v7042_v7 = vld [vmem:[%s11641_s3 + $0x1f8] sm:$0xff] }
 0x8b5   :  { %9322 = vmatprep.subr.mxu0 %v11423_v24  ;;  %9328 = vmatprep.mubr.f32.mxu0 %v6580_v20  ;;  %v11521_v15 = vand.u32 4294901760, %v7042_v7 }
 0x8b6   :  { %9355 = vmatprep.subr.mxu1 %v11412_v38  ;;  %9323 = vmatpush3.msra.mxu0 %v11423_v24 }
 0x8b7   :  { %9356 = vmatpush3.msra.mxu1 %v11412_v38  ;;  %9324 = vmatprep.subr.mxu0 %v11438_v22  ;;  %v11519_v38 = vsub.f32 %v7043_v3, %v11513_v52 }
 0x8b8   :  { %9357 = vmatprep.subr.mxu1 %v11425_v25  ;;  %9325 = vmatpush3.msra.mxu0 %v11438_v22 }
 0x8b9   :  { %9358 = vmatpush3.msra.mxu1 %v11425_v25  ;;  %9326 = vmatprep.subr.mxu0 %v11450_v28  ;;  %v11529_v24 = vand.u32 4294901760, %v11519_v38  ;;  %v11532_v25 = vsub.f32 %v7042_v7, %v11521_v15 }
 0x8ba   :  { %9359 = vmatprep.subr.mxu1 %v11440_v42  ;;  %9327 = vmatpush3.msra.mxu0 %v11450_v28 }
 0x8bb   :  { %9360 = vmatpush3.msra.mxu1 %v11440_v42  ;;  %9329 = vmatmul.mubr.f32.vlgmr.msra.gmra.mxu0 %v6590_v49  ;;  %v11544_v22 = vand.u32 4294901760, %v11532_v25 }
 0x8bc   :  { %9342 = vmatprep.subr.mxu0 %v11420_v12  ;;  %9362 = vmatmul.mubr.f32.vlgmr.msra.gmra.mxu1 %v6589_v14 }
 0x8bd   :  { %9343 = vmatpush3.msra.mxu0 %v11420_v12  ;;  %9350 = vmatprep.mubr.f32.mxu0 %v6579_v35  ;;  %v7041_v12 = vld [vmem:[%s11641_s3 + $0x1f0] sm:$0xff] }
 0x8be   :  { %9344 = vmatprep.subr.mxu0 %v11435_v5  ;;  %v11534_v9 = vand.u32 4294901760, %v7041_v12 }
 0x8bf   :  { %9345 = vmatpush3.msra.mxu0 %v11435_v5  ;;  %v7172_v5 = vsub.f32 %v11519_v38, %v11529_v24 }
 0x8c0   :  { %9346 = vmatprep.subr.mxu0 %v11447_v31  ;;  %v11547_v42 = vsub.f32 %v7041_v12, %v11534_v9 }
 0x8c1   :  { %9347 = vmatpush3.msra.mxu0 %v11447_v31  ;;  %v7173_v39 = vand.u32 4294901760, %v7172_v5  ;;  %v7179_v31 = vsub.f32 %v11532_v25, %v11544_v22 }
 0x8c2   :  { %9348 = vmatprep.subr.mxu0 %v11457_v2  ;;  %v11556_v28 = vand.u32 4294901760, %v11547_v42 }
 0x8c3   :  { %9349 = vmatpush3.msra.mxu0 %v11457_v2  ;;  %9375 = vmatprep.subr.mxu1 %v7173_v39  ;;  %v7180_v34 = vand.u32 4294901760, %v7179_v31 }
 0x8c4   :  { %9351 = vmatmul.mubr.f32.vlgmr.msra.gmra.mxu0 %v6589_v14  ;;  %9364 = vmatprep.subr.mxu0 %v11513_v52  ;;  %v7186_v2 = vsub.f32 %v11547_v42, %v11556_v28 }
 0x8c5   :  { %9365 = vmatpush3.msra.mxu0 %v11513_v52  ;;  %9376 = vmatpush3.msra.mxu1 %v7173_v39 }
 0x8c6   :  { %9366 = vmatprep.subr.mxu0 %v11521_v15  ;;  %9377 = vmatprep.subr.mxu1 %v7180_v34  ;;  %v7187_v46 = vand.u32 4294901760, %v7186_v2 }
 0x8c7   :  { %9367 = vmatpush3.msra.mxu0 %v11521_v15  ;;  %9378 = vmatpush3.msra.mxu1 %v7180_v34 }
 0x8c8   :  { %9368 = vmatprep.subr.mxu0 %v11534_v9  ;;  %9379 = vmatprep.subr.mxu1 %v7187_v46 }
 0x8c9   :  { %9369 = vmatpush3.msra.mxu0 %v11534_v9  ;;  %9380 = vmatpush3.msra.mxu1 %v7187_v46 }
 0x8ca   :  { %9370 = vmatprep.subr.mxu0 %v11549_v29  ;;  %9381 = vmatprep.subr.mxu1 %v7194_v59 }
 0x8cb   :  { %9371 = vmatpush3.msra.mxu0 %v11549_v29  ;;  %9382 = vmatpush3.msra.mxu1 %v7194_v59 }
 0x8cc   :  { %9386 = vmatprep.subr.mxu0 %v11519_v38  ;;  %9397 = vmatprep.subr.mxu1 %v11513_v52 }
 0x96a   :  { %v9319_v36 = vpop.f32.mrf.mxu1 }
 0x96c   :  { %v6686_v41 = vpop.f32.mrf.mxu1 }
 0x972   :  { %v9341_v32 = vpop.f32.mrf.mxu1 }
 0x973   :  { %v9308_v33 = vpop.f32.mrf.mxu0 }
 0x974   :  { %v6596_v6 = vadd.f32 %v9308_v33, %v7692_v40  ;;  %v6856_v55 = vpop.f32.mrf.mxu1 }
 0x975   :  { %v6585_v63 = vpop.f32.mrf.mxu0 }
 0x976   :  { %v6586_v43 = vadd.f32 %v7692_v40, %v6585_v63  ;;  %v6693_v54 = vadd.f32 %v9319_v36, %v6596_v6 }
 0x978   :  { %v6687_v62 = vadd.f32 %v6686_v41, %v6586_v43 }
 0x97b   :  { %v9330_v11 = vpop.f32.mrf.mxu0 }
 0x97c   :  { %v6780_v60 = vadd.f32 %v9330_v11, %v6693_v54  ;;  %v9363_v19 = vpop.f32.mrf.mxu1 }
 0x97d   :  { %v6772_v58 = vpop.f32.mrf.mxu0 }
 0x97e   :  { %v6773_v8 = vadd.f32 %v6772_v58, %v6687_v62  ;;  %v6865_v50 = vadd.f32 %v9341_v32, %v6780_v60  ;;  %v7028_v49 = vpop.f32.mrf.mxu1 }
 0x980   :  { %v6857_v37 = vadd.f32 %v6856_v55, %v6773_v8  ;;  %v7596_v55 = vpop.permute.xlu1 %7595 }
 0x984   :  { %v9352_v21 = vpop.f32.mrf.mxu0 }
 0x985   :  { %v6954_v0 = vadd.f32 %v9352_v21, %v6865_v50  ;;  %v7598_v50 = vpop.permute.xlu1 %7597  ;;  %v7601_v21 = vadd.f32 %v11501_v1, %v7596_v55 }
 0x986   :  { %v6947_v48 = vpop.f32.mrf.mxu0 }
 0x987   :  { %v7035_v14 = vadd.f32 %v9363_v19, %v6954_v0  ;;  %v6948_v10 = vadd.f32 %v6947_v48, %v6857_v37  ;;  %v7602_v0 = vadd.f32 %v11507_v4, %v7598_v50  ;;  %v11655_v37 = vmov 0  }
 0x989   :  { %v7039_v35 = vmax.f32 %v7035_v14, 0.0  ;;  %v7029_v20 = vadd.f32 %v7028_v49, %v6948_v10 }
 0x98b   :  { %v7053_v61 = vsel %vm42_vm0, %v7039_v35, 0  ;;  %v7038_v26 = vmax.f32 %v7029_v20, 0.0 }
 0x98c   :  { %v7134_v51 = vand.u32 4294901760, %v7053_v61 }
 0x98d   :  { %v7050_v45 = vsel %vm42_vm0, %v7038_v26, 0 }
 0x98e   :  { %v7135_v57 = vsub.f32 %v7053_v61, %v7134_v51  ;;  %v7124_v27 = vand.u32 4294901760, %v7050_v45 }
 0x990   :  { %v7125_v3 = vsub.f32 %v7050_v45, %v7124_v27  ;;  %9383 = vmatprep.mubr.f32.mxu1 %v7124_v27  ;;  %v7136_v7 = vand.u32 4294901760, %v7135_v57 }
 0x991   :  { %9384 = vmatmul.mubr.f32.vlgmr.msra.gmra.mxu1 %v7134_v51 }
 0x992   :  { %9398 = vmatpush3.msra.mxu1 %v11513_v52  ;;  %v7126_v12 = vand.u32 4294901760, %v7125_v3  ;;  %v7137_v5 = vsub.f32 %v7135_v57, %v7136_v7 }
 0x993   :  { %9399 = vmatprep.subr.mxu1 %v11521_v15 }
 0x994   :  { %9400 = vmatpush3.msra.mxu1 %v11521_v15  ;;  %9405 = vmatprep.mubr.f32.mxu1 %v7126_v12  ;;  %v7127_v56 = vsub.f32 %v7125_v3, %v7126_v12  ;;  %v7138_v31 = vand.u32 4294901760, %v7137_v5 }
 0x995   :  { %9401 = vmatprep.subr.mxu1 %v11534_v9 }
 0x996   :  { %9402 = vmatpush3.msra.mxu1 %v11534_v9  ;;  %v7128_v39 = vand.u32 4294901760, %v7127_v56 }
 0x997   :  { %9403 = vmatprep.subr.mxu1 %v11549_v29 }
 0x998   :  { %9404 = vmatpush3.msra.mxu1 %v11549_v29  ;;  %9372 = vmatprep.mubr.f32.mxu0 %v7128_v39 }
 0x999   :  { %9406 = vmatmul.mubr.f32.vlgmr.msra.gmra.mxu1 %v7136_v7  ;;  %9419 = vmatprep.subr.mxu1 %v11513_v52 }
 0x99a   :  { %9373 = vmatmul.mubr.f32.vlgmr.msra.gmra.mxu0 %v7138_v31  ;;  %9420 = vmatpush3.msra.mxu1 %v11513_v52 }
 0x99b   :  { %9387 = vmatpush3.msra.mxu0 %v11519_v38  ;;  %9427 = vmatprep.mubr.f32.mxu1 %v7124_v27  ;;  %v7693_v38 = vld [vmem:[%s11642_s4 + $0xe] ss:$0 sm:$0xff]  ;;  %s9513_s4 = smov [#allocation2]  }
 0x99c   :  { %9388 = vmatprep.subr.mxu0 %v11532_v25  ;;  %9394 = vmatprep.mubr.f32.mxu0 %v7125_v3  ;;  %s7656_s26 = sshll.u32 %s9513_s4, 4  ;;  %s7657_s26 = int_to_ptr.vmem [resolvable:$true] %s7656_s26 }
 0x99d   :  { %9421 = vmatprep.subr.mxu1 %v11521_v15  ;;  %9389 = vmatpush3.msra.mxu0 %v11532_v25  ;;  %s9485_s27 = scalar_lea.vmem %s7657_s26, 256  ;;  %p9490_p1 = scmp.lt.s32.totalorder %s7657_s26, %s7657_s26 }
 0x99e   :  { %9422 = vmatpush3.msra.mxu1 %v11521_v15  ;;  %9390 = vmatprep.subr.mxu0 %v11547_v42  ;;  %p9486_p0 = scmp.ne.s32.totalorder %s7657_s26, %s9485_s27  ;;  %p9491_p2 = scmp.lt.s32.totalorder %s9485_s27, %s9485_s27 }
 0x99f   :  { %9423 = vmatprep.subr.mxu1 %v11534_v9  ;;  %9391 = vmatpush3.msra.mxu0 %v11547_v42 }
 0x9a0   :  { %9424 = vmatpush3.msra.mxu1 %v11534_v9  ;;  %9392 = vmatprep.subr.mxu0 %v11559_v17  ;;  %p9492_p3 = por %p9491_p2, %p9490_p1 }
 0x9a1   :  { %9425 = vmatprep.subr.mxu1 %v11549_v29  ;;  %9393 = vmatpush3.msra.mxu0 %v11559_v17 }
 0x9a2   :  { %9426 = vmatpush3.msra.mxu1 %v11549_v29  ;;  %9395 = vmatmul.mubr.f32.vlgmr.msra.gmra.mxu0 %v7135_v57  ;;  %p9493_p4 = pnand %p9492_p3, %p9486_p0 }
 0x9a3   :  { %9408 = vmatprep.subr.mxu0 %v11529_v24  ;;  %9428 = vmatmul.mubr.f32.vlgmr.msra.gmra.mxu1 %v7134_v51 }
 0x9a4   :  { %9409 = vmatpush3.msra.mxu0 %v11529_v24  ;;  %9416 = vmatprep.mubr.f32.mxu0 %v7124_v27 }
 0x9a5   :  { %9410 = vmatprep.subr.mxu0 %v11544_v22 }
 0x9a6   :  { %9411 = vmatpush3.msra.mxu0 %v11544_v22 }
 0x9a7   :  { %9412 = vmatprep.subr.mxu0 %v11556_v28 }
 0x9a8   :  { %9413 = vmatpush3.msra.mxu0 %v11556_v28 }
 0x9a9   :  { %9414 = vmatprep.subr.mxu0 %v11566_v47 }
 0x9aa   :  { %9415 = vmatpush3.msra.mxu0 %v11566_v47 }
 0x9ab   :  { %9417 = vmatmul.mubr.f32.vlgmr.msra.gmra.mxu0 %v7134_v51 }
 0xa51   :  { %v9385_v15 = vpop.f32.mrf.mxu1 }
 0xa53   :  { %v7231_v22 = vpop.f32.mrf.mxu1 }
 0xa59   :  { %v9407_v17 = vpop.f32.mrf.mxu1 }
 0xa5a   :  { %v9374_v52 = vpop.f32.mrf.mxu0 }
 0xa5b   :  { %v7141_v25 = vadd.f32 %v9374_v52, %v7693_v38  ;;  %v7401_v30 = vpop.f32.mrf.mxu1 }
 0xa5c   :  { %v7130_v24 = vpop.f32.mrf.mxu0 }
 0xa5d   :  { %v7131_v9 = vadd.f32 %v7693_v38, %v7130_v24  ;;  %v7238_v29 = vadd.f32 %v9385_v15, %v7141_v25 }
 0xa5f   :  { %v7232_v2 = vadd.f32 %v7231_v22, %v7131_v9 }
 0xa62   :  { %v9396_v42 = vpop.f32.mrf.mxu0 }
 0xa63   :  { %v7325_v28 = vadd.f32 %v9396_v42, %v7238_v29  ;;  %v9429_v59 = vpop.f32.mrf.mxu1 }
 0xa64   :  { %v7317_v34 = vpop.f32.mrf.mxu0 }
 0xa65   :  { %v7318_v46 = vadd.f32 %v7317_v34, %v7232_v2  ;;  %v7410_v47 = vadd.f32 %v9407_v17, %v7325_v28  ;;  %v7573_v36 = vpop.f32.mrf.mxu1 }
 0xa67   :  { %v7402_v16 = vadd.f32 %v7401_v30, %v7318_v46 }
 0xa6b   :  { %v9418_v53 = vpop.f32.mrf.mxu0 }
 0xa6c   :  { %v7499_v23 = vadd.f32 %v9418_v53, %v7410_v47 }
 0xa6d   :  { %v7492_v33 = vpop.f32.mrf.mxu0 }
 0xa6e   :  { %v7580_v18 = vadd.f32 %v9429_v59, %v7499_v23  ;;  %v7493_v40 = vadd.f32 %v7492_v33, %v7402_v16 }
 0xa70   :  { %v7606_v63 = vmin.f32 %v7580_v18, 5.0  ;;  %v7574_v6 = vadd.f32 %v7573_v36, %v7493_v40  ;;  %v7604_v48 = vadd.f32 %v7602_v0, %v7580_v18 }
 0xa72   :  { %v7608_v43 = vadd.f32 %v7606_v63, %v11576_v13  ;;  %v7605_v11 = vmin.f32 %v7574_v6, 5.0 }
 0xa74   :  { %v7695_v41 = vmul.f32 -1.442695, %v7608_v43  ;;  %v7607_v54 = vadd.f32 %v7605_v11, %v11573_v44  ;;  %v7603_v44 = vadd.f32 %v7601_v21, %v7574_v6 }
 0xa76   :  { %9475 = vpow2.f32 %v7695_v41  ;;  %v7694_v32 = vmul.f32 -1.442695, %v7607_v54 }
 0xa78   :  { %9477 = vpow2.f32 %v7694_v32 }
 0xa83   :  { %v9476_v58 = vpop.eup %9475 }
 0xa84   :  { %v7616_v60 = vadd.f32 1.0, %v9476_v58 }
 0xa85   :  { %v9478_v62 = vpop.eup %9477 }
 0xa86   :  { %9479 = vrcp.f32 %v7616_v60  ;;  %v7615_v8 = vadd.f32 1.0, %v9478_v62 }
 0xa88   :  { %9481 = vrcp.f32 %v7615_v8 }
 0xa93   :  { %v9480_v19 = vpop.eup %9479 }
 0xa94   :  { %7630 = vperm.xlu1 %9449, %v9480_v19  }
 0xa95   :  { %v9482_v13 = vpop.eup %9481 }
 0xa96   :  { %7625 = vperm.xlu0 %9450, %v9482_v13  }
 0xa98   :  { %9451 = vset.pattern.permute.xlu1 %v11655_v37 }
 0xa99   :  { %7637 = vperm.xlu1 %9451, %v7603_v44  }
 0xa9a   :  { %9452 = vset.pattern.permute.xlu0 %v11655_v37 }
 0xa9b   :  { %9496 = shalt.err (!%p9493_p4)
}
 0xa9c   :  { %s9514_s28 = smov 128   ;;  %s9515_s29 = smov 8   ;;  %7642 = vperm.xlu0 %9452, %v7604_v48   ;;  %v11656_v1 = vld [vmem:[#allocation5_spill] sm:$0xff]  ;;  %v9516_v14 = vmov 0.5  }
 0xa9d   :  { %7662 = dma.vmem_to_hbm [thread:$0]  %s7657_s26, 256, %s11644_s6, [#allocation3], %s9514_s28, %s9514_s28, %s9515_s29   ;;  %vm7621_vm0 = vcmp.eq.s32.totalorder %v11656_v1, 0 }
 0xa9e   :  { %v7622_v10 = vsel %vm7621_vm0, -0.5, %v9516_v14 }
 0xb0f   :  { %v7631_v4 = vpop.permute.xlu1 %7630 }
 0xb10   :  { %v7634_v61 = vmul.f32 %v7631_v4, %v7622_v10 }
 0xb11   :  { %v7626_v49 = vpop.permute.xlu0 %7625 }
 0xb12   :  { %v7633_v35 = vmul.f32 %v7626_v49, %v7622_v10 }
 0xb14   :  { %v7638_v20 = vpop.permute.xlu1 %7637 }
 0xb15   :  { %v7645_v26 = vadd.f32 %v7638_v20, %v7633_v35 }
 0xb17   :  { %v7643_v51 = vpop.permute.xlu0 %7642  ;;  %7647 = vst.msk [vmem:[%s11643_s5] sm:$0xff] %vm1163_vm9, %v7645_v26 }
 0xb18   :  { %v7646_v45 = vadd.f32 %v7643_v51, %v7634_v61 }
 0xb1a   :  { %7648 = vst.msk [vmem:[%s11643_s5 + $0x8] sm:$0xff] %vm1163_vm9, %v7646_v45 }
 0xb1b   :  { %9505 = dma.done.wait [#allocation3], 256  }
 0xb1c   :  { %9506 = vsyncadd [#allocation3], 4294967040 }
 0xb1d   :  { %7668 = vsyncpa [#allocation3], 1 }

</bundles_post_ra>
